<compile_context>
chip_gen: v6e
topology: v6e:2x2x1
jax: 0.10.0
libtpu: 0.0.40
codegen_flags: <defaults>
</compile_context>

<pallas_src>
import numpy as np
import jax
import jax.numpy as jnp
from jax import lax
from jax.experimental import pallas as pl
from jax.experimental.pallas import tpu as pltpu


# ----------------------------------------------------------------------------
# In-kernel helpers (traced into the single fused kernel)
# ----------------------------------------------------------------------------
def _shift_matrix(h, dh, dtype):
    """(h, h) matrix S with (S @ x)[r] = x[r + dh], zero rows outside [0, h)."""
    r = lax.broadcasted_iota(jnp.int32, (h, h), 0)
    c = lax.broadcasted_iota(jnp.int32, (h, h), 1)
    return (c == r + dh).astype(dtype)


def _conv3x3(x, w_ref, b_ref, relu):
    """3x3 'same' conv on a (H, W*Cin) slab.

    w_ref: (3, W*Cin, W*Cout) banded weights; index 0/1/2 <-> kernel row kh,
    i.e. pairs with input rows r-1 / r / r+1.  b_ref: (1, W*Cout)."""
    h = x.shape[0]
    x_dn = jnp.dot(_shift_matrix(h, -1, x.dtype), x,
                   preferred_element_type=jnp.float32)          # row r -> x[r-1]
    x_up = jnp.dot(_shift_matrix(h, 1, x.dtype), x,
                   preferred_element_type=jnp.float32)          # row r -> x[r+1]
    y = (jnp.dot(x_dn, w_ref[0], preferred_element_type=jnp.float32)
         + jnp.dot(x, w_ref[1], preferred_element_type=jnp.float32)
         + jnp.dot(x_up, w_ref[2], preferred_element_type=jnp.float32)
         + b_ref[...])
    return jnp.maximum(y, 0.0) if relu else y


def _upsample(x, uh_ref, rw_ref=None):
    """Bilinear upsample of a (H, W*C) slab: U_h @ X [@ (U_w^T kron I_C)]."""
    y = jnp.dot(uh_ref[...], x, preferred_element_type=jnp.float32)
    if rw_ref is not None:
        y = jnp.dot(y, rw_ref[...], preferred_element_type=jnp.float32)
    return y


def _decoder_kernel(h_ref, dew_ref, deb_ref,
                    w1_ref, b1_ref, w2_ref, b2_ref, w3_ref, b3_ref,
                    w4_ref, b4_ref, w5_ref, b5_ref,
                    uh1_ref, uh2_ref, uh3_ref, uh4_ref, uh5_ref,
                    rw2_ref, rw3_ref, rw4_ref, rw5_ref,
                    de_ref, r_ref):
    # Linear(2, 16) + ReLU, produced directly as the (4, 4) one-channel image
    # (two VPU multiply-adds -- no dedicated matmul / kernel launch).
    hv = h_ref[0]                                                # (1, 2)
    x0 = dew_ref[0] * hv[:, 0:1] + dew_ref[1] * hv[:, 1:2] + deb_ref[...]
    x0 = jnp.maximum(x0, 0.0)                                    # (4, 4)
    de_ref[0] = x0.astype(de_ref.dtype)

    x = _conv3x3(x0, w1_ref, b1_ref, relu=True)                  # (4, 64)
    x = _upsample(x, uh1_ref)                                    # (8, 64)   scale (2,1)
    x = _conv3x3(x, w2_ref, b2_ref, relu=True)                   # (8, 64)
    x = _upsample(x, uh2_ref, rw2_ref)                           # (16, 128)
    x = _conv3x3(x, w3_ref, b3_ref, relu=True)                   # (16, 128)
    x = _upsample(x, uh3_ref, rw3_ref)                           # (32, 256)
    x = _conv3x3(x, w4_ref, b4_ref, relu=True)                   # (32, 256)
    x = _upsample(x, uh4_ref, rw4_ref)                           # (64, 512)
    x = _conv3x3(x, w5_ref, b5_ref, relu=False)                  # (64, 32)
    x = _upsample(x, uh5_ref, rw5_ref)                           # (128, 64)
    r_ref[0] = jax.nn.sigmoid(x).astype(r_ref.dtype)


# ----------------------------------------------------------------------------
# Host-side constant preparation (runs once at init; nothing here is per-call)
# ----------------------------------------------------------------------------
def _upsample_matrix(n_in, scale):
    """PyTorch bilinear (align_corners=False) 1-D interpolation matrix."""
    n_out = int(round(n_in * scale))
    m = np.zeros((n_out, n_in), np.float32)
    for i in range(n_out):
        src = max((i + 0.5) / scale - 0.5, 0.0)
        i0 = min(int(np.floor(src)), n_in - 1)
        i1 = min(i0 + 1, n_in - 1)
        lam = src - i0
        m[i, i0] += 1.0 - lam
        m[i, i1] += lam
    return m


def _conv_band_weight(w_pt, width):
    """Banded weight (3, W*Cin, W*Cout) for a 3x3 'same' conv on (H, W*C) slabs.

    ConvTranspose2d(k=3, s=1, p=1) == correlation with the spatially flipped
    kernel; w_pt has PyTorch layout (Cin, Cout, 3, 3).  Row index of band[kh]:
    w_in*Cin + ci ; column index: w_out*Cout + co ; nonzero iff |w_in-w_out|<=1.
    The band structure implements the W-direction zero padding for free."""
    w_pt = np.asarray(w_pt, np.float32)
    cin, cout = w_pt.shape[0], w_pt.shape[1]
    wf = np.flip(np.transpose(w_pt, (1, 0, 2, 3)), axis=(2, 3))  # (Cout,Cin,kh,kw)
    band = np.zeros((3, width * cin, width * cout), np.float32)
    for kh in range(3):
        for w_out in range(width):
            for dw in (-1, 0, 1):
                w_in = w_out + dw
                if 0 <= w_in < width:
                    band[kh,
                         w_in * cin:(w_in + 1) * cin,
                         w_out * cout:(w_out + 1) * cout] = wf[:, :, kh, dw + 1].T
    return band


def _conv_bias_row(b, width):
    b = np.asarray(b, np.float32)
    return np.tile(b, width).reshape(1, width * b.shape[0])


def _wup_matrix(w_in, scale, channels):
    """Right-multiply matrix (W*C, W2*C) for the W-direction bilinear upsample."""
    uw = _upsample_matrix(w_in, scale)                 # (w_out, w_in)
    return np.kron(uw.T, np.eye(channels, dtype=np.float32))


def prepare_constants(params):
    dew = np.asarray(params["de_w"], np.float32)       # (16, 2) torch Linear (out,in)
    deb = np.asarray(params["de_b"], np.float32)       # (16,)
    # TODO(synk): the module declares ConvTranspose2d(in_channels=10) but its own
    # forward feeds the 1-channel DE image (PyTorch would raise); we use
    # input-channel slice 0 of that weight so the pipeline is runnable.
    ct1_w = np.asarray(params["ct1_w"], np.float32)[:1]
    return {
        "dew": jnp.asarray(dew.T.reshape(2, 4, 4)),    # dew[k, r, w] = W[4r+w, k]
        "deb": jnp.asarray(deb.reshape(4, 4)),
        "w1": jnp.asarray(_conv_band_weight(ct1_w, 4)),
        "b1": jnp.asarray(_conv_bias_row(params["ct1_b"], 4)),
        "w2": jnp.asarray(_conv_band_weight(params["ct2_w"], 4)),
        "b2": jnp.asarray(_conv_bias_row(params["ct2_b"], 4)),
        "w3": jnp.asarray(_conv_band_weight(params["ct3_w"], 8)),
        "b3": jnp.asarray(_conv_bias_row(params["ct3_b"], 8)),
        "w4": jnp.asarray(_conv_band_weight(params["ct4_w"], 16)),
        "b4": jnp.asarray(_conv_bias_row(params["ct4_b"], 16)),
        "w5": jnp.asarray(_conv_band_weight(params["ct5_w"], 32)),
        "b5": jnp.asarray(_conv_bias_row(params["ct5_b"], 32)),
        "uh1": jnp.asarray(_upsample_matrix(4, 2)),    # (8, 4)
        "uh2": jnp.asarray(_upsample_matrix(8, 2)),    # (16, 8)
        "uh3": jnp.asarray(_upsample_matrix(16, 2)),   # (32, 16)
        "uh4": jnp.asarray(_upsample_matrix(32, 2)),   # (64, 32)
        "uh5": jnp.asarray(_upsample_matrix(64, 2)),   # (128, 64)
        "rw2": jnp.asarray(_wup_matrix(4, 2, 16)),     # (64, 128)
        "rw3": jnp.asarray(_wup_matrix(8, 2, 16)),     # (128, 256)
        "rw4": jnp.asarray(_wup_matrix(16, 2, 16)),    # (256, 512)
        "rw5": jnp.asarray(_wup_matrix(32, 2, 1)),     # (32, 64)
    }


_CONST_KEYS = ("dew", "deb", "w1", "b1", "w2", "b2", "w3", "b3", "w4", "b4",
               "w5", "b5", "uh1", "uh2", "uh3", "uh4", "uh5",
               "rw2", "rw3", "rw4", "rw5")


# ----------------------------------------------------------------------------
# Forward pass: one pallas_call, batch on the (parallel) grid axis
# ----------------------------------------------------------------------------
@jax.jit
def decoder_forward(consts, h):
    """Matches Decoder.forward: returns (DE (B,1,4,4), r (B,1,128,64))."""
    B = h.shape[0]
    h3 = h.astype(jnp.float32).reshape(B, 1, 2)
    operands = [consts[k] for k in _CONST_KEYS]

    def const_spec(a):
        if a.ndim == 2:
            return pl.BlockSpec(a.shape, lambda n: (0, 0))
        return pl.BlockSpec(a.shape, lambda n: (0, 0, 0))

    de, r = pl.pallas_call(
        _decoder_kernel,
        out_shape=(jax.ShapeDtypeStruct((B, 4, 4), jnp.float32),
                   jax.ShapeDtypeStruct((B, 128, 64), jnp.float32)),
        grid_spec=pltpu.PrefetchScalarGridSpec(
            num_scalar_prefetch=0,
            grid=(B,),
            in_specs=[pl.BlockSpec((1, 1, 2), lambda n: (n, 0, 0))]
                     + [const_spec(a) for a in operands],
            out_specs=[pl.BlockSpec((1, 4, 4), lambda n: (n, 0, 0)),
                       pl.BlockSpec((1, 128, 64), lambda n: (n, 0, 0))],
        ),
        compiler_params=pltpu.CompilerParams(
            dimension_semantics=("parallel",),   # v7x: one batch element per TensorCore
            vmem_limit_bytes=32 * 1024 * 1024,
        ),
    )(h3, *operands)

    return de.reshape(B, 1, 4, 4), r.reshape(B, 1, 128, 64)


# ----------------------------------------------------------------------------
# Parameters (deterministic synthetic init, PyTorch layouts from __init__)
# ----------------------------------------------------------------------------
def init_params():
    keys = jax.random.split(jax.random.PRNGKey(0), 12)
    n = lambda k, s: 0.1 * jax.random.normal(k, s, dtype=jnp.float32)
    return {
        "de_w": n(keys[0], (16, 2)),          # nn.Linear(2, 16) weight (out, in)
        "de_b": n(keys[1], (16,)),
        "ct1_w": n(keys[2], (10, 16, 3, 3)),  # ConvTranspose2d(10, 16, 3, pad=1)
        "ct1_b": n(keys[3], (16,)),
        "ct2_w": n(keys[4], (16, 16, 3, 3)),
        "ct2_b": n(keys[5], (16,)),
        "ct3_w": n(keys[6], (16, 16, 3, 3)),
        "ct3_b": n(keys[7], (16,)),
        "ct4_w": n(keys[8], (16, 16, 3, 3)),
        "ct4_b": n(keys[9], (16,)),
        "ct5_w": n(keys[10], (16, 1, 3, 3)),
        "ct5_b": n(keys[11], (1,)),
    }


# ----------------------------------------------------------------------------
# Pure-XLA reference (numerical cross-check only; not on the hot path)
# ----------------------------------------------------------------------------
def reference_forward(params, h):
    hp = lax.Precision.HIGHEST
    de = jax.nn.relu(h @ params["de_w"].T + params["de_b"])
    de_img = de.reshape(-1, 1, 4, 4)

    def conv(x, w_pt, b, relu):
        wf = jnp.flip(jnp.transpose(w_pt, (1, 0, 2, 3)), axis=(2, 3))
        y = lax.conv_general_dilated(x, wf, (1, 1), ((1, 1), (1, 1)),
                                     dimension_numbers=("NCHW", "OIHW", "NCHW"),
                                     precision=hp)
        y = y + b.reshape(1, -1, 1, 1)
        return jax.nn.relu(y) if relu else y

    def up(x, w_scale):
        uh = jnp.asarray(_upsample_matrix(x.shape[2], 2))
        y = jnp.einsum("pr,ncrw->ncpw", uh, x, precision=hp)
        if w_scale != 1:
            uw = jnp.asarray(_upsample_matrix(x.shape[3], w_scale))
            y = jnp.einsum("qw,ncpw->ncpq", uw, y, precision=hp)
        return y

    x = conv(de_img, params["ct1_w"][:1], params["ct1_b"], True)
    x = up(x, 1)
    x = conv(x, params["ct2_w"], params["ct2_b"], True)
    x = up(x, 2)
    x = conv(x, params["ct3_w"], params["ct3_b"], True)
    x = up(x, 2)
    x = conv(x, params["ct4_w"], params["ct4_b"], True)
    x = up(x, 2)
    x = conv(x, params["ct5_w"], params["ct5_b"], False)
    x = up(x, 2)
    return de_img, jax.nn.sigmoid(x)


if __name__ == "__main__":
    params = init_params()
    consts = prepare_constants(params)
    h = jax.random.normal(jax.random.PRNGKey(0), (2, 2), dtype=jnp.float32)

    de, r = decoder_forward(consts, h)
    jax.block_until_ready((de, r))

    assert de.shape == (2, 1, 4, 4) and de.dtype == jnp.float32
    assert r.shape == (2, 1, 128, 64) and r.dtype == jnp.float32
    assert bool(jnp.all(jnp.isfinite(de)))
    assert bool(jnp.all((r >= 0.0) & (r <= 1.0)))

    de_ref, r_ref = reference_forward(params, h)
    assert bool(jnp.max(jnp.abs(de - de_ref)) < 1e-3)
    assert bool(jnp.max(jnp.abs(r - r_ref)) < 5e-3)

    print("KERNEL_OK")
</pallas_src>

<mosaic_0001>
module attributes {stable_mosaic.version = 11 : i64} {
  func.func @_decoder_kernel(%arg0: i32, %arg1: memref<1x1x2xf32, #tpu.memory_space<vmem>>, %arg2: memref<2x4x4xf32, #tpu.memory_space<vmem>>, %arg3: memref<4x4xf32, #tpu.memory_space<vmem>>, %arg4: memref<3x4x64xf32, #tpu.memory_space<vmem>>, %arg5: memref<1x64xf32, #tpu.memory_space<vmem>>, %arg6: memref<3x64x64xf32, #tpu.memory_space<vmem>>, %arg7: memref<1x64xf32, #tpu.memory_space<vmem>>, %arg8: memref<3x128x128xf32, #tpu.memory_space<vmem>>, %arg9: memref<1x128xf32, #tpu.memory_space<vmem>>, %arg10: memref<3x256x256xf32, #tpu.memory_space<vmem>>, %arg11: memref<1x256xf32, #tpu.memory_space<vmem>>, %arg12: memref<3x512x32xf32, #tpu.memory_space<vmem>>, %arg13: memref<1x32xf32, #tpu.memory_space<vmem>>, %arg14: memref<8x4xf32, #tpu.memory_space<vmem>>, %arg15: memref<16x8xf32, #tpu.memory_space<vmem>>, %arg16: memref<32x16xf32, #tpu.memory_space<vmem>>, %arg17: memref<64x32xf32, #tpu.memory_space<vmem>>, %arg18: memref<128x64xf32, #tpu.memory_space<vmem>>, %arg19: memref<64x128xf32, #tpu.memory_space<vmem>>, %arg20: memref<128x256xf32, #tpu.memory_space<vmem>>, %arg21: memref<256x512xf32, #tpu.memory_space<vmem>>, %arg22: memref<32x64xf32, #tpu.memory_space<vmem>>, %arg23: memref<1x4x4xf32, #tpu.memory_space<vmem>>, %arg24: memref<1x128x64xf32, #tpu.memory_space<vmem>>) attributes {dimension_semantics = [#tpu.dimension_semantics<parallel>], iteration_bounds = array<i64: 2>, scalar_prefetch = 0 : i64, scratch_operands = 0 : i64, tpu.core_type = #tpu.core_type<tc>, window_params = [{transform_indices = @transform_0, window_bounds = array<i64: 1, 1, 2>}, {pipeline_mode = #tpu.pipeline_mode<synchronous>, transform_indices = @transform_1, window_bounds = array<i64: 2, 4, 4>}, {pipeline_mode = #tpu.pipeline_mode<synchronous>, transform_indices = @transform_2, window_bounds = array<i64: 4, 4>}, {pipeline_mode = #tpu.pipeline_mode<synchronous>, transform_indices = @transform_3, window_bounds = array<i64: 3, 4, 64>}, {pipeline_mode = #tpu.pipeline_mode<synchronous>, transform_indices = @transform_4, window_bounds = array<i64: 1, 64>}, {pipeline_mode = #tpu.pipeline_mode<synchronous>, transform_indices = @transform_5, window_bounds = array<i64: 3, 64, 64>}, {pipeline_mode = #tpu.pipeline_mode<synchronous>, transform_indices = @transform_6, window_bounds = array<i64: 1, 64>}, {pipeline_mode = #tpu.pipeline_mode<synchronous>, transform_indices = @transform_7, window_bounds = array<i64: 3, 128, 128>}, {pipeline_mode = #tpu.pipeline_mode<synchronous>, transform_indices = @transform_8, window_bounds = array<i64: 1, 128>}, {pipeline_mode = #tpu.pipeline_mode<synchronous>, transform_indices = @transform_9, window_bounds = array<i64: 3, 256, 256>}, {pipeline_mode = #tpu.pipeline_mode<synchronous>, transform_indices = @transform_10, window_bounds = array<i64: 1, 256>}, {pipeline_mode = #tpu.pipeline_mode<synchronous>, transform_indices = @transform_11, window_bounds = array<i64: 3, 512, 32>}, {pipeline_mode = #tpu.pipeline_mode<synchronous>, transform_indices = @transform_12, window_bounds = array<i64: 1, 32>}, {pipeline_mode = #tpu.pipeline_mode<synchronous>, transform_indices = @transform_13, window_bounds = array<i64: 8, 4>}, {pipeline_mode = #tpu.pipeline_mode<synchronous>, transform_indices = @transform_14, window_bounds = array<i64: 16, 8>}, {pipeline_mode = #tpu.pipeline_mode<synchronous>, transform_indices = @transform_15, window_bounds = array<i64: 32, 16>}, {pipeline_mode = #tpu.pipeline_mode<synchronous>, transform_indices = @transform_16, window_bounds = array<i64: 64, 32>}, {pipeline_mode = #tpu.pipeline_mode<synchronous>, transform_indices = @transform_17, window_bounds = array<i64: 128, 64>}, {pipeline_mode = #tpu.pipeline_mode<synchronous>, transform_indices = @transform_18, window_bounds = array<i64: 64, 128>}, {pipeline_mode = #tpu.pipeline_mode<synchronous>, transform_indices = @transform_19, window_bounds = array<i64: 128, 256>}, {pipeline_mode = #tpu.pipeline_mode<synchronous>, transform_indices = @transform_20, window_bounds = array<i64: 256, 512>}, {pipeline_mode = #tpu.pipeline_mode<synchronous>, transform_indices = @transform_21, window_bounds = array<i64: 32, 64>}, {transform_indices = @transform_22, window_bounds = array<i64: 1, 4, 4>}, {transform_indices = @transform_23, window_bounds = array<i64: 1, 128, 64>}]} {
    %c0 = arith.constant 0 : index
    %c0_0 = arith.constant 0 : index
    %c0_1 = arith.constant 0 : index
    %0 = vector.load %arg1[%c0, %c0_0, %c0_1] : memref<1x1x2xf32, #tpu.memory_space<vmem>>, vector<1x1x2xf32>
    %1 = vector.shape_cast %0 : vector<1x1x2xf32> to vector<1x2xf32>
    %c0_2 = arith.constant 0 : index
    %c0_3 = arith.constant 0 : index
    %c0_4 = arith.constant 0 : index
    %2 = vector.load %arg2[%c0_2, %c0_3, %c0_4] : memref<2x4x4xf32, #tpu.memory_space<vmem>>, vector<1x4x4xf32>
    %3 = vector.shape_cast %2 : vector<1x4x4xf32> to vector<4x4xf32>
    %4 = vector.extract_strided_slice %1 {offsets = [0, 0], sizes = [1, 1], strides = [1, 1]} : vector<1x2xf32> to vector<1x1xf32>
    %5 = vector.broadcast %4 : vector<1x1xf32> to vector<4x4xf32>
    %6 = arith.mulf %3, %5 : vector<4x4xf32>
    %c1 = arith.constant 1 : index
    %c0_5 = arith.constant 0 : index
    %c0_6 = arith.constant 0 : index
    %7 = vector.load %arg2[%c1, %c0_5, %c0_6] : memref<2x4x4xf32, #tpu.memory_space<vmem>>, vector<1x4x4xf32>
    %8 = vector.shape_cast %7 : vector<1x4x4xf32> to vector<4x4xf32>
    %9 = vector.extract_strided_slice %1 {offsets = [0, 1], sizes = [1, 1], strides = [1, 1]} : vector<1x2xf32> to vector<1x1xf32>
    %10 = vector.broadcast %9 : vector<1x1xf32> to vector<4x4xf32>
    %11 = arith.mulf %8, %10 : vector<4x4xf32>
    %12 = arith.addf %6, %11 : vector<4x4xf32>
    %c0_7 = arith.constant 0 : index
    %c0_8 = arith.constant 0 : index
    %13 = vector.load %arg3[%c0_7, %c0_8] : memref<4x4xf32, #tpu.memory_space<vmem>>, vector<4x4xf32>
    %14 = arith.addf %12, %13 : vector<4x4xf32>
    %cst = arith.constant 0.000000e+00 : f32
    %15 = vector.broadcast %cst : f32 to vector<4x4xf32>
    %16 = arith.maximumf %14, %15 : vector<4x4xf32>
    %c0_9 = arith.constant 0 : index
    %c0_10 = arith.constant 0 : index
    %c0_11 = arith.constant 0 : index
    %17 = vector.load %arg23[%c0_9, %c0_10, %c0_11] : memref<1x4x4xf32, #tpu.memory_space<vmem>>, vector<1x4x4xf32>
    %18 = vector.shape_cast %17 : vector<1x4x4xf32> to vector<4x4xf32>
    %19 = vector.shape_cast %16 : vector<4x4xf32> to vector<1x4x4xf32>
    tpu.vector_store %arg23[%c0_9, %c0_10, %c0_11], %19 {strides = array<i32>} : memref<1x4x4xf32, #tpu.memory_space<vmem>>, vector<1x4x4xf32>,
    %20 = tpu.iota {dimensions = array<i32: 0>} : vector<4x4xi32>
    %21 = tpu.iota {dimensions = array<i32: 1>} : vector<4x4xi32>
    %c-1_i32 = arith.constant -1 : i32
    %22 = vector.broadcast %c-1_i32 : i32 to vector<4x4xi32>
    %23 = arith.addi %20, %22 : vector<4x4xi32>
    %24 = arith.cmpi eq, %21, %23 : vector<4x4xi32>
    %25 = arith.extui %24 : vector<4x4xi1> to vector<4x4xi32>
    %26 = arith.sitofp %25 : vector<4x4xi32> to vector<4x4xf32>
    %cst_12 = arith.constant dense<0.000000e+00> : vector<4x4xf32>
    %27 = tpu.matmul %26, %16, %cst_12 {dimension_numbers = #tpu.dot_dimension_numbers<[1], [0], [0], [1], [0, 0, 1, 1], [], []>} : vector<4x4xf32>, vector<4x4xf32>, vector<4x4xf32> -> vector<4x4xf32>
    %28 = tpu.iota {dimensions = array<i32: 0>} : vector<4x4xi32>
    %29 = tpu.iota {dimensions = array<i32: 1>} : vector<4x4xi32>
    %c1_i32 = arith.constant 1 : i32
    %30 = vector.broadcast %c1_i32 : i32 to vector<4x4xi32>
    %31 = arith.addi %28, %30 : vector<4x4xi32>
    %32 = arith.cmpi eq, %29, %31 : vector<4x4xi32>
    %33 = arith.extui %32 : vector<4x4xi1> to vector<4x4xi32>
    %34 = arith.sitofp %33 : vector<4x4xi32> to vector<4x4xf32>
    %cst_13 = arith.constant dense<0.000000e+00> : vector<4x4xf32>
    %35 = tpu.matmul %34, %16, %cst_13 {dimension_numbers = #tpu.dot_dimension_numbers<[1], [0], [0], [1], [0, 0, 1, 1], [], []>} : vector<4x4xf32>, vector<4x4xf32>, vector<4x4xf32> -> vector<4x4xf32>
    %c0_14 = arith.constant 0 : index
    %c0_15 = arith.constant 0 : index
    %c0_16 = arith.constant 0 : index
    %36 = vector.load %arg4[%c0_14, %c0_15, %c0_16] : memref<3x4x64xf32, #tpu.memory_space<vmem>>, vector<1x4x64xf32>
    %37 = vector.shape_cast %36 : vector<1x4x64xf32> to vector<4x64xf32>
    %cst_17 = arith.constant dense<0.000000e+00> : vector<4x64xf32>
    %38 = tpu.matmul %27, %37, %cst_17 {dimension_numbers = #tpu.dot_dimension_numbers<[1], [0], [0], [1], [0, 0, 1, 1], [], []>} : vector<4x4xf32>, vector<4x64xf32>, vector<4x64xf32> -> vector<4x64xf32>
    %c1_18 = arith.constant 1 : index
    %c0_19 = arith.constant 0 : index
    %c0_20 = arith.constant 0 : index
    %39 = vector.load %arg4[%c1_18, %c0_19, %c0_20] : memref<3x4x64xf32, #tpu.memory_space<vmem>>, vector<1x4x64xf32>
    %40 = vector.shape_cast %39 : vector<1x4x64xf32> to vector<4x64xf32>
    %cst_21 = arith.constant dense<0.000000e+00> : vector<4x64xf32>
    %41 = tpu.matmul %16, %40, %cst_21 {dimension_numbers = #tpu.dot_dimension_numbers<[1], [0], [0], [1], [0, 0, 1, 1], [], []>} : vector<4x4xf32>, vector<4x64xf32>, vector<4x64xf32> -> vector<4x64xf32>
    %42 = arith.addf %38, %41 : vector<4x64xf32>
    %c2 = arith.constant 2 : index
    %c0_22 = arith.constant 0 : index
    %c0_23 = arith.constant 0 : index
    %43 = vector.load %arg4[%c2, %c0_22, %c0_23] : memref<3x4x64xf32, #tpu.memory_space<vmem>>, vector<1x4x64xf32>
    %44 = vector.shape_cast %43 : vector<1x4x64xf32> to vector<4x64xf32>
    %cst_24 = arith.constant dense<0.000000e+00> : vector<4x64xf32>
    %45 = tpu.matmul %35, %44, %cst_24 {dimension_numbers = #tpu.dot_dimension_numbers<[1], [0], [0], [1], [0, 0, 1, 1], [], []>} : vector<4x4xf32>, vector<4x64xf32>, vector<4x64xf32> -> vector<4x64xf32>
    %46 = arith.addf %42, %45 : vector<4x64xf32>
    %c0_25 = arith.constant 0 : index
    %c0_26 = arith.constant 0 : index
    %47 = vector.load %arg5[%c0_25, %c0_26] : memref<1x64xf32, #tpu.memory_space<vmem>>, vector<1x64xf32>
    %48 = vector.broadcast %47 : vector<1x64xf32> to vector<4x64xf32>
    %49 = arith.addf %46, %48 : vector<4x64xf32>
    %cst_27 = arith.constant 0.000000e+00 : f32
    %50 = vector.broadcast %cst_27 : f32 to vector<4x64xf32>
    %51 = arith.maximumf %49, %50 : vector<4x64xf32>
    %c0_28 = arith.constant 0 : index
    %c0_29 = arith.constant 0 : index
    %52 = vector.load %arg14[%c0_28, %c0_29] : memref<8x4xf32, #tpu.memory_space<vmem>>, vector<8x4xf32>
    %cst_30 = arith.constant dense<0.000000e+00> : vector<8x64xf32>
    %53 = tpu.matmul %52, %51, %cst_30 {dimension_numbers = #tpu.dot_dimension_numbers<[1], [0], [0], [1], [0, 0, 1, 1], [], []>} : vector<8x4xf32>, vector<4x64xf32>, vector<8x64xf32> -> vector<8x64xf32>
    %54 = tpu.iota {dimensions = array<i32: 0>} : vector<8x8xi32>
    %55 = tpu.iota {dimensions = array<i32: 1>} : vector<8x8xi32>
    %c-1_i32_31 = arith.constant -1 : i32
    %56 = vector.broadcast %c-1_i32_31 : i32 to vector<8x8xi32>
    %57 = arith.addi %54, %56 : vector<8x8xi32>
    %58 = arith.cmpi eq, %55, %57 : vector<8x8xi32>
    %59 = arith.extui %58 : vector<8x8xi1> to vector<8x8xi32>
    %60 = arith.sitofp %59 : vector<8x8xi32> to vector<8x8xf32>
    %cst_32 = arith.constant dense<0.000000e+00> : vector<8x64xf32>
    %61 = tpu.matmul %60, %53, %cst_32 {dimension_numbers = #tpu.dot_dimension_numbers<[1], [0], [0], [1], [0, 0, 1, 1], [], []>} : vector<8x8xf32>, vector<8x64xf32>, vector<8x64xf32> -> vector<8x64xf32>
    %62 = tpu.iota {dimensions = array<i32: 0>} : vector<8x8xi32>
    %63 = tpu.iota {dimensions = array<i32: 1>} : vector<8x8xi32>
    %c1_i32_33 = arith.constant 1 : i32
    %64 = vector.broadcast %c1_i32_33 : i32 to vector<8x8xi32>
    %65 = arith.addi %62, %64 : vector<8x8xi32>
    %66 = arith.cmpi eq, %63, %65 : vector<8x8xi32>
    %67 = arith.extui %66 : vector<8x8xi1> to vector<8x8xi32>
    %68 = arith.sitofp %67 : vector<8x8xi32> to vector<8x8xf32>
    %cst_34 = arith.constant dense<0.000000e+00> : vector<8x64xf32>
    %69 = tpu.matmul %68, %53, %cst_34 {dimension_numbers = #tpu.dot_dimension_numbers<[1], [0], [0], [1], [0, 0, 1, 1], [], []>} : vector<8x8xf32>, vector<8x64xf32>, vector<8x64xf32> -> vector<8x64xf32>
    %c0_35 = arith.constant 0 : index
    %c0_36 = arith.constant 0 : index
    %c0_37 = arith.constant 0 : index
    %70 = vector.load %arg6[%c0_35, %c0_36, %c0_37] : memref<3x64x64xf32, #tpu.memory_space<vmem>>, vector<1x64x64xf32>
    %71 = vector.shape_cast %70 : vector<1x64x64xf32> to vector<64x64xf32>
    %cst_38 = arith.constant dense<0.000000e+00> : vector<8x64xf32>
    %72 = tpu.matmul %61, %71, %cst_38 {dimension_numbers = #tpu.dot_dimension_numbers<[1], [0], [0], [1], [0, 0, 1, 1], [], []>} : vector<8x64xf32>, vector<64x64xf32>, vector<8x64xf32> -> vector<8x64xf32>
    %c1_39 = arith.constant 1 : index
    %c0_40 = arith.constant 0 : index
    %c0_41 = arith.constant 0 : index
    %73 = vector.load %arg6[%c1_39, %c0_40, %c0_41] : memref<3x64x64xf32, #tpu.memory_space<vmem>>, vector<1x64x64xf32>
    %74 = vector.shape_cast %73 : vector<1x64x64xf32> to vector<64x64xf32>
    %cst_42 = arith.constant dense<0.000000e+00> : vector<8x64xf32>
    %75 = tpu.matmul %53, %74, %cst_42 {dimension_numbers = #tpu.dot_dimension_numbers<[1], [0], [0], [1], [0, 0, 1, 1], [], []>} : vector<8x64xf32>, vector<64x64xf32>, vector<8x64xf32> -> vector<8x64xf32>
    %76 = arith.addf %72, %75 : vector<8x64xf32>
    %c2_43 = arith.constant 2 : index
    %c0_44 = arith.constant 0 : index
    %c0_45 = arith.constant 0 : index
    %77 = vector.load %arg6[%c2_43, %c0_44, %c0_45] : memref<3x64x64xf32, #tpu.memory_space<vmem>>, vector<1x64x64xf32>
    %78 = vector.shape_cast %77 : vector<1x64x64xf32> to vector<64x64xf32>
    %cst_46 = arith.constant dense<0.000000e+00> : vector<8x64xf32>
    %79 = tpu.matmul %69, %78, %cst_46 {dimension_numbers = #tpu.dot_dimension_numbers<[1], [0], [0], [1], [0, 0, 1, 1], [], []>} : vector<8x64xf32>, vector<64x64xf32>, vector<8x64xf32> -> vector<8x64xf32>
    %80 = arith.addf %76, %79 : vector<8x64xf32>
    %c0_47 = arith.constant 0 : index
    %c0_48 = arith.constant 0 : index
    %81 = vector.load %arg7[%c0_47, %c0_48] : memref<1x64xf32, #tpu.memory_space<vmem>>, vector<1x64xf32>
    %82 = vector.broadcast %81 : vector<1x64xf32> to vector<8x64xf32>
    %83 = arith.addf %80, %82 : vector<8x64xf32>
    %cst_49 = arith.constant 0.000000e+00 : f32
    %84 = vector.broadcast %cst_49 : f32 to vector<8x64xf32>
    %85 = arith.maximumf %83, %84 : vector<8x64xf32>
    %c0_50 = arith.constant 0 : index
    %c0_51 = arith.constant 0 : index
    %86 = vector.load %arg15[%c0_50, %c0_51] : memref<16x8xf32, #tpu.memory_space<vmem>>, vector<16x8xf32>
    %cst_52 = arith.constant dense<0.000000e+00> : vector<16x64xf32>
    %87 = tpu.matmul %86, %85, %cst_52 {dimension_numbers = #tpu.dot_dimension_numbers<[1], [0], [0], [1], [0, 0, 1, 1], [], []>} : vector<16x8xf32>, vector<8x64xf32>, vector<16x64xf32> -> vector<16x64xf32>
    %c0_53 = arith.constant 0 : index
    %c0_54 = arith.constant 0 : index
    %88 = vector.load %arg19[%c0_53, %c0_54] : memref<64x128xf32, #tpu.memory_space<vmem>>, vector<64x128xf32>
    %cst_55 = arith.constant dense<0.000000e+00> : vector<16x128xf32>
    %89 = tpu.matmul %87, %88, %cst_55 {dimension_numbers = #tpu.dot_dimension_numbers<[1], [0], [0], [1], [0, 0, 1, 1], [], []>} : vector<16x64xf32>, vector<64x128xf32>, vector<16x128xf32> -> vector<16x128xf32>
    %90 = tpu.iota {dimensions = array<i32: 0>} : vector<16x16xi32>
    %91 = tpu.iota {dimensions = array<i32: 1>} : vector<16x16xi32>
    %c-1_i32_56 = arith.constant -1 : i32
    %92 = vector.broadcast %c-1_i32_56 : i32 to vector<16x16xi32>
    %93 = arith.addi %90, %92 : vector<16x16xi32>
    %94 = arith.cmpi eq, %91, %93 : vector<16x16xi32>
    %95 = arith.extui %94 : vector<16x16xi1> to vector<16x16xi32>
    %96 = arith.sitofp %95 : vector<16x16xi32> to vector<16x16xf32>
    %cst_57 = arith.constant dense<0.000000e+00> : vector<16x128xf32>
    %97 = tpu.matmul %96, %89, %cst_57 {dimension_numbers = #tpu.dot_dimension_numbers<[1], [0], [0], [1], [0, 0, 1, 1], [], []>} : vector<16x16xf32>, vector<16x128xf32>, vector<16x128xf32> -> vector<16x128xf32>
    %98 = tpu.iota {dimensions = array<i32: 0>} : vector<16x16xi32>
    %99 = tpu.iota {dimensions = array<i32: 1>} : vector<16x16xi32>
    %c1_i32_58 = arith.constant 1 : i32
    %100 = vector.broadcast %c1_i32_58 : i32 to vector<16x16xi32>
    %101 = arith.addi %98, %100 : vector<16x16xi32>
    %102 = arith.cmpi eq, %99, %101 : vector<16x16xi32>
    %103 = arith.extui %102 : vector<16x16xi1> to vector<16x16xi32>
    %104 = arith.sitofp %103 : vector<16x16xi32> to vector<16x16xf32>
    %cst_59 = arith.constant dense<0.000000e+00> : vector<16x128xf32>
    %105 = tpu.matmul %104, %89, %cst_59 {dimension_numbers = #tpu.dot_dimension_numbers<[1], [0], [0], [1], [0, 0, 1, 1], [], []>} : vector<16x16xf32>, vector<16x128xf32>, vector<16x128xf32> -> vector<16x128xf32>
    %c0_60 = arith.constant 0 : index
    %c0_61 = arith.constant 0 : index
    %c0_62 = arith.constant 0 : index
    %106 = vector.load %arg8[%c0_60, %c0_61, %c0_62] : memref<3x128x128xf32, #tpu.memory_space<vmem>>, vector<1x128x128xf32>
    %107 = vector.shape_cast %106 : vector<1x128x128xf32> to vector<128x128xf32>
    %cst_63 = arith.constant dense<0.000000e+00> : vector<16x128xf32>
    %108 = tpu.matmul %97, %107, %cst_63 {dimension_numbers = #tpu.dot_dimension_numbers<[1], [0], [0], [1], [0, 0, 1, 1], [], []>} : vector<16x128xf32>, vector<128x128xf32>, vector<16x128xf32> -> vector<16x128xf32>
    %c1_64 = arith.constant 1 : index
    %c0_65 = arith.constant 0 : index
    %c0_66 = arith.constant 0 : index
    %109 = vector.load %arg8[%c1_64, %c0_65, %c0_66] : memref<3x128x128xf32, #tpu.memory_space<vmem>>, vector<1x128x128xf32>
    %110 = vector.shape_cast %109 : vector<1x128x128xf32> to vector<128x128xf32>
    %cst_67 = arith.constant dense<0.000000e+00> : vector<16x128xf32>
    %111 = tpu.matmul %89, %110, %cst_67 {dimension_numbers = #tpu.dot_dimension_numbers<[1], [0], [0], [1], [0, 0, 1, 1], [], []>} : vector<16x128xf32>, vector<128x128xf32>, vector<16x128xf32> -> vector<16x128xf32>
    %112 = arith.addf %108, %111 : vector<16x128xf32>
    %c2_68 = arith.constant 2 : index
    %c0_69 = arith.constant 0 : index
    %c0_70 = arith.constant 0 : index
    %113 = vector.load %arg8[%c2_68, %c0_69, %c0_70] : memref<3x128x128xf32, #tpu.memory_space<vmem>>, vector<1x128x128xf32>
    %114 = vector.shape_cast %113 : vector<1x128x128xf32> to vector<128x128xf32>
    %cst_71 = arith.constant dense<0.000000e+00> : vector<16x128xf32>
    %115 = tpu.matmul %105, %114, %cst_71 {dimension_numbers = #tpu.dot_dimension_numbers<[1], [0], [0], [1], [0, 0, 1, 1], [], []>} : vector<16x128xf32>, vector<128x128xf32>, vector<16x128xf32> -> vector<16x128xf32>
    %116 = arith.addf %112, %115 : vector<16x128xf32>
    %c0_72 = arith.constant 0 : index
    %c0_73 = arith.constant 0 : index
    %117 = vector.load %arg9[%c0_72, %c0_73] : memref<1x128xf32, #tpu.memory_space<vmem>>, vector<1x128xf32>
    %118 = vector.broadcast %117 : vector<1x128xf32> to vector<16x128xf32>
    %119 = arith.addf %116, %118 : vector<16x128xf32>
    %cst_74 = arith.constant 0.000000e+00 : f32
    %120 = vector.broadcast %cst_74 : f32 to vector<16x128xf32>
    %121 = arith.maximumf %119, %120 : vector<16x128xf32>
    %c0_75 = arith.constant 0 : index
    %c0_76 = arith.constant 0 : index
    %122 = vector.load %arg16[%c0_75, %c0_76] : memref<32x16xf32, #tpu.memory_space<vmem>>, vector<32x16xf32>
    %cst_77 = arith.constant dense<0.000000e+00> : vector<32x128xf32>
    %123 = tpu.matmul %122, %121, %cst_77 {dimension_numbers = #tpu.dot_dimension_numbers<[1], [0], [0], [1], [0, 0, 1, 1], [], []>} : vector<32x16xf32>, vector<16x128xf32>, vector<32x128xf32> -> vector<32x128xf32>
    %c0_78 = arith.constant 0 : index
    %c0_79 = arith.constant 0 : index
    %124 = vector.load %arg20[%c0_78, %c0_79] : memref<128x256xf32, #tpu.memory_space<vmem>>, vector<128x256xf32>
    %cst_80 = arith.constant dense<0.000000e+00> : vector<32x256xf32>
    %125 = tpu.matmul %123, %124, %cst_80 {dimension_numbers = #tpu.dot_dimension_numbers<[1], [0], [0], [1], [0, 0, 1, 1], [], []>} : vector<32x128xf32>, vector<128x256xf32>, vector<32x256xf32> -> vector<32x256xf32>
    %126 = tpu.iota {dimensions = array<i32: 0>} : vector<32x32xi32>
    %127 = tpu.iota {dimensions = array<i32: 1>} : vector<32x32xi32>
    %c-1_i32_81 = arith.constant -1 : i32
    %128 = vector.broadcast %c-1_i32_81 : i32 to vector<32x32xi32>
    %129 = arith.addi %126, %128 : vector<32x32xi32>
    %130 = arith.cmpi eq, %127, %129 : vector<32x32xi32>
    %131 = arith.extui %130 : vector<32x32xi1> to vector<32x32xi32>
    %132 = arith.sitofp %131 : vector<32x32xi32> to vector<32x32xf32>
    %cst_82 = arith.constant dense<0.000000e+00> : vector<32x256xf32>
    %133 = tpu.matmul %132, %125, %cst_82 {dimension_numbers = #tpu.dot_dimension_numbers<[1], [0], [0], [1], [0, 0, 1, 1], [], []>} : vector<32x32xf32>, vector<32x256xf32>, vector<32x256xf32> -> vector<32x256xf32>
    %134 = tpu.iota {dimensions = array<i32: 0>} : vector<32x32xi32>
    %135 = tpu.iota {dimensions = array<i32: 1>} : vector<32x32xi32>
    %c1_i32_83 = arith.constant 1 : i32
    %136 = vector.broadcast %c1_i32_83 : i32 to vector<32x32xi32>
    %137 = arith.addi %134, %136 : vector<32x32xi32>
    %138 = arith.cmpi eq, %135, %137 : vector<32x32xi32>
    %139 = arith.extui %138 : vector<32x32xi1> to vector<32x32xi32>
    %140 = arith.sitofp %139 : vector<32x32xi32> to vector<32x32xf32>
    %cst_84 = arith.constant dense<0.000000e+00> : vector<32x256xf32>
    %141 = tpu.matmul %140, %125, %cst_84 {dimension_numbers = #tpu.dot_dimension_numbers<[1], [0], [0], [1], [0, 0, 1, 1], [], []>} : vector<32x32xf32>, vector<32x256xf32>, vector<32x256xf32> -> vector<32x256xf32>
    %c0_85 = arith.constant 0 : index
    %c0_86 = arith.constant 0 : index
    %c0_87 = arith.constant 0 : index
    %142 = vector.load %arg10[%c0_85, %c0_86, %c0_87] : memref<3x256x256xf32, #tpu.memory_space<vmem>>, vector<1x256x256xf32>
    %143 = vector.shape_cast %142 : vector<1x256x256xf32> to vector<256x256xf32>
    %cst_88 = arith.constant dense<0.000000e+00> : vector<32x256xf32>
    %144 = tpu.matmul %133, %143, %cst_88 {dimension_numbers = #tpu.dot_dimension_numbers<[1], [0], [0], [1], [0, 0, 1, 1], [], []>} : vector<32x256xf32>, vector<256x256xf32>, vector<32x256xf32> -> vector<32x256xf32>
    %c1_89 = arith.constant 1 : index
    %c0_90 = arith.constant 0 : index
    %c0_91 = arith.constant 0 : index
    %145 = vector.load %arg10[%c1_89, %c0_90, %c0_91] : memref<3x256x256xf32, #tpu.memory_space<vmem>>, vector<1x256x256xf32>
    %146 = vector.shape_cast %145 : vector<1x256x256xf32> to vector<256x256xf32>
    %cst_92 = arith.constant dense<0.000000e+00> : vector<32x256xf32>
    %147 = tpu.matmul %125, %146, %cst_92 {dimension_numbers = #tpu.dot_dimension_numbers<[1], [0], [0], [1], [0, 0, 1, 1], [], []>} : vector<32x256xf32>, vector<256x256xf32>, vector<32x256xf32> -> vector<32x256xf32>
    %148 = arith.addf %144, %147 : vector<32x256xf32>
    %c2_93 = arith.constant 2 : index
    %c0_94 = arith.constant 0 : index
    %c0_95 = arith.constant 0 : index
    %149 = vector.load %arg10[%c2_93, %c0_94, %c0_95] : memref<3x256x256xf32, #tpu.memory_space<vmem>>, vector<1x256x256xf32>
    %150 = vector.shape_cast %149 : vector<1x256x256xf32> to vector<256x256xf32>
    %cst_96 = arith.constant dense<0.000000e+00> : vector<32x256xf32>
    %151 = tpu.matmul %141, %150, %cst_96 {dimension_numbers = #tpu.dot_dimension_numbers<[1], [0], [0], [1], [0, 0, 1, 1], [], []>} : vector<32x256xf32>, vector<256x256xf32>, vector<32x256xf32> -> vector<32x256xf32>
    %152 = arith.addf %148, %151 : vector<32x256xf32>
    %c0_97 = arith.constant 0 : index
    %c0_98 = arith.constant 0 : index
    %153 = vector.load %arg11[%c0_97, %c0_98] : memref<1x256xf32, #tpu.memory_space<vmem>>, vector<1x256xf32>
    %154 = vector.broadcast %153 : vector<1x256xf32> to vector<32x256xf32>
    %155 = arith.addf %152, %154 : vector<32x256xf32>
    %cst_99 = arith.constant 0.000000e+00 : f32
    %156 = vector.broadcast %cst_99 : f32 to vector<32x256xf32>
    %157 = arith.maximumf %155, %156 : vector<32x256xf32>
    %c0_100 = arith.constant 0 : index
    %c0_101 = arith.constant 0 : index
    %158 = vector.load %arg17[%c0_100, %c0_101] : memref<64x32xf32, #tpu.memory_space<vmem>>, vector<64x32xf32>
    %cst_102 = arith.constant dense<0.000000e+00> : vector<64x256xf32>
    %159 = tpu.matmul %158, %157, %cst_102 {dimension_numbers = #tpu.dot_dimension_numbers<[1], [0], [0], [1], [0, 0, 1, 1], [], []>} : vector<64x32xf32>, vector<32x256xf32>, vector<64x256xf32> -> vector<64x256xf32>
    %c0_103 = arith.constant 0 : index
    %c0_104 = arith.constant 0 : index
    %160 = vector.load %arg21[%c0_103, %c0_104] : memref<256x512xf32, #tpu.memory_space<vmem>>, vector<256x512xf32>
    %cst_105 = arith.constant dense<0.000000e+00> : vector<64x512xf32>
    %161 = tpu.matmul %159, %160, %cst_105 {dimension_numbers = #tpu.dot_dimension_numbers<[1], [0], [0], [1], [0, 0, 1, 1], [], []>} : vector<64x256xf32>, vector<256x512xf32>, vector<64x512xf32> -> vector<64x512xf32>
    %162 = tpu.iota {dimensions = array<i32: 0>} : vector<64x64xi32>
    %163 = tpu.iota {dimensions = array<i32: 1>} : vector<64x64xi32>
    %c-1_i32_106 = arith.constant -1 : i32
    %164 = vector.broadcast %c-1_i32_106 : i32 to vector<64x64xi32>
    %165 = arith.addi %162, %164 : vector<64x64xi32>
    %166 = arith.cmpi eq, %163, %165 : vector<64x64xi32>
    %167 = arith.extui %166 : vector<64x64xi1> to vector<64x64xi32>
    %168 = arith.sitofp %167 : vector<64x64xi32> to vector<64x64xf32>
    %cst_107 = arith.constant dense<0.000000e+00> : vector<64x512xf32>
    %169 = tpu.matmul %168, %161, %cst_107 {dimension_numbers = #tpu.dot_dimension_numbers<[1], [0], [0], [1], [0, 0, 1, 1], [], []>} : vector<64x64xf32>, vector<64x512xf32>, vector<64x512xf32> -> vector<64x512xf32>
    %170 = tpu.iota {dimensions = array<i32: 0>} : vector<64x64xi32>
    %171 = tpu.iota {dimensions = array<i32: 1>} : vector<64x64xi32>
    %c1_i32_108 = arith.constant 1 : i32
    %172 = vector.broadcast %c1_i32_108 : i32 to vector<64x64xi32>
    %173 = arith.addi %170, %172 : vector<64x64xi32>
    %174 = arith.cmpi eq, %171, %173 : vector<64x64xi32>
    %175 = arith.extui %174 : vector<64x64xi1> to vector<64x64xi32>
    %176 = arith.sitofp %175 : vector<64x64xi32> to vector<64x64xf32>
    %cst_109 = arith.constant dense<0.000000e+00> : vector<64x512xf32>
    %177 = tpu.matmul %176, %161, %cst_109 {dimension_numbers = #tpu.dot_dimension_numbers<[1], [0], [0], [1], [0, 0, 1, 1], [], []>} : vector<64x64xf32>, vector<64x512xf32>, vector<64x512xf32> -> vector<64x512xf32>
    %c0_110 = arith.constant 0 : index
    %c0_111 = arith.constant 0 : index
    %c0_112 = arith.constant 0 : index
    %178 = vector.load %arg12[%c0_110, %c0_111, %c0_112] : memref<3x512x32xf32, #tpu.memory_space<vmem>>, vector<1x512x32xf32>
    %179 = vector.shape_cast %178 : vector<1x512x32xf32> to vector<512x32xf32>
    %cst_113 = arith.constant dense<0.000000e+00> : vector<64x32xf32>
    %180 = tpu.matmul %169, %179, %cst_113 {dimension_numbers = #tpu.dot_dimension_numbers<[1], [0], [0], [1], [0, 0, 1, 1], [], []>} : vector<64x512xf32>, vector<512x32xf32>, vector<64x32xf32> -> vector<64x32xf32>
    %c1_114 = arith.constant 1 : index
    %c0_115 = arith.constant 0 : index
    %c0_116 = arith.constant 0 : index
    %181 = vector.load %arg12[%c1_114, %c0_115, %c0_116] : memref<3x512x32xf32, #tpu.memory_space<vmem>>, vector<1x512x32xf32>
    %182 = vector.shape_cast %181 : vector<1x512x32xf32> to vector<512x32xf32>
    %cst_117 = arith.constant dense<0.000000e+00> : vector<64x32xf32>
    %183 = tpu.matmul %161, %182, %cst_117 {dimension_numbers = #tpu.dot_dimension_numbers<[1], [0], [0], [1], [0, 0, 1, 1], [], []>} : vector<64x512xf32>, vector<512x32xf32>, vector<64x32xf32> -> vector<64x32xf32>
    %184 = arith.addf %180, %183 : vector<64x32xf32>
    %c2_118 = arith.constant 2 : index
    %c0_119 = arith.constant 0 : index
    %c0_120 = arith.constant 0 : index
    %185 = vector.load %arg12[%c2_118, %c0_119, %c0_120] : memref<3x512x32xf32, #tpu.memory_space<vmem>>, vector<1x512x32xf32>
    %186 = vector.shape_cast %185 : vector<1x512x32xf32> to vector<512x32xf32>
    %cst_121 = arith.constant dense<0.000000e+00> : vector<64x32xf32>
    %187 = tpu.matmul %177, %186, %cst_121 {dimension_numbers = #tpu.dot_dimension_numbers<[1], [0], [0], [1], [0, 0, 1, 1], [], []>} : vector<64x512xf32>, vector<512x32xf32>, vector<64x32xf32> -> vector<64x32xf32>
    %188 = arith.addf %184, %187 : vector<64x32xf32>
    %c0_122 = arith.constant 0 : index
    %c0_123 = arith.constant 0 : index
    %189 = vector.load %arg13[%c0_122, %c0_123] : memref<1x32xf32, #tpu.memory_space<vmem>>, vector<1x32xf32>
    %190 = vector.broadcast %189 : vector<1x32xf32> to vector<64x32xf32>
    %191 = arith.addf %188, %190 : vector<64x32xf32>
    %c0_124 = arith.constant 0 : index
    %c0_125 = arith.constant 0 : index
    %192 = vector.load %arg18[%c0_124, %c0_125] : memref<128x64xf32, #tpu.memory_space<vmem>>, vector<128x64xf32>
    %cst_126 = arith.constant dense<0.000000e+00> : vector<128x32xf32>
    %193 = tpu.matmul %192, %191, %cst_126 {dimension_numbers = #tpu.dot_dimension_numbers<[1], [0], [0], [1], [0, 0, 1, 1], [], []>} : vector<128x64xf32>, vector<64x32xf32>, vector<128x32xf32> -> vector<128x32xf32>
    %c0_127 = arith.constant 0 : index
    %c0_128 = arith.constant 0 : index
    %194 = vector.load %arg22[%c0_127, %c0_128] : memref<32x64xf32, #tpu.memory_space<vmem>>, vector<32x64xf32>
    %cst_129 = arith.constant dense<0.000000e+00> : vector<128x64xf32>
    %195 = tpu.matmul %193, %194, %cst_129 {dimension_numbers = #tpu.dot_dimension_numbers<[1], [0], [0], [1], [0, 0, 1, 1], [], []>} : vector<128x32xf32>, vector<32x64xf32>, vector<128x64xf32> -> vector<128x64xf32>
    %196 = arith.negf %195 : vector<128x64xf32>
    %197 = math.exp %196 : vector<128x64xf32>
    %cst_130 = arith.constant 1.000000e+00 : f32
    %198 = vector.broadcast %cst_130 : f32 to vector<128x64xf32>
    %199 = arith.addf %198, %197 : vector<128x64xf32>
    %200 = arith.divf %198, %199 : vector<128x64xf32>
    %c0_131 = arith.constant 0 : index
    %c0_132 = arith.constant 0 : index
    %c0_133 = arith.constant 0 : index
    %201 = vector.load %arg24[%c0_131, %c0_132, %c0_133] : memref<1x128x64xf32, #tpu.memory_space<vmem>>, vector<1x128x64xf32>
    %202 = vector.shape_cast %201 : vector<1x128x64xf32> to vector<128x64xf32>
    %203 = vector.shape_cast %200 : vector<128x64xf32> to vector<1x128x64xf32>
    tpu.vector_store %arg24[%c0_131, %c0_132, %c0_133], %203 {strides = array<i32>} : memref<1x128x64xf32, #tpu.memory_space<vmem>>, vector<1x128x64xf32>,
    return
  }
  func.func @transform_0(%arg0: i32) -> (i32, i32, i32) {
    %c0_i32 = arith.constant 0 : i32
    %c0_i32_0 = arith.constant 0 : i32
    %c0_i32_1 = arith.constant 0 : i32
    return %arg0, %c0_i32, %c0_i32_0 : i32, i32, i32
  }
  func.func @transform_1(%arg0: i32) -> (i32, i32, i32) {
    %c0_i32 = arith.constant 0 : i32
    %c0_i32_0 = arith.constant 0 : i32
    %c0_i32_1 = arith.constant 0 : i32
    %c0_i32_2 = arith.constant 0 : i32
    return %c0_i32, %c0_i32_0, %c0_i32_1 : i32, i32, i32
  }
  func.func @transform_2(%arg0: i32) -> (i32, i32) {
    %c0_i32 = arith.constant 0 : i32
    %c0_i32_0 = arith.constant 0 : i32
    %c0_i32_1 = arith.constant 0 : i32
    return %c0_i32, %c0_i32_0 : i32, i32
  }
  func.func @transform_3(%arg0: i32) -> (i32, i32, i32) {
    %c0_i32 = arith.constant 0 : i32
    %c0_i32_0 = arith.constant 0 : i32
    %c0_i32_1 = arith.constant 0 : i32
    %c0_i32_2 = arith.constant 0 : i32
    return %c0_i32, %c0_i32_0, %c0_i32_1 : i32, i32, i32
  }
  func.func @transform_4(%arg0: i32) -> (i32, i32) {
    %c0_i32 = arith.constant 0 : i32
    %c0_i32_0 = arith.constant 0 : i32
    %c0_i32_1 = arith.constant 0 : i32
    return %c0_i32, %c0_i32_0 : i32, i32
  }
  func.func @transform_5(%arg0: i32) -> (i32, i32, i32) {
    %c0_i32 = arith.constant 0 : i32
    %c0_i32_0 = arith.constant 0 : i32
    %c0_i32_1 = arith.constant 0 : i32
    %c0_i32_2 = arith.constant 0 : i32
    return %c0_i32, %c0_i32_0, %c0_i32_1 : i32, i32, i32
  }
  func.func @transform_6(%arg0: i32) -> (i32, i32) {
    %c0_i32 = arith.constant 0 : i32
    %c0_i32_0 = arith.constant 0 : i32
    %c0_i32_1 = arith.constant 0 : i32
    return %c0_i32, %c0_i32_0 : i32, i32
  }
  func.func @transform_7(%arg0: i32) -> (i32, i32, i32) {
    %c0_i32 = arith.constant 0 : i32
    %c0_i32_0 = arith.constant 0 : i32
    %c0_i32_1 = arith.constant 0 : i32
    %c0_i32_2 = arith.constant 0 : i32
    return %c0_i32, %c0_i32_0, %c0_i32_1 : i32, i32, i32
  }
  func.func @transform_8(%arg0: i32) -> (i32, i32) {
    %c0_i32 = arith.constant 0 : i32
    %c0_i32_0 = arith.constant 0 : i32
    %c0_i32_1 = arith.constant 0 : i32
    return %c0_i32, %c0_i32_0 : i32, i32
  }
  func.func @transform_9(%arg0: i32) -> (i32, i32, i32) {
    %c0_i32 = arith.constant 0 : i32
    %c0_i32_0 = arith.constant 0 : i32
    %c0_i32_1 = arith.constant 0 : i32
    %c0_i32_2 = arith.constant 0 : i32
    return %c0_i32, %c0_i32_0, %c0_i32_1 : i32, i32, i32
  }
  func.func @transform_10(%arg0: i32) -> (i32, i32) {
    %c0_i32 = arith.constant 0 : i32
    %c0_i32_0 = arith.constant 0 : i32
    %c0_i32_1 = arith.constant 0 : i32
    return %c0_i32, %c0_i32_0 : i32, i32
  }
  func.func @transform_11(%arg0: i32) -> (i32, i32, i32) {
    %c0_i32 = arith.constant 0 : i32
    %c0_i32_0 = arith.constant 0 : i32
    %c0_i32_1 = arith.constant 0 : i32
    %c0_i32_2 = arith.constant 0 : i32
    return %c0_i32, %c0_i32_0, %c0_i32_1 : i32, i32, i32
  }
  func.func @transform_12(%arg0: i32) -> (i32, i32) {
    %c0_i32 = arith.constant 0 : i32
    %c0_i32_0 = arith.constant 0 : i32
    %c0_i32_1 = arith.constant 0 : i32
    return %c0_i32, %c0_i32_0 : i32, i32
  }
  func.func @transform_13(%arg0: i32) -> (i32, i32) {
    %c0_i32 = arith.constant 0 : i32
    %c0_i32_0 = arith.constant 0 : i32
    %c0_i32_1 = arith.constant 0 : i32
    return %c0_i32, %c0_i32_0 : i32, i32
  }
  func.func @transform_14(%arg0: i32) -> (i32, i32) {
    %c0_i32 = arith.constant 0 : i32
    %c0_i32_0 = arith.constant 0 : i32
    %c0_i32_1 = arith.constant 0 : i32
    return %c0_i32, %c0_i32_0 : i32, i32
  }
  func.func @transform_15(%arg0: i32) -> (i32, i32) {
    %c0_i32 = arith.constant 0 : i32
    %c0_i32_0 = arith.constant 0 : i32
    %c0_i32_1 = arith.constant 0 : i32
    return %c0_i32, %c0_i32_0 : i32, i32
  }
  func.func @transform_16(%arg0: i32) -> (i32, i32) {
    %c0_i32 = arith.constant 0 : i32
    %c0_i32_0 = arith.constant 0 : i32
    %c0_i32_1 = arith.constant 0 : i32
    return %c0_i32, %c0_i32_0 : i32, i32
  }
  func.func @transform_17(%arg0: i32) -> (i32, i32) {
    %c0_i32 = arith.constant 0 : i32
    %c0_i32_0 = arith.constant 0 : i32
    %c0_i32_1 = arith.constant 0 : i32
    return %c0_i32, %c0_i32_0 : i32, i32
  }
  func.func @transform_18(%arg0: i32) -> (i32, i32) {
    %c0_i32 = arith.constant 0 : i32
    %c0_i32_0 = arith.constant 0 : i32
    %c0_i32_1 = arith.constant 0 : i32
    return %c0_i32, %c0_i32_0 : i32, i32
  }
  func.func @transform_19(%arg0: i32) -> (i32, i32) {
    %c0_i32 = arith.constant 0 : i32
    %c0_i32_0 = arith.constant 0 : i32
    %c0_i32_1 = arith.constant 0 : i32
    return %c0_i32, %c0_i32_0 : i32, i32
  }
  func.func @transform_20(%arg0: i32) -> (i32, i32) {
    %c0_i32 = arith.constant 0 : i32
    %c0_i32_0 = arith.constant 0 : i32
    %c0_i32_1 = arith.constant 0 : i32
    return %c0_i32, %c0_i32_0 : i32, i32
  }
  func.func @transform_21(%arg0: i32) -> (i32, i32) {
    %c0_i32 = arith.constant 0 : i32
    %c0_i32_0 = arith.constant 0 : i32
    %c0_i32_1 = arith.constant 0 : i32
    return %c0_i32, %c0_i32_0 : i32, i32
  }
  func.func @transform_22(%arg0: i32) -> (i32, i32, i32) {
    %c0_i32 = arith.constant 0 : i32
    %c0_i32_0 = arith.constant 0 : i32
    %c0_i32_1 = arith.constant 0 : i32
    return %arg0, %c0_i32, %c0_i32_0 : i32, i32, i32
  }
  func.func @transform_23(%arg0: i32) -> (i32, i32, i32) {
    %c0_i32 = arith.constant 0 : i32
    %c0_i32_0 = arith.constant 0 : i32
    %c0_i32_1 = arith.constant 0 : i32
    return %arg0, %c0_i32, %c0_i32_0 : i32, i32, i32
  }
}

</mosaic_0001>

<bundles_post_ra>
// kernel: decoder_forward.1
= control target key start
LH: loop header
LB: loop body
LE: loop exit
PB: predicated region body
PF: predicated region fallthrough
CT: control target
= control target key end

     0   :  { %s10282_s0 = inlined_call_operand.vmem [shape: f32[2,1,2], index: 0, kind: input, shape index: {}]   ;;  %s10283_s1 = inlined_call_operand.vmem [shape: f32[2,4,4], index: 1, kind: input, shape index: {}]   ;;  %s10284_s2 = inlined_call_operand.vmem [shape: f32[4,4], index: 2, kind: input, shape index: {}]   ;;  %s10285_s3 = inlined_call_operand.vmem [shape: f32[3,4,64], index: 3, kind: input, shape index: {}]   ;;  %s10286_s4 = inlined_call_operand.hbm [shape: f32[1,64], index: 4, kind: input, shape index: {}]   ;;  %s10287_s5 = inlined_call_operand.hbm [shape: f32[3,64,64], index: 5, kind: input, shape index: {}]   ;;  %s10288_s6 = inlined_call_operand.hbm [shape: f32[1,64], index: 6, kind: input, shape index: {}]   ;;  %s10289_s7 = inlined_call_operand.vmem [shape: f32[3,128,128], index: 7, kind: input, shape index: {}]   ;;  %s10290_s8 = inlined_call_operand.hbm [shape: f32[1,128], index: 8, kind: input, shape index: {}]   ;;  %s10291_s9 = inlined_call_operand.vmem [shape: f32[3,256,256], index: 9, kind: input, shape index: {}]   ;;  %s10292_s10 = inlined_call_operand.hbm [shape: f32[1,256], index: 10, kind: input, shape index: {}]   ;;  %s10293_s11 = inlined_call_operand.vmem [shape: f32[3,512,32], index: 11, kind: input, shape index: {}]   ;;  %s10294_s12 = inlined_call_operand.hbm [shape: f32[1,32], index: 12, kind: input, shape index: {}]   ;;  %s10295_s13 = inlined_call_operand.vmem [shape: f32[8,4], index: 13, kind: input, shape index: {}]   ;;  %s10296_s14 = inlined_call_operand.vmem [shape: f32[16,8], index: 14, kind: input, shape index: {}]   ;;  %s10297_s15 = inlined_call_operand.vmem [shape: f32[32,16], index: 15, kind: input, shape index: {}]   ;;  %s10298_s16 = inlined_call_operand.vmem [shape: f32[64,32], index: 16, kind: input, shape index: {}]   ;;  %s10299_s17 = inlined_call_operand.vmem [shape: f32[128,64], index: 17, kind: input, shape index: {}]   ;;  %s10300_s18 = inlined_call_operand.hbm [shape: f32[64,128], index: 18, kind: input, shape index: {}]   ;;  %s10301_s19 = inlined_call_operand.hbm [shape: f32[128,256], index: 19, kind: input, shape index: {}]   ;;  %s10302_s20 = inlined_call_operand.hbm [shape: f32[256,512], index: 20, kind: input, shape index: {}]   ;;  %s10303_s21 = inlined_call_operand.hbm [shape: f32[32,64], index: 21, kind: input, shape index: {}]   ;;  %s10304_s22 = inlined_call_operand.hbm [shape: f32[2,4,4], index: 22, kind: output, shape index: {0}]   ;;  %s10305_s23 = inlined_call_operand.vmem [shape: f32[2,128,64], index: 23, kind: output, shape index: {1}]  }
   0x1   :  { %10326 = sst [smem:[#allocation42_spill]] %s10282_s0 }
   0x2   :  { %10327 = sst [smem:[#allocation43_spill]] %s10283_s1 }
   0x3   :  { %10328 = sst [smem:[#allocation44_spill]] %s10284_s2 }
   0x4   :  { %10329 = sst [smem:[#allocation45_spill]] %s10285_s3 }
   0x5   :  { %10330 = sst [smem:[#allocation46_spill]] %s10286_s4 }
   0x6   :  { %10331 = sst [smem:[#allocation47_spill]] %s10287_s5 }
   0x7   :  { %10332 = sst [smem:[#allocation48_spill]] %s10288_s6 }
   0x8   :  { %10333 = sst [smem:[#allocation49_spill]] %s10289_s7 }
   0x9   :  { %10334 = sst [smem:[#allocation50_spill]] %s10290_s8 }
   0xa   :  { %10335 = sst [smem:[#allocation51_spill]] %s10291_s9 }
   0xb   :  { %10336 = sst [smem:[#allocation52_spill]] %s10292_s10 }
   0xc   :  { %10337 = sst [smem:[#allocation53_spill]] %s10293_s11 }
   0xd   :  { %10338 = sst [smem:[#allocation54_spill]] %s10304_s22 }
   0xe   :  { %10339 = sst [smem:[#allocation55_spill]] %s10305_s23 }
   0xf   :  { %29 = vsyncpa [#allocation3], 0 }
  0x10   :  { %30 = vsyncpa [#allocation6], 0 }
  0x11   :  { %31 = vsyncpa [#allocation9], 0 }
  0x12   :  { %32 = vsyncpa [#allocation12], 0 }
  0x13   :  { %33 = vsyncpa [#allocation15], 0 }
  0x14   :  { %34 = vsyncpa [#allocation18], 0 }
  0x15   :  { %35 = vsyncpa [#allocation4], 0 }
  0x16   :  { %37 = vsyncpa [#allocation4 + $0x1], 0  ;;  %s7917_s4 = smov 0   ;;  %s7919_s30 = smov 0  }
  0x17   :  { %s7921_s24 = smov 0   ;;  %s7923_s25 = smov 0  }
  0x18 LB: > { %10340 = sst [smem:[#allocation27_spill]] %s7762_s4  ;;  %s7938_s5 = sadd.s32 4294967295, %s7774_s25   ;;  %s7774_s25 = sphi %s7923_s25, %s10407_s25   ;;  %s7770_s24 = sphi %s7921_s24, %s10409_s24   ;;  %s7766_s30 = sphi %s7919_s30, %s10411_s30   ;;  %s7762_s4 = sphi %s7917_s4, %s10410_s4  }
  0x19   : > { %10341 = sst [smem:[#allocation28_spill]] %s7770_s24  ;;  %s5919_s1 = sadd.s32 4294967294, %s7774_s25  }
  0x1a   : > { %10342 = sst [smem:[#allocation29_spill]] %s7774_s25  ;;  %s7942_s26 = sadd.s32 1, %s7774_s25  }
  0x1b   : > { %10343 = sst [smem:[#allocation30_spill]] %s7942_s26  ;;  %s517_s2 = sadd.s32 1, %s7770_s24 }
  0x1c   : > { %s514_s6 = ssub.s32 %s7774_s25, %s7942_s26  ;;  %p527_p0 = scmp.ne.s32.totalorder %s7770_s24, %s7766_s30 }
  0x1d   : > { %p515_p1 = scmp.eq.s32.totalorder %s514_s6, 0  ;;  %p528_p2 = scmp.eq.s32.totalorder %s7938_s5, 1 }
  0x1e   : > { %p533_p3 = scmp.ne.s32.totalorder %s7766_s30, %s7762_s4  ;;  %p534_p4 = scmp.eq.s32.totalorder %s5919_s1, 1 }
  0x1f   : > { %s7953_s27 = scalar_select %p515_p1, %s7770_s24, %s517_s2  }
  0x20   : > { %p7955_p5 = por %p528_p2, %p527_p0  ;;  %p7959_p6 = por %p534_p4, %p533_p3 }
  0x21   : > { %10344 = sst [smem:[#allocation31_spill]] %s7953_s27  ;;  %p5920_p7 = scmp.ge.s32.totalorder %s7774_s25, 1 }
  0x22   : > { %s10345_s7 = scalar_select %p7955_p5, 1, 0 }
  0x23   : > { %s10347_s28 = scalar_select %p7959_p6, 1, 0 }
  0x24   : > { %10346 = sst [smem:[#allocation32_spill]] %s10345_s7  ;;  %p567_p8 = scmp.lt.s32.totalorder %s7774_s25, 3 }
  0x25   : > { %10348 = sst [smem:[#allocation33_spill]] %s10347_s28  ;;  %p10318_p9 = scmp.eq.s32.totalorder %s7938_s5, 0 }
  0x26   : > { %p7966_p10 = pnand %p5920_p7, %p567_p8  ;;  %s7776_s3 = smov [#allocation5]  }
  0x27   : > { %s599_s0 = sshll.u32 %s7776_s3, 4  ;;  %s7777_s2 = smov [#allocation8]   ;;  %s600_s0 = int_to_ptr.vmem [resolvable:$true] %s599_s0 }
  0x28   : > { %s10349_s29 = scalar_select %p7966_p10, 1, 0 }
  0x29   : > { %p7256_p11 = pneg %p7966_p10  ;;  %s627_s6 = sshll.u32 %s7777_s2, 4  ;;  %s628_s6 = int_to_ptr.vmem [resolvable:$true] %s627_s6 }
  0x2a   : > { %s7778_s27 = smov [#allocation11]   ;;  %s7441_s3 = scalar_lea.vmem %s600_s0, 3072 }
  0x2b   : > { %p7974_p12 = pnand %p10318_p9, %p7256_p11  ;;  %s655_s24 = sshll.u32 %s7778_s27, 4  ;;  %s656_s24 = int_to_ptr.vmem [resolvable:$true] %s655_s24 }
  0x2c   : > { %p7442_p0 = scmp.ne.s32.totalorder %s600_s0, %s7441_s3  ;;  %p7449_p3 = scmp.lt.s32.totalorder %s600_s0, %s600_s0 }
  0x2d   : > { %p7980_p13 = pneg %p7974_p12  ;;  %p7450_p4 = scmp.lt.s32.totalorder %s7441_s3, %s7441_s3 }
  0x2f   : > { %p7444_p1 = pnand %p7442_p0, %p7980_p13  ;;  %p7451_p7 = por %p7450_p4, %p7449_p3 }
  0x31   : > { %p7445_p2 = pneg %p7444_p1 }
  0x33   : > { %p7452_p8 = pnand %p7451_p7, %p7445_p2 }
  0x35   : > { %7455 = shalt.err (!%p7452_p8)
}
  0x36   : > { %s10320_s2 = smov 128   ;;  %s7780_s27 = smov 8  }
  0x37   : > { %s10352_s25 = sld [smem:[#allocation47_spill]]  ;;  %s7467_s23 = scalar_lea.vmem %s628_s6, 16 }
  0x38   : > { %p7468_p11 = scmp.ne.s32.totalorder %s628_s6, %s7467_s23  ;;  %s7474_s3 = scalar_lea.vmem %s628_s6, 32 }
  0x39   : > { %p7475_p2 = scmp.lt.s32.totalorder %s628_s6, %s628_s6  ;;  %p7476_p3 = scmp.lt.s32.totalorder %s7474_s3, %s7467_s23 }
  0x3a   : > { %p7470_p0 = pnand %p7468_p11, %p7980_p13 }
  0x3b   : > { %p7477_p4 = por %p7476_p3, %p7475_p2 }
  0x3c   : > { %p7471_p1 = pneg %p7470_p0 }
  0x3d   : > { %7262 = dma.hbm_to_vmem [thread:$0]  (!%p7974_p12), %s10352_s25, 3072, %s600_s0, [#allocation6], %s10320_s2, %s10320_s2, %s7780_s27  }
  0x3e   : > { %p7478_p7 = pnand %p7477_p4, %p7471_p1 }
  0x40   : > { %7481 = shalt.err (!%p7478_p7)
}
  0x41   : > { %s10353_s8 = sld [smem:[#allocation50_spill]]  ;;  %s7493_s4 = scalar_lea.vmem %s656_s24, 16 }
  0x42   : > { %p7494_p8 = scmp.ne.s32.totalorder %s656_s24, %s7493_s4  ;;  %s7500_s25 = scalar_lea.vmem %s656_s24, 32 }
  0x43   : > { %p7501_p0 = scmp.lt.s32.totalorder %s656_s24, %s656_s24  ;;  %p7502_p6 = scmp.lt.s32.totalorder %s7500_s25, %s7493_s4 }
  0x44   : > { %p7496_p9 = pnand %p7494_p8, %p7980_p13 }
  0x45   : > { %p7503_p5 = por %p7502_p6, %p7501_p0 }
  0x46   : > { %p7497_p11 = pneg %p7496_p9 }
  0x47   : > { %7268 = dma.hbm_to_vmem [thread:$0]  (!%p7974_p12), %s10353_s8, 16, %s628_s6, [#allocation9]  }
  0x48   : > { %p7504_p2 = pnand %p7503_p5, %p7497_p11 }
  0x4a   : > { %7507 = shalt.err (!%p7504_p2)
}
  0x4b   : > { %7274 = dma.hbm_to_vmem [thread:$0]  (!%p7974_p12), %s10294_s12, 16, %s656_s24, [#allocation12]  }
  0x4c   : > { %s7781_s22 = smov [#allocation14]  }
  0x4d   : > { %s693_s7 = sshll.u32 %s7781_s22, 4  ;;  %s694_s7 = int_to_ptr.vmem [resolvable:$true] %s693_s7 }
  0x4e   : > { %s7519_s0 = scalar_lea.vmem %s694_s7, 4096  ;;  %p7527_p4 = scmp.lt.s32.totalorder %s694_s7, %s694_s7 }
  0x4f   : > { %p7520_p1 = scmp.ne.s32.totalorder %s694_s7, %s7519_s0  ;;  %p7528_p7 = scmp.lt.s32.totalorder %s7519_s0, %s7519_s0 }
  0x51   : > { %p7522_p9 = pnand %p7520_p1, %p7980_p13  ;;  %p7529_p6 = por %p7528_p7, %p7527_p4 }
  0x53   : > { %p7523_p3 = pneg %p7522_p9 }
  0x55   : > { %p7530_p5 = pnand %p7529_p6, %p7523_p3 }
  0x57   : > { %7533 = shalt.err (!%p7530_p5)
}
  0x58   : > { %s7782_s6 = smov 256   ;;  %s7783_s3 = smov 16  }
  0x59   : > { %7280 = dma.hbm_to_vmem [thread:$0]  (!%p7974_p12), %s10301_s19, 4096, %s694_s7, [#allocation15], %s7782_s6, %s7782_s6, %s7783_s3  }
  0x5a   : > { %s7784_s25 = smov [#allocation2]   ;;  %s7785_s28 = smov [#allocation7]  }
  0x5b   : > { %s589_s23 = sshll.u32 %s7784_s25, 4  ;;  %s613_s22 = sshll.u32 %s7785_s28, 4  ;;  %s590_s23 = int_to_ptr.vmem [resolvable:$true] %s589_s23  ;;  %s614_s22 = int_to_ptr.vmem [resolvable:$true] %s613_s22 }
  0x5c   : > { %s7545_s2 = scalar_lea.vmem %s590_s23, 16  ;;  %s7552_s0 = scalar_lea.vmem %s590_s23, 32 }
  0x5d   : > { %p7546_p8 = scmp.ne.s32.totalorder %s590_s23, %s7545_s2  ;;  %p7553_p2 = scmp.lt.s32.totalorder %s590_s23, %s590_s23 }
  0x5e   : > { %p7554_p1 = scmp.lt.s32.totalorder %s7552_s0, %s7545_s2 }
  0x5f   : > { %p7548_p11 = pnand %p7546_p8, %p7980_p13 }
  0x60   : > { %p7555_p9 = por %p7554_p1, %p7553_p2 }
  0x61   : > { %p7549_p0 = pneg %p7548_p11 }
  0x63   : > { %p7556_p3 = pnand %p7555_p9, %p7549_p0 }
  0x65   : > { %7559 = shalt.err (!%p7556_p3)
}
  0x66   : > { %s10354_s3 = sld [smem:[#allocation46_spill]]  ;;  %s7571_s4 = scalar_lea.vmem %s614_s22, 16 }
  0x67   : > { %p7572_p4 = scmp.ne.s32.totalorder %s614_s22, %s7571_s4  ;;  %s7578_s24 = scalar_lea.vmem %s614_s22, 32 }
  0x68   : > { %p7579_p5 = scmp.lt.s32.totalorder %s614_s22, %s614_s22  ;;  %p7580_p8 = scmp.lt.s32.totalorder %s7578_s24, %s7571_s4 }
  0x69   : > { %p7574_p7 = pnand %p7572_p4, %p7980_p13 }
  0x6a   : > { %p7581_p11 = por %p7580_p8, %p7579_p5 }
  0x6b   : > { %p7575_p6 = pneg %p7574_p7 }
  0x6c   : > { %7259 = dma.hbm_to_vmem [thread:$0]  (!%p7974_p12), %s10354_s3, 16, %s590_s23, [#allocation3]  }
  0x6d   : > { %p7582_p10 = pnand %p7581_p11, %p7575_p6 }
  0x6f   : > { %7585 = shalt.err (!%p7582_p10)
}
  0x70   : > { %s10355_s28 = sld [smem:[#allocation48_spill]]  ;;  %s7786_s0 = smov [#allocation10]  }
  0x71   : > { %s641_s23 = sshll.u32 %s7786_s0, 4  ;;  %s7787_s7 = smov [#allocation13]   ;;  %s642_s23 = int_to_ptr.vmem [resolvable:$true] %s641_s23 }
  0x72   : > { %s680_s6 = sshll.u32 %s7787_s7, 4  ;;  %s7597_s3 = scalar_lea.vmem %s642_s23, 32  ;;  %s681_s6 = int_to_ptr.vmem [resolvable:$true] %s680_s6 }
  0x73   : > { %p7598_p0 = scmp.ne.s32.totalorder %s642_s23, %s7597_s3  ;;  %p7605_p9 = scmp.lt.s32.totalorder %s642_s23, %s642_s23 }
  0x74   : > { %p7606_p10 = scmp.lt.s32.totalorder %s7597_s3, %s7597_s3 }
  0x75   : > { %p7600_p2 = pnand %p7598_p0, %p7980_p13 }
  0x76   : > { %7265 = dma.hbm_to_vmem [thread:$0]  (!%p7974_p12), %s10355_s28, 16, %s614_s22, [#allocation6]  }
  0x77   : > { %p7601_p1 = pneg %p7600_p2  ;;  %p7607_p3 = por %p7606_p10, %p7605_p9 }
  0x79   : > { %p7608_p4 = pnand %p7607_p3, %p7601_p1 }
  0x7b   : > { %7611 = shalt.err (!%p7608_p4)
}
  0x7c   : > { %s10356_s10 = sld [smem:[#allocation52_spill]]  ;;  %s7623_s24 = scalar_lea.vmem %s681_s6, 1024 }
  0x7d   : > { %p7624_p7 = scmp.ne.s32.totalorder %s681_s6, %s7623_s24  ;;  %p7631_p8 = scmp.lt.s32.totalorder %s681_s6, %s681_s6 }
  0x7e   : > { %p7632_p11 = scmp.lt.s32.totalorder %s7623_s24, %s7623_s24 }
  0x7f   : > { %p7626_p6 = pnand %p7624_p7, %p7980_p13 }
  0x80   : > { %p7633_p0 = por %p7632_p11, %p7631_p8 }
  0x81   : > { %p7627_p5 = pneg %p7626_p6 }
  0x82   : > { %7271 = dma.hbm_to_vmem [thread:$0]  (!%p7974_p12), %s10356_s10, 32, %s642_s23, [#allocation9]  }
  0x83   : > { %p7634_p2 = pnand %p7633_p0, %p7627_p5 }
  0x85   : > { %7637 = shalt.err (!%p7634_p2)
}
  0x86   : > { %s10357_s2 = smov 128   ;;  %s7788_s0 = smov [#allocation16]  }
  0x87   : > { %7277 = dma.hbm_to_vmem [thread:$0]  (!%p7974_p12), %s10300_s18, 1024, %s681_s6, [#allocation12], %s10357_s2, %s10357_s2, %s7780_s27  }
  0x88   : > { %s706_s23 = sshll.u32 %s7788_s0, 4  ;;  %s707_s23 = int_to_ptr.vmem [resolvable:$true] %s706_s23 }
  0x89   : > { %s7649_s7 = scalar_lea.vmem %s707_s23, 16384  ;;  %p7657_p3 = scmp.lt.s32.totalorder %s707_s23, %s707_s23 }
  0x8a   : > { %p7650_p1 = scmp.ne.s32.totalorder %s707_s23, %s7649_s7  ;;  %p7658_p4 = scmp.lt.s32.totalorder %s7649_s7, %s7649_s7 }
  0x8c   : > { %p7652_p9 = pnand %p7650_p1, %p7980_p13  ;;  %p7659_p7 = por %p7658_p4, %p7657_p3 }
  0x8e   : > { %p7653_p10 = pneg %p7652_p9 }
  0x90   : > { %p7660_p6 = pnand %p7659_p7, %p7653_p10 }
  0x92   : > { %7663 = shalt.err (!%p7660_p6)
}
  0x93   : > { %s7789_s3 = smov 512   ;;  %s7790_s4 = smov 32  }
  0x94   : > { %7283 = dma.hbm_to_vmem [thread:$0]  (!%p7974_p12), %s10302_s20, 16384, %s707_s23, [#allocation15], %s7789_s3, %s7789_s3, %s7790_s4  }
  0x95   : > { %s7791_s24 = smov [#allocation17]  }
  0x96   : > { %s719_s25 = sshll.u32 %s7791_s24, 4  ;;  %s720_s25 = int_to_ptr.vmem [resolvable:$true] %s719_s25 }
  0x97   : > { %s7675_s28 = scalar_lea.vmem %s720_s25, 512  ;;  %p7683_p0 = scmp.lt.s32.totalorder %s720_s25, %s720_s25 }
  0x98   : > { %p7676_p5 = scmp.ne.s32.totalorder %s720_s25, %s7675_s28  ;;  %p7684_p2 = scmp.lt.s32.totalorder %s7675_s28, %s7675_s28 }
  0x9a   : > { %p7678_p8 = pnand %p7676_p5, %p7980_p13  ;;  %p7685_p1 = por %p7684_p2, %p7683_p0 }
  0x9c   : > { %p7679_p11 = pneg %p7678_p8 }
  0x9e   : > { %p7686_p9 = pnand %p7685_p1, %p7679_p11 }
  0xa0   : > { %7689 = shalt.err (!%p7686_p9)
}
  0xa1   : > { %7286 = dma.hbm_to_vmem [thread:$0]  (!%p7974_p12), %s10303_s21, 512, %s720_s25, [#allocation18], %s10357_s2, %s10357_s2, %s7780_s27  }
  0xa2   : > { %p10358_p10 = scmp.ne.s32.totalorder %s10349_s29, 0 }
  0xa4   : > { %741 = sbr.rel (%p10358_p10) target bundleno = 4348 (0x10fc), region = 108 }
  0xa9   : > { %p10359_p13 = scmp.eq.s32.totalorder %s7938_s5, 0 }
  0xab   : > { %7733 = dma.done.wait (%p10359_p13), [#allocation3], 16   ;;  %p10360_p3 = pmov %p10359_p13 }
  0xad   : > { %7735 = vsyncadd (%p10360_p3), [#allocation3], 4294967280  ;;  %p10361_p4 = pmov %p10360_p3 }
  0xae   : > { %p10362_p7 = pmov %p10360_p3 }
  0xaf   : > { %7737 = dma.done.wait (%p10361_p4), [#allocation6], 3088  }
  0xb0   : > { %7739 = vsyncadd (%p10362_p7), [#allocation6], 4294964208  ;;  %p10363_p6 = pmov %p10360_p3 }
  0xb1   : > { %p10364_p12 = pmov %p10360_p3 }
  0xb2   : > { %7741 = dma.done.wait (%p10363_p6), [#allocation9], 48  }
  0xb3   : > { %7743 = vsyncadd (%p10364_p12), [#allocation9], 4294967248  ;;  %p10365_p5 = pmov %p10360_p3 }
  0xb4   : > { %p10366_p8 = pmov %p10360_p3 }
  0xb5   : > { %7745 = dma.done.wait (%p10365_p5), [#allocation12], 1040  }
  0xb6   : > { %7747 = vsyncadd (%p10366_p8), [#allocation12], 4294966256  ;;  %p10367_p11 = pmov %p10360_p3 }
  0xb7   : > { %p10368_p0 = pmov %p10360_p3 }
  0xb8   : > { %7749 = dma.done.wait (%p10367_p11), [#allocation15], 20480  }
  0xb9   : > { %7751 = vsyncadd (%p10368_p0), [#allocation15], 4294946816  ;;  %p10369_p2 = pmov %p10368_p0 }
  0xba   : > { %p10370_p1 = pmov %p10368_p0 }
  0xbb   : > { %7753 = dma.done.wait (%p10369_p2), [#allocation18], 512  }
  0xbc   : > { %7755 = vsyncadd (%p10370_p1), [#allocation18], 4294966784  ;;  %p844_p9 = scmp.lt.s32.totalorder %s7938_s5, 1  ;;  %v7792_v0 = vmov 0   ;;  %s10371_s27 = sld [smem:[#allocation42_spill]]  ;;  %v7793_v2 = vmov 1   ;;  %v877_v4 = vlaneseq }
  0xbd   : > { %7364 = vset.pattern.permute.xlu0 %v7792_v0  ;;  %v7794_v3 = vmov 0.0   ;;  %vm7795_vm0 = vmmov 0   ;;  %s10372_s4 = sld [smem:[#allocation43_spill]]  ;;  %s10323_s25 = sand.u32 1, %s7766_s30   ;;  %vm889_vm3 = vcmask 1043456   ;;  %vm875_vm4 = vcmask 27648  }
  0xbe   : > { %s8091_s26 = scalar_select %p844_p9, %s7938_s5, 1  ;;  %6892 = vmatprep.subr.mxu0 %v7794_v3  ;;  %6897 = vmatprep.subr.mxu1 %v7794_v3  ;;  %v8103_v6 = vshrl.u32 %v877_v4, 7  ;;  %v8111_v10 = vand.u32 127, %v877_v4  ;;  %vm885_vm5 = vcmask 31744   ;;  %v5962_v33 = vld [vmem:[#allocation2] ss:$0 sm:$0xff] }
  0xbf   : > { %6894 = vmatprep.mubr.msk.f32.mxu0 %vm7795_vm0, %v7794_v3  ;;  %6899 = vmatprep.mubr.msk.f32.mxu1 %vm7795_vm0, %v7794_v3  ;;  %s10374_s23 = sld [smem:[#allocation44_spill]]  ;;  %s8121_s29 = sshll.u32 %s10323_s25, 2  ;;  %v1282_v39 = vld [vmem:[%s10295_s13] sm:$0xff]  ;;  %vm1359_vm6 = vcmask 64512   ;;  %v1519_v44 = vld [vmem:[#allocation5 + $0x70] sm:$0xff]  ;;  %v1518_v46 = vld [vmem:[#allocation5 + $0x68] sm:$0xff] }
  0xc0   : > { %v881_v11 = vadd.s32 4294967295, %v8103_v6  ;;  %v963_v12 = vadd.s32 1, %v8103_v6  ;;  %s10324_s7 = scalar_lea.vmem [#allocation19], %s8121_s29  ;;  %v1520_v41 = vld [vmem:[#allocation5 + $0x78] sm:$0xff]  ;;  %v1675_v45 = vld [vmem:[#allocation5 + $0xb0] sm:$0xff]  ;;  %v1674_v47 = vld [vmem:[#allocation5 + $0xa8] sm:$0xff] }
  0xc1   : > { %v1676_v43 = vld [vmem:[#allocation5 + $0xb8] sm:$0xff]  ;;  %v1517_v48 = vld [vmem:[#allocation5 + $0x60] sm:$0xff]  ;;  %v1515_v52 = vld [vmem:[#allocation5 + $0x50] sm:$0xff]  ;;  %vm1521_vm7 = vcmask 523264   ;;  %s10376_s24 = sld [smem:[#allocation49_spill]]  ;;  %vm1937_vm8 = vcmask 130048  }
  0xc2   : > { %s846_s2 = scalar_lea.vmem %s10371_s27, %s8091_s26  ;;  %vm882_vm1 = vcmp.eq.s32.totalorder %v8111_v10, %v881_v11  ;;  %vm964_vm2 = vcmp.eq.s32.totalorder %v8111_v10, %v963_v12  ;;  %v1673_v49 = vld [vmem:[#allocation5 + $0xa0] sm:$0xff]  ;;  %v1516_v50 = vld [vmem:[#allocation5 + $0x58] sm:$0xff]  ;;  %v1671_v53 = vld [vmem:[#allocation5 + $0x90] sm:$0xff]  ;;  %vm2622_vm11 = vcmask 261120   ;;  %s10378_s9 = sld [smem:[#allocation51_spill]] }
  0xc3   : > { %v5946_v1 = vld [vmem:[%s846_s2] ss:$0 sm:$0xff]  ;;  %s10373_s22 = smov %s10372_s4  ;;  %v8126_v19 = vsel %vm882_vm1, 1.0, %v7794_v3  ;;  %v8129_v20 = vsel %vm964_vm2, 1.0, %v7794_v3  ;;  %s10375_s2 = sld [smem:[#allocation45_spill]]  ;;  %v1514_v54 = vld [vmem:[#allocation5 + $0x48] sm:$0xff] }
  0xc4   : > { %860 = vperm.xlu0 %7364, %v5946_v1   ;;  %v853_v7 = vld [vmem:[%s10372_s4] sm:$0xf]  ;;  %v5947_v8 = vld [vmem:[%s10373_s22 + $0x4] sm:$0xf]  ;;  %v1670_v55 = vld [vmem:[#allocation5 + $0x88] sm:$0xff]  ;;  %s10379_s11 = sld [smem:[#allocation53_spill]] }
  0xc5   : > { %v872_v15 = vld [vmem:[%s10374_s23] sm:$0xf]  ;;  %v1510_v58 = vld [vmem:[#allocation5 + $0x30] sm:$0xff]  ;;  %v1509_v59 = vld [vmem:[#allocation5 + $0x28] sm:$0xff]  ;;  %s10396_s1 = sld [smem:[#allocation32_spill]]  ;;  %s6384_s27 = sshll.u32 %s7938_s5, 6 }
  0xc6   : > { %v1672_v51 = vld [vmem:[#allocation5 + $0x98] sm:$0xff]  ;;  %v1513_v56 = vld [vmem:[#allocation5 + $0x40] sm:$0xff]  ;;  %v1506_v62 = vld [vmem:[#allocation5 + $0x10] sm:$0xff]  ;;  %s10397_s3 = scalar_lea.vmem [#allocation19], %s8121_s29  ;;  %s10398_s25 = sld [smem:[#allocation54_spill]] }
  0xc7   : > { %v1511_v57 = vld [vmem:[#allocation5 + $0x38] sm:$0xff]  ;;  %v1508_v60 = vld [vmem:[#allocation5 + $0x20] sm:$0xff]  ;;  %v1505_v63 = vld [vmem:[#allocation5 + $0x8] sm:$0xff]  ;;  %s10377_s28 = smov %s10376_s24  ;;  %s5737_s4 = sshll.u32 %s10397_s3, 4  ;;  %s5738_s4 = int_to_ptr.vmem [resolvable:$true] %s5737_s4 }
  0xc8   : > { %7365 = vset.pattern.permute.xlu0 %v7793_v2  ;;  %v1507_v61 = vld [vmem:[#allocation5 + $0x18] sm:$0xff]  ;;  %v1504_v0 = vld [vmem:[#allocation5] sm:$0xff]  ;;  %s10400_s23 = sand.u32 1, %s7766_s30   ;;  %s7690_s8 = scalar_lea.vmem %s5738_s4, 64 }
  0xc9   : > { %867 = vperm.xlu0 %7365, %v5946_v1   ;;  %v5954_v21 = vld [vmem:[%s10375_s2 + $0x4] sm:$0xf]  ;;  %v1040_v22 = vld [vmem:[%s10375_s2] sm:$0xf]  ;;  %v5959_v23 = vld [vmem:[%s10375_s2 + $0x8] sm:$0xf]  ;;  %p7691_p10 = scmp.ne.s32.totalorder %s5738_s4, %s7690_s8 }
  0xca   : > { %v1669_v1 = vld [vmem:[#allocation5 + $0x80] sm:$0xff]  ;;  %s5719_s2 = scalar_lea.sflag [#allocation4], %s10400_s23 }
  0xcb   : > { %v1760_v11 = vld [vmem:[%s10296_s14] sm:$0xff]  ;;  %p10401_p13 = scmp.ne.s32.totalorder %s10396_s1, 0 }
  0xcc   : > { %s5735_s0 = scalar_lea.hbm %s10398_s25, %s6384_s27 }
  0xcd   : > { %p7692_p3 = pnand %p7691_p10, %p10401_p13 }
  0xcf   : > { %p7693_p4 = pneg %p7692_p3 }
 0x13f   : > { %v861_v5 = vpop.permute.xlu0 %860 }
 0x140   : > { %v863_v13 = vmul.f32 %v861_v5, %v853_v7 }
 0x144   : > { %v868_v9 = vpop.permute.xlu0 %867 }
 0x145   : > { %v870_v14 = vmul.f32 %v5947_v8, %v868_v9 }
 0x147   : > { %v871_v16 = vadd.f32 %v870_v14, %v863_v13 }
 0x149   : > { %v873_v17 = vadd.f32 %v872_v15, %v871_v16  ;;  %v5970_v15 = vld [vmem:[#allocation7] ss:$0 sm:$0xff] }
 0x14b   : > { %v874_v18 = vmax.f32 %v873_v17, 0.0 }
 0x14d   : > { %6893 = vmatpush3.msk.msra.mxu0 %vm889_vm3, %v874_v18  ;;  %6898 = vmatpush3.msk.msra.mxu1 %vm889_vm3, %v874_v18  ;;  %876 = vst.msk [vmem:[%s10324_s7] sm:$0xf] %vm875_vm4, %v874_v18  ;;  %s10399_s7 = smov %s10398_s25 }
 0x14e   : > { %6895 = vmatmul.mubr.msk.f32.vlgmr.msra.gmra.mxu0 %vm885_vm5, %v8126_v19  ;;  %6900 = vmatmul.mubr.msk.f32.vlgmr.msra.gmra.mxu1 %vm885_vm5, %v8129_v20 }
 0x14f   : > { %6902 = vmatprep.subr.mxu0 %v7794_v3  ;;  %6904 = vmatprep.mubr.msk.f32.mxu0 %vm7795_vm0, %v7794_v3 }
 0x150   : > { %6903 = vmatpush3.msk.msra.mxu0 %vm889_vm3, %v5954_v21  ;;  %6907 = vmatprep.subr.mxu1 %v7794_v3 }
 0x151   : > { %6912 = vmatprep.subr.mxu0 %v7794_v3  ;;  %6909 = vmatprep.mubr.msk.f32.mxu1 %vm7795_vm0, %v7794_v3 }
 0x152   : > { %6905 = vmatmul.mubr.msk.f32.vlgmr.msra.gmra.mxu0 %vm885_vm5, %v874_v18  ;;  %6908 = vmatpush3.msk.msra.mxu1 %vm889_vm3, %v1040_v22 }
 0x153   : > { %6914 = vmatprep.mubr.msk.f32.mxu0 %vm7795_vm0, %v7794_v3  ;;  %6913 = vmatpush3.msk.msra.mxu0 %vm889_vm3, %v5959_v23  ;;  %v1761_v23 = vld [vmem:[%s10296_s14 + $0x8] sm:$0xff] }
 0x154   : > { %6917 = vmatprep.subr.mxu1 %v7794_v3  ;;  %6922 = vmatprep.subr.mxu0 %v7794_v3 }
 0x20e   : > { %v959_v24 = vpop.f32.mrf.mxu0  ;;  %v1036_v25 = vpop.f32.mrf.mxu1 }
 0x20f   : > { %6910 = vmatmul.mubr.msk.f32.vlgmr.msra.gmra.mxu1 %vm885_vm5, %v959_v24  ;;  %6915 = vmatmul.mubr.msk.f32.vlgmr.msra.gmra.mxu0 %vm885_vm5, %v1036_v25  ;;  %v1850_v24 = vld [vmem:[#allocation13 + $0x38] sm:$0xff]  ;;  %v1849_v25 = vld [vmem:[#allocation13 + $0x30] sm:$0xff] }
 0x210   : > { %v6896_v26 = vpop.f32.mrf.mxu0  ;;  %v6901_v27 = vpop.f32.mrf.mxu1  ;;  %6919 = vmatprep.mubr.msk.f32.mxu1 %vm7795_vm0, %v7794_v3  ;;  %6924 = vmatprep.mubr.msk.f32.mxu0 %vm7795_vm0, %v7794_v3 }
 0x211   : > { %v1848_v26 = vld [vmem:[#allocation13 + $0x28] sm:$0xff]  ;;  %v1847_v27 = vld [vmem:[#allocation13 + $0x20] sm:$0xff] }
 0x212   : > { %v1114_v28 = vpop.f32.mrf.mxu0 }
 0x214   : > { %v6906_v29 = vpop.f32.mrf.mxu0 }
 0x215   : > { %v1845_v29 = vld [vmem:[#allocation13 + $0x10] sm:$0xff] }
 0x2cf   : > { %v1190_v30 = vpop.f32.mrf.mxu1  ;;  %v1268_v31 = vpop.f32.mrf.mxu0 }
 0x2d0   : > { %v1191_v32 = vadd.f32 %v1190_v30, %v1114_v28  ;;  %v1846_v28 = vld [vmem:[#allocation13 + $0x18] sm:$0xff]  ;;  %v1844_v30 = vld [vmem:[#allocation13 + $0x8] sm:$0xff] }
 0x2d1   : > { %v6911_v34 = vpop.f32.mrf.mxu1  ;;  %v6916_v35 = vpop.f32.mrf.mxu0 }
 0x2d2   : > { %v1272_v36 = vadd.f32 %v1268_v31, %v1191_v32  ;;  %v1843_v31 = vld [vmem:[#allocation13] sm:$0xff]  ;;  %v5996_v32 = vld [vmem:[%s10376_s24 + $0xf8] sm:$0xff] }
 0x2d3   : > { %v5995_v35 = vld [vmem:[%s10377_s28 + $0xf0] sm:$0xff] }
 0x2d4   : > { %v1280_v37 = vadd.f32 %v5962_v33, %v1272_v36  ;;  %v5994_v36 = vld [vmem:[%s10377_s28 + $0xe8] sm:$0xff] }
 0x2d6   : > { %v1281_v38 = vmax.f32 %v1280_v37, 0.0  ;;  %v5993_v37 = vld [vmem:[%s10377_s28 + $0xe0] sm:$0xff] }
 0x2d8   : > { %6918 = vmatpush3.msk.msra.mxu1 %vm889_vm3, %v1281_v38  ;;  %v5992_v38 = vld [vmem:[%s10377_s28 + $0xd8] sm:$0xff] }
 0x2d9   : > { %6920 = vmatmul.mubr.msk.f32.vlgmr.msra.gmra.mxu1 %vm885_vm5, %v1282_v39  ;;  %6927 = vmatprep.subr.mxu1 %v7794_v3  ;;  %v5991_v39 = vld [vmem:[%s10377_s28 + $0xd0] sm:$0xff] }
 0x2da   : > { %6929 = vmatprep.mubr.msk.f32.mxu1 %vm7795_vm0, %v7794_v3 }
 0x399   : > { %v1355_v40 = vpop.f32.mrf.mxu1 }
 0x39a   : > { %6923 = vmatpush3.msra.mxu0 %v1355_v40  ;;  %6928 = vmatpush3.msra.mxu1 %v1355_v40 }
 0x39b   : > { %v6921_v42 = vpop.f32.mrf.mxu1  ;;  %6925 = vmatmul.mubr.msk.f32.vlgmr.msra.gmra.mxu0 %vm1359_vm6, %v8126_v19  ;;  %6930 = vmatmul.mubr.msk.f32.vlgmr.msra.gmra.mxu1 %vm1359_vm6, %v8129_v20 }
 0x39c   : > { %6932 = vmatprep.subr.mxu1 %v7794_v3  ;;  %6948 = vmatprep.mubr.msk.f32.mxu1 %vm7795_vm0, %v7794_v3  ;;  %v5988_v42 = vld [vmem:[%s10377_s28 + $0xb8] sm:$0xff] }
 0x39d   : > { %6933 = vmatpush3.msra.mxu1 %v1520_v41  ;;  %6970 = vmatprep.subr.mxu0 %v7794_v3  ;;  %v5989_v41 = vld [vmem:[%s10377_s28 + $0xc0] sm:$0xff] }
 0x39e   : > { %6934 = vmatprep.subr.mxu1 %v7794_v3  ;;  %6971 = vmatpush3.msra.mxu0 %v1676_v43  ;;  %v5987_v43 = vld [vmem:[%s10377_s28 + $0xb0] sm:$0xff] }
 0x39f   : > { %6935 = vmatpush3.msra.mxu1 %v1519_v44  ;;  %6972 = vmatprep.subr.mxu0 %v7794_v3  ;;  %v5986_v44 = vld [vmem:[%s10377_s28 + $0xa8] sm:$0xff] }
 0x3a0   : > { %6936 = vmatprep.subr.mxu1 %v7794_v3  ;;  %6973 = vmatpush3.msra.mxu0 %v1675_v45  ;;  %v5985_v45 = vld [vmem:[%s10377_s28 + $0xa0] sm:$0xff] }
 0x3a1   : > { %6937 = vmatpush3.msra.mxu1 %v1518_v46  ;;  %6974 = vmatprep.subr.mxu0 %v7794_v3  ;;  %v5984_v46 = vld [vmem:[%s10377_s28 + $0x98] sm:$0xff] }
 0x3a2   : > { %6938 = vmatprep.subr.mxu1 %v7794_v3  ;;  %6975 = vmatpush3.msra.mxu0 %v1674_v47  ;;  %v5983_v47 = vld [vmem:[%s10377_s28 + $0x90] sm:$0xff] }
 0x3a3   : > { %6939 = vmatpush3.msra.mxu1 %v1517_v48  ;;  %6976 = vmatprep.subr.mxu0 %v7794_v3  ;;  %v5982_v48 = vld [vmem:[%s10377_s28 + $0x88] sm:$0xff] }
 0x3a4   : > { %6940 = vmatprep.subr.mxu1 %v7794_v3  ;;  %6977 = vmatpush3.msra.mxu0 %v1673_v49  ;;  %v5981_v49 = vld [vmem:[%s10377_s28 + $0x80] sm:$0xff] }
 0x3a5   : > { %6941 = vmatpush3.msra.mxu1 %v1516_v50  ;;  %6978 = vmatprep.subr.mxu0 %v7794_v3  ;;  %v6012_v50 = vld [vmem:[%s10377_s28 + $0x178] sm:$0xff] }
 0x3a6   : > { %6942 = vmatprep.subr.mxu1 %v7794_v3  ;;  %6979 = vmatpush3.msra.mxu0 %v1672_v51  ;;  %v1932_v51 = vadd.s32 8, %v8103_v6 }
 0x3a7   : > { %6943 = vmatpush3.msra.mxu1 %v1515_v52  ;;  %6980 = vmatprep.subr.mxu0 %v7794_v3 }
 0x3a8   : > { %6944 = vmatprep.subr.mxu1 %v7794_v3  ;;  %6981 = vmatpush3.msra.mxu0 %v1671_v53  ;;  %v1933_v52 = vadd.s32 4294967295, %v1932_v51  ;;  %v2018_v53 = vadd.s32 1, %v1932_v51  ;;  %v2522_v51 = vld [vmem:[#allocation14 + $0xf8] sm:$0xff] }
 0x3a9   : > { %6945 = vmatpush3.msra.mxu1 %v1514_v54  ;;  %6982 = vmatprep.subr.mxu0 %v7794_v3 }
 0x3aa   : > { %6946 = vmatprep.subr.mxu1 %v7794_v3  ;;  %6983 = vmatpush3.msra.mxu0 %v1670_v55  ;;  %vm1934_vm9 = vcmp.eq.s32.totalorder %v8111_v10, %v1933_v52  ;;  %vm2019_vm10 = vcmp.eq.s32.totalorder %v8111_v10, %v2018_v53  ;;  %v2392_v52 = vld [vmem:[%s10297_s15 + $0x10] sm:$0xff]  ;;  %v2521_v53 = vld [vmem:[#allocation14 + $0xf0] sm:$0xff] }
 0x3ab   : > { %6947 = vmatpush3.msra.mxu1 %v1513_v56  ;;  %6984 = vmatprep.subr.mxu0 %v7794_v3  ;;  %v8281_v56 = vsel %vm1934_vm9, 1.0, %v7794_v3 }
 0x3ac   : > { %6949 = vmatmul.mubr.msk.f32.vlgmr.msra.gmra.mxu1 %vm1521_vm7, %v1355_v40  ;;  %6951 = vmatprep.subr.mxu1 %v7794_v3  ;;  %v5990_v40 = vld [vmem:[%s10377_s28 + $0xc8] sm:$0xff] }
 0x3ad   : > { %6952 = vmatpush3.msra.mxu1 %v1511_v57  ;;  %6967 = vmatprep.mubr.msk.f32.mxu1 %vm7795_vm0, %v7794_v3  ;;  %v6011_v57 = vld [vmem:[%s10377_s28 + $0x170] sm:$0xff] }
 0x3ae   : > { %6953 = vmatprep.subr.mxu1 %v7794_v3  ;;  %6986 = vmatprep.mubr.msk.f32.mxu0 %vm7795_vm0, %v7794_v3 }
 0x3af   : > { %6954 = vmatpush3.msra.mxu1 %v1510_v58  ;;  %6985 = vmatpush3.msra.mxu0 %v1669_v1  ;;  %v8292_v58 = vsel %vm2019_vm10, 1.0, %v7794_v3  ;;  %v6008_v1 = vld [vmem:[%s10377_s28 + $0x158] sm:$0xff] }
 0x3b0   : > { %6955 = vmatprep.subr.mxu1 %v7794_v3 }
 0x3b1   : > { %6956 = vmatpush3.msra.mxu1 %v1509_v59  ;;  %v2117_v59 = vld [vmem:[%s10377_s28 + $0x78] sm:$0xff] }
 0x3b2   : > { %6957 = vmatprep.subr.mxu1 %v7794_v3 }
 0x3b3   : > { %6958 = vmatpush3.msra.mxu1 %v1508_v60  ;;  %v2116_v60 = vld [vmem:[%s10377_s28 + $0x70] sm:$0xff] }
 0x3b4   : > { %6959 = vmatprep.subr.mxu1 %v7794_v3 }
 0x3b5   : > { %6960 = vmatpush3.msra.mxu1 %v1507_v61  ;;  %v6010_v61 = vld [vmem:[%s10377_s28 + $0x168] sm:$0xff] }
 0x3b6   : > { %6961 = vmatprep.subr.mxu1 %v7794_v3 }
 0x3b7   : > { %6962 = vmatpush3.msra.mxu1 %v1506_v62  ;;  %v2115_v62 = vld [vmem:[%s10377_s28 + $0x68] sm:$0xff] }
 0x3b8   : > { %6963 = vmatprep.subr.mxu1 %v7794_v3 }
 0x3b9   : > { %6964 = vmatpush3.msra.mxu1 %v1505_v63  ;;  %v6009_v63 = vld [vmem:[%s10377_s28 + $0x160] sm:$0xff] }
 0x3ba   : > { %6965 = vmatprep.subr.mxu1 %v7794_v3 }
 0x3bb   : > { %6966 = vmatpush3.msra.mxu1 %v1504_v0  ;;  %v2114_v0 = vld [vmem:[%s10377_s28 + $0x60] sm:$0xff] }
 0x45b   : > { %v1428_v2 = vpop.f32.mrf.mxu0  ;;  %v1500_v4 = vpop.f32.mrf.mxu1 }
 0x45c   : > { %6968 = vmatmul.mubr.msk.f32.vlgmr.msra.gmra.mxu1 %vm1521_vm7, %v1428_v2  ;;  %6987 = vmatmul.mubr.msk.f32.vlgmr.msra.gmra.mxu0 %vm1521_vm7, %v1500_v4  ;;  %v2113_v2 = vld [vmem:[%s10377_s28 + $0x58] sm:$0xff]  ;;  %v6007_v4 = vld [vmem:[%s10377_s28 + $0x150] sm:$0xff] }
 0x45d   : > { %v6926_v5 = vpop.f32.mrf.mxu0  ;;  %v6931_v7 = vpop.f32.mrf.mxu1  ;;  %6991 = vmatprep.mubr.msk.f32.mxu1 %vm1359_vm6, %v1760_v11  ;;  %7017 = vmatprep.mubr.msk.f32.mxu0 %vm1937_vm8, %v8126_v19  ;;  %v2110_v11 = vld [vmem:[%s10377_s28 + $0x40] sm:$0xff] }
 0x45e   : > { %v2112_v5 = vld [vmem:[%s10377_s28 + $0x50] sm:$0xff]  ;;  %v6006_v7 = vld [vmem:[%s10377_s28 + $0x148] sm:$0xff] }
 0x46c   : > { %v1591_v8 = vpop.f32.mrf.mxu1 }
 0x46e   : > { %v6950_v9 = vpop.f32.mrf.mxu1 }
 0x46f   : > { %v6005_v9 = vld [vmem:[%s10377_s28 + $0x140] sm:$0xff] }
 0x51c   : > { %v1664_v12 = vpop.f32.mrf.mxu1  ;;  %v1746_v13 = vpop.f32.mrf.mxu0 }
 0x51d   : > { %v1665_v14 = vadd.f32 %v1664_v12, %v1591_v8  ;;  %v2111_v8 = vld [vmem:[%s10377_s28 + $0x48] sm:$0xff]  ;;  %v6004_v12 = vld [vmem:[%s10377_s28 + $0x138] sm:$0xff] }
 0x51e   : > { %v6969_v16 = vpop.f32.mrf.mxu1  ;;  %v6988_v17 = vpop.f32.mrf.mxu0 }
 0x51f   : > { %v1750_v18 = vadd.f32 %v1746_v13, %v1665_v14  ;;  %v2109_v13 = vld [vmem:[%s10377_s28 + $0x38] sm:$0xff]  ;;  %v6003_v14 = vld [vmem:[%s10377_s28 + $0x130] sm:$0xff]  ;;  %v6002_v16 = vld [vmem:[%s10377_s28 + $0x128] sm:$0xff] }
 0x520   : > { %v2107_v17 = vld [vmem:[%s10377_s28 + $0x28] sm:$0xff] }
 0x521   : > { %v1758_v21 = vadd.f32 %v5970_v15, %v1750_v18  ;;  %v2108_v15 = vld [vmem:[%s10377_s28 + $0x30] sm:$0xff]  ;;  %v6001_v18 = vld [vmem:[%s10377_s28 + $0x120] sm:$0xff] }
 0x523   : > { %v1759_v22 = vmax.f32 %v1758_v21, 0.0  ;;  %v2106_v21 = vld [vmem:[%s10377_s28 + $0x20] sm:$0xff] }
 0x525   : > { %6989 = vmatprep.subr.mxu1 %v1759_v22 }
 0x526   : > { %6990 = vmatpush3.msra.mxu1 %v1759_v22  ;;  %v2105_v22 = vld [vmem:[%s10377_s28 + $0x18] sm:$0xff] }
 0x527   : > { %6992 = vmatmul.mubr.msk.f32.vlgmr.msra.gmra.mxu1 %vm1359_vm6, %v1761_v23  ;;  %6994 = vmatprep.subr.mxu1 %v1850_v24  ;;  %v2104_v23 = vld [vmem:[%s10377_s28 + $0x10] sm:$0xff] }
 0x528   : > { %6995 = vmatpush3.msra.mxu1 %v1850_v24  ;;  %v2103_v24 = vld [vmem:[%s10377_s28 + $0x8] sm:$0xff] }
 0x529   : > { %6996 = vmatprep.subr.mxu1 %v1849_v25 }
 0x52a   : > { %6997 = vmatpush3.msra.mxu1 %v1849_v25  ;;  %v6000_v25 = vld [vmem:[%s10377_s28 + $0x118] sm:$0xff] }
 0x52b   : > { %6998 = vmatprep.subr.mxu1 %v1848_v26 }
 0x52c   : > { %6999 = vmatpush3.msra.mxu1 %v1848_v26  ;;  %v2102_v26 = vld [vmem:[%s10377_s28] sm:$0xff] }
 0x52d   : > { %7000 = vmatprep.subr.mxu1 %v1847_v27 }
 0x52e   : > { %7001 = vmatpush3.msra.mxu1 %v1847_v27  ;;  %v5999_v27 = vld [vmem:[%s10377_s28 + $0x110] sm:$0xff] }
 0x52f   : > { %7002 = vmatprep.subr.mxu1 %v1846_v28 }
 0x530   : > { %7003 = vmatpush3.msra.mxu1 %v1846_v28  ;;  %v5998_v28 = vld [vmem:[%s10377_s28 + $0x108] sm:$0xff] }
 0x531   : > { %7004 = vmatprep.subr.mxu1 %v1845_v29 }
 0x532   : > { %7005 = vmatpush3.msra.mxu1 %v1845_v29  ;;  %v5997_v29 = vld [vmem:[%s10377_s28 + $0x100] sm:$0xff] }
 0x533   : > { %7006 = vmatprep.subr.mxu1 %v1844_v30 }
 0x534   : > { %7007 = vmatpush3.msra.mxu1 %v1844_v30 }
 0x535   : > { %7008 = vmatprep.subr.mxu1 %v1843_v31 }
 0x536   : > { %7009 = vmatpush3.msra.mxu1 %v1843_v31 }
 0x537   : > { %7027 = vmatprep.subr.mxu1 %v5996_v32 }
 0x5e7   : > { %v6993_v33 = vpop.f32.mrf.mxu1 }
 0x5e9   : > { %v1834_v34 = vpop.f32.mrf.mxu1 }
 0x5ea   : > { %7010 = vmatprep.mubr.msk.f32.mxu1 %vm1521_vm7, %v1834_v34  ;;  %v2390_v34 = vld [vmem:[%s10297_s15] sm:$0xff] }
 0x5eb   : > { %7011 = vmatmul.mubr.msk.f32.vlgmr.msra.gmra.mxu1 %vm1521_vm7, %v6993_v33 }
 0x5ec   : > { %7028 = vmatpush3.msra.mxu1 %v5996_v32 }
 0x5ed   : > { %7029 = vmatprep.subr.mxu1 %v5995_v35 }
 0x5ee   : > { %7030 = vmatpush3.msra.mxu1 %v5995_v35 }
 0x5ef   : > { %7031 = vmatprep.subr.mxu1 %v5994_v36 }
 0x5f0   : > { %7032 = vmatpush3.msra.mxu1 %v5994_v36 }
 0x5f1   : > { %7033 = vmatprep.subr.mxu1 %v5993_v37 }
 0x5f2   : > { %7034 = vmatpush3.msra.mxu1 %v5993_v37 }
 0x5f3   : > { %7035 = vmatprep.subr.mxu1 %v5992_v38 }
 0x5f4   : > { %7036 = vmatpush3.msra.mxu1 %v5992_v38 }
 0x5f5   : > { %7037 = vmatprep.subr.mxu1 %v5991_v39 }
 0x5f6   : > { %7038 = vmatpush3.msra.mxu1 %v5991_v39 }
 0x5f7   : > { %7039 = vmatprep.subr.mxu1 %v5990_v40 }
 0x5f8   : > { %7040 = vmatpush3.msra.mxu1 %v5990_v40 }
 0x5f9   : > { %7041 = vmatprep.subr.mxu1 %v5989_v41 }
 0x5fa   : > { %7042 = vmatpush3.msra.mxu1 %v5989_v41  ;;  %v6013_v41 = vld [vmem:[#allocation8] ss:$0 sm:$0xff] }
 0x5fb   : > { %7043 = vmatprep.subr.mxu1 %v5988_v42 }
 0x5fc   : > { %7044 = vmatpush3.msra.mxu1 %v5988_v42 }
 0x5fd   : > { %7045 = vmatprep.subr.mxu1 %v5987_v43 }
 0x5fe   : > { %7046 = vmatpush3.msra.mxu1 %v5987_v43 }
 0x5ff   : > { %7047 = vmatprep.subr.mxu1 %v5986_v44 }
 0x600   : > { %7048 = vmatpush3.msra.mxu1 %v5986_v44 }
 0x601   : > { %7049 = vmatprep.subr.mxu1 %v5985_v45 }
 0x602   : > { %7050 = vmatpush3.msra.mxu1 %v5985_v45 }
 0x603   : > { %7051 = vmatprep.subr.mxu1 %v5984_v46 }
 0x604   : > { %7052 = vmatpush3.msra.mxu1 %v5984_v46 }
 0x605   : > { %7053 = vmatprep.subr.mxu1 %v5983_v47 }
 0x606   : > { %7054 = vmatpush3.msra.mxu1 %v5983_v47 }
 0x607   : > { %7055 = vmatprep.subr.mxu1 %v5982_v48 }
 0x608   : > { %7056 = vmatpush3.msra.mxu1 %v5982_v48 }
 0x609   : > { %7057 = vmatprep.subr.mxu1 %v5981_v49 }
 0x60a   : > { %7058 = vmatpush3.msra.mxu1 %v5981_v49 }
 0x60b   : > { %7097 = vmatprep.subr.mxu1 %v6012_v50 }
 0x6ab   : > { %v7012_v54 = vpop.f32.mrf.mxu1 }
 0x6ac   : > { %7013 = vmatprep.subr.mxu0 %v7012_v54 }
 0x6ad   : > { %v1923_v55 = vpop.f32.mrf.mxu1  ;;  %7014 = vmatpush3.msra.mxu0 %v7012_v54 }
 0x6ae   : > { %7015 = vmatprep.subr.mxu0 %v1923_v55  ;;  %7059 = vmatprep.mubr.f32.mxu1 %v1923_v55 }
 0x6af   : > { %7016 = vmatpush3.msra.mxu0 %v1923_v55  ;;  %7060 = vmatmul.mubr.f32.vlgmr.msra.gmra.mxu1 %v7012_v54 }
 0x6b0   : > { %7018 = vmatmul.mubr.msk.f32.vlgmr.msra.gmra.mxu0 %vm1937_vm8, %v8281_v56  ;;  %7020 = vmatprep.subr.mxu0 %v7012_v54 }
 0x6b1   : > { %7021 = vmatpush3.msra.mxu0 %v7012_v54  ;;  %7024 = vmatprep.mubr.msk.f32.mxu0 %vm1937_vm8, %v8129_v20  ;;  %v2520_v54 = vld [vmem:[#allocation14 + $0xe8] sm:$0xff] }
 0x6b2   : > { %7022 = vmatprep.subr.mxu0 %v1923_v55  ;;  %7098 = vmatpush3.msra.mxu1 %v6012_v50  ;;  %v2391_v50 = vld [vmem:[%s10297_s15 + $0x8] sm:$0xff] }
 0x6b3   : > { %7023 = vmatpush3.msra.mxu0 %v1923_v55  ;;  %7099 = vmatprep.subr.mxu1 %v6011_v57  ;;  %v2519_v55 = vld [vmem:[#allocation14 + $0xe0] sm:$0xff] }
 0x6b4   : > { %7025 = vmatmul.mubr.msk.f32.vlgmr.msra.gmra.mxu0 %vm1937_vm8, %v8292_v58  ;;  %7062 = vmatprep.subr.mxu0 %v2117_v59 }
 0x6b5   : > { %7063 = vmatpush3.msra.mxu0 %v2117_v59  ;;  %7100 = vmatpush3.msra.mxu1 %v6011_v57  ;;  %v2393_v57 = vld [vmem:[%s10297_s15 + $0x18] sm:$0xff]  ;;  %v2518_v59 = vld [vmem:[#allocation14 + $0xd8] sm:$0xff] }
 0x6b6   : > { %7064 = vmatprep.subr.mxu0 %v2116_v60  ;;  %7101 = vmatprep.subr.mxu1 %v6010_v61 }
 0x6b7   : > { %7065 = vmatpush3.msra.mxu0 %v2116_v60  ;;  %7102 = vmatpush3.msra.mxu1 %v6010_v61  ;;  %v2517_v60 = vld [vmem:[#allocation14 + $0xd0] sm:$0xff]  ;;  %v2516_v61 = vld [vmem:[#allocation14 + $0xc8] sm:$0xff] }
 0x6b8   : > { %7066 = vmatprep.subr.mxu0 %v2115_v62  ;;  %7103 = vmatprep.subr.mxu1 %v6009_v63 }
 0x6b9   : > { %7067 = vmatpush3.msra.mxu0 %v2115_v62  ;;  %7104 = vmatpush3.msra.mxu1 %v6009_v63  ;;  %v2515_v62 = vld [vmem:[#allocation14 + $0xc0] sm:$0xff]  ;;  %v2514_v63 = vld [vmem:[#allocation14 + $0xb8] sm:$0xff] }
 0x6ba   : > { %7068 = vmatprep.subr.mxu0 %v2114_v0  ;;  %7105 = vmatprep.subr.mxu1 %v6008_v1 }
 0x6bb   : > { %7069 = vmatpush3.msra.mxu0 %v2114_v0  ;;  %7106 = vmatpush3.msra.mxu1 %v6008_v1  ;;  %v2513_v0 = vld [vmem:[#allocation14 + $0xb0] sm:$0xff]  ;;  %v2512_v1 = vld [vmem:[#allocation14 + $0xa8] sm:$0xff] }
 0x6bc   : > { %7070 = vmatprep.subr.mxu0 %v2113_v2  ;;  %7107 = vmatprep.subr.mxu1 %v6007_v4 }
 0x6bd   : > { %7071 = vmatpush3.msra.mxu0 %v2113_v2  ;;  %7108 = vmatpush3.msra.mxu1 %v6007_v4  ;;  %v2511_v2 = vld [vmem:[#allocation14 + $0xa0] sm:$0xff]  ;;  %v2510_v4 = vld [vmem:[#allocation14 + $0x98] sm:$0xff] }
 0x6be   : > { %7072 = vmatprep.subr.mxu0 %v2112_v5  ;;  %7109 = vmatprep.subr.mxu1 %v6006_v7 }
 0x6bf   : > { %7073 = vmatpush3.msra.mxu0 %v2112_v5  ;;  %7110 = vmatpush3.msra.mxu1 %v6006_v7  ;;  %v2509_v5 = vld [vmem:[#allocation14 + $0x90] sm:$0xff]  ;;  %v2508_v7 = vld [vmem:[#allocation14 + $0x88] sm:$0xff] }
 0x6c0   : > { %7074 = vmatprep.subr.mxu0 %v2111_v8  ;;  %7111 = vmatprep.subr.mxu1 %v6005_v9 }
 0x6c1   : > { %7075 = vmatpush3.msra.mxu0 %v2111_v8  ;;  %7112 = vmatpush3.msra.mxu1 %v6005_v9  ;;  %v2507_v8 = vld [vmem:[#allocation14 + $0x80] sm:$0xff]  ;;  %v2506_v9 = vld [vmem:[#allocation14 + $0x78] sm:$0xff] }
 0x6c2   : > { %7076 = vmatprep.subr.mxu0 %v2110_v11  ;;  %7113 = vmatprep.subr.mxu1 %v6004_v12 }
 0x6c3   : > { %7077 = vmatpush3.msra.mxu0 %v2110_v11  ;;  %7114 = vmatpush3.msra.mxu1 %v6004_v12  ;;  %v2505_v11 = vld [vmem:[#allocation14 + $0x70] sm:$0xff]  ;;  %v2504_v12 = vld [vmem:[#allocation14 + $0x68] sm:$0xff] }
 0x6c4   : > { %7078 = vmatprep.subr.mxu0 %v2109_v13  ;;  %7115 = vmatprep.subr.mxu1 %v6003_v14 }
 0x6c5   : > { %7079 = vmatpush3.msra.mxu0 %v2109_v13  ;;  %7116 = vmatpush3.msra.mxu1 %v6003_v14  ;;  %v2503_v13 = vld [vmem:[#allocation14 + $0x60] sm:$0xff]  ;;  %v2502_v14 = vld [vmem:[#allocation14 + $0x58] sm:$0xff] }
 0x6c6   : > { %7080 = vmatprep.subr.mxu0 %v2108_v15  ;;  %7117 = vmatprep.subr.mxu1 %v6002_v16 }
 0x6c7   : > { %7081 = vmatpush3.msra.mxu0 %v2108_v15  ;;  %7118 = vmatpush3.msra.mxu1 %v6002_v16  ;;  %v2501_v15 = vld [vmem:[#allocation14 + $0x50] sm:$0xff]  ;;  %v2500_v16 = vld [vmem:[#allocation14 + $0x48] sm:$0xff] }
 0x6c8   : > { %7082 = vmatprep.subr.mxu0 %v2107_v17  ;;  %7119 = vmatprep.subr.mxu1 %v6001_v18 }
 0x6c9   : > { %7083 = vmatpush3.msra.mxu0 %v2107_v17  ;;  %7120 = vmatpush3.msra.mxu1 %v6001_v18  ;;  %v2499_v17 = vld [vmem:[#allocation14 + $0x40] sm:$0xff]  ;;  %v2498_v18 = vld [vmem:[#allocation14 + $0x38] sm:$0xff] }
 0x6ca   : > { %7084 = vmatprep.subr.mxu0 %v2106_v21  ;;  %7121 = vmatprep.subr.mxu1 %v6000_v25 }
 0x6cb   : > { %7085 = vmatpush3.msra.mxu0 %v2106_v21  ;;  %7122 = vmatpush3.msra.mxu1 %v6000_v25  ;;  %v2497_v21 = vld [vmem:[#allocation14 + $0x30] sm:$0xff] }
 0x6cc   : > { %7086 = vmatprep.subr.mxu0 %v2105_v22  ;;  %7123 = vmatprep.subr.mxu1 %v5999_v27  ;;  %v2493_v25 = vld [vmem:[#allocation14 + $0x10] sm:$0xff] }
 0x6cd   : > { %7087 = vmatpush3.msra.mxu0 %v2105_v22  ;;  %7124 = vmatpush3.msra.mxu1 %v5999_v27  ;;  %v2496_v22 = vld [vmem:[#allocation14 + $0x28] sm:$0xff]  ;;  %v2491_v27 = vld [vmem:[#allocation14] sm:$0xff] }
 0x6ce   : > { %7088 = vmatprep.subr.mxu0 %v2104_v23  ;;  %7125 = vmatprep.subr.mxu1 %v5998_v28 }
 0x6cf   : > { %7089 = vmatpush3.msra.mxu0 %v2104_v23  ;;  %7126 = vmatpush3.msra.mxu1 %v5998_v28  ;;  %v2495_v23 = vld [vmem:[#allocation14 + $0x20] sm:$0xff] }
 0x6d0   : > { %7090 = vmatprep.subr.mxu0 %v2103_v24  ;;  %7127 = vmatprep.subr.mxu1 %v5997_v29 }
 0x6d1   : > { %7091 = vmatpush3.msra.mxu0 %v2103_v24  ;;  %7128 = vmatpush3.msra.mxu1 %v5997_v29  ;;  %v2494_v24 = vld [vmem:[#allocation14 + $0x18] sm:$0xff] }
 0x6d2   : > { %7092 = vmatprep.subr.mxu0 %v2102_v26 }
 0x6d3   : > { %7093 = vmatpush3.msra.mxu0 %v2102_v26  ;;  %v2492_v26 = vld [vmem:[#allocation14 + $0x8] sm:$0xff] }
 0x76f   : > { %v7061_v35 = vpop.f32.mrf.mxu1 }
 0x770   : > { %v7019_v30 = vpop.f32.mrf.mxu0 }
 0x771   : > { %v2201_v37 = vpop.f32.mrf.mxu1 }
 0x772   : > { %v2009_v31 = vpop.f32.mrf.mxu0 }
 0x773   : > { %7094 = vmatprep.mubr.f32.mxu0 %v2009_v31 }
 0x774   : > { %v7026_v32 = vpop.f32.mrf.mxu0  ;;  %7095 = vmatmul.mubr.f32.vlgmr.msra.gmra.mxu0 %v7019_v30 }
 0x775   : > { %7136 = vmatprep.mubr.msk.f32.mxu0 %vm1937_vm8, %v2390_v34 }
 0x776   : > { %v2093_v33 = vpop.f32.mrf.mxu0 }
 0x777   : > { %7129 = vmatprep.mubr.f32.mxu1 %v2093_v33 }
 0x778   : > { %7130 = vmatmul.mubr.f32.vlgmr.msra.gmra.mxu1 %v7026_v32 }
 0x779   : > { %2697 = vmatprep.mubr.f32.mxu1 %v7794_v3 }
 0x834   : > { %v7096_v36 = vpop.f32.mrf.mxu0 }
 0x835   : > { %v2282_v39 = vadd.f32 %v7096_v36, %v7061_v35 }
 0x836   : > { %v2276_v38 = vpop.f32.mrf.mxu0 }
 0x837   : > { %v2277_v42 = vadd.f32 %v2276_v38, %v2201_v37 }
 0x838   : > { %v7131_v40 = vpop.f32.mrf.mxu1 }
 0x839   : > { %v2378_v43 = vadd.f32 %v7131_v40, %v2282_v39  ;;  %v2612_v40 = vadd.s32 16, %v8103_v6 }
 0x83a   : > { %v2368_v44 = vpop.f32.mrf.mxu1 }
 0x83b   : > { %v2387_v45 = vadd.f32 %v6013_v41, %v2378_v43  ;;  %v2377_v46 = vadd.f32 %v2368_v44, %v2277_v42  ;;  %v2722_v42 = vadd.s32 1, %v2612_v40  ;;  %v2613_v43 = vadd.s32 24, %v8103_v6  ;;  %v6060_v44 = vld [vmem:[%s10378_s9 + $0x2f0] sm:$0xff] }
 0x83d   : > { %v2389_v47 = vmax.f32 %v2387_v45, 0.0  ;;  %v2386_v48 = vadd.f32 %v6013_v41, %v2377_v46  ;;  %v6061_v41 = vld [vmem:[%s10378_s9 + $0x2f8] sm:$0xff]  ;;  %v2614_v45 = vadd.s32 4294967295, %v2612_v40  ;;  %v6059_v46 = vld [vmem:[%s10378_s9 + $0x2e8] sm:$0xff]  ;;  %vm2724_vm12 = vcmp.eq.s32.totalorder %v8111_v10, %v2722_v42  ;;  %v2847_v40 = vld [vmem:[%s10378_s9 + $0x90] sm:$0xff] }
 0x83e   : > { %v2846_v42 = vld [vmem:[%s10378_s9 + $0x88] sm:$0xff] }
 0x83f   : > { %7132 = vmatprep.subr.mxu0 %v2389_v47  ;;  %v2388_v49 = vmax.f32 %v2386_v48, 0.0  ;;  %v6058_v48 = vld [vmem:[%s10378_s9 + $0x2e0] sm:$0xff]  ;;  %vm2616_vm13 = vcmp.eq.s32.totalorder %v8111_v10, %v2614_v45  ;;  %v6032_v45 = vld [vmem:[%s10378_s9 + $0x210] sm:$0xff] }
 0x840   : > { %7133 = vmatpush3.msra.mxu0 %v2389_v47  ;;  %v2860_v47 = vld [vmem:[%s10378_s9 + $0xf8] sm:$0xff] }
 0x841   : > { %7134 = vmatprep.subr.mxu0 %v2388_v49 }
 0x842   : > { %7135 = vmatpush3.msra.mxu0 %v2388_v49  ;;  %v6057_v49 = vld [vmem:[%s10378_s9 + $0x2d8] sm:$0xff] }
 0x843   : > { %7137 = vmatmul.mubr.msk.f32.vlgmr.msra.gmra.mxu0 %vm1937_vm8, %v2391_v50  ;;  %2523 = vmatprep.subr.mxu0 %v2522_v51  ;;  %v2723_v50 = vadd.s32 1, %v2613_v43  ;;  %v6056_v51 = vld [vmem:[%s10378_s9 + $0x2d0] sm:$0xff] }
 0x844   : > { %7139 = vmatprep.mubr.msk.f32.mxu0 %vm1937_vm8, %v2392_v52  ;;  %2524 = vmatpush1.msra.mxu0 %v2521_v53  ;;  %v2615_v52 = vadd.s32 4294967295, %v2613_v43  ;;  %v6055_v53 = vld [vmem:[%s10378_s9 + $0x2c8] sm:$0xff]  ;;  %v6033_v43 = vld [vmem:[%s10378_s9 + $0x218] sm:$0xff] }
 0x845   : > { %2525 = vmatprep.subr.mxu0 %v2520_v54  ;;  %v6054_v54 = vld [vmem:[%s10378_s9 + $0x2c0] sm:$0xff]  ;;  %vm2725_vm14 = vcmp.eq.s32.totalorder %v8111_v10, %v2723_v50  ;;  %v2842_v50 = vld [vmem:[%s10378_s9 + $0x68] sm:$0xff] }
 0x846   : > { %2526 = vmatpush1.msra.mxu0 %v2519_v55  ;;  %v8482_v55 = vsel %vm2724_vm12, 1.0, %v7794_v3  ;;  %vm2617_vm15 = vcmp.eq.s32.totalorder %v8111_v10, %v2615_v52  ;;  %v2841_v52 = vld [vmem:[%s10378_s9 + $0x60] sm:$0xff] }
 0x847   : > { %7140 = vmatmul.mubr.msk.f32.gmra.mxu0 %vm1937_vm8, %v2393_v57  ;;  %2527 = vmatprep.subr.mxu0 %v2518_v59  ;;  %v8486_v57 = vsel %vm2616_vm13, 1.0, %v7794_v3  ;;  %v6053_v59 = vld [vmem:[%s10378_s9 + $0x2b8] sm:$0xff] }
 0x848   : > { %2528 = vmatpush1.msra.mxu0 %v2517_v60  ;;  %2587 = vmatprep.mubr.f32.mxu0 %v7794_v3  ;;  %v6052_v60 = vld [vmem:[%s10378_s9 + $0x2b0] sm:$0xff] }
 0x849   : > { %2529 = vmatprep.subr.mxu0 %v2516_v61  ;;  %v6051_v61 = vld [vmem:[%s10378_s9 + $0x2a8] sm:$0xff] }
 0x84a   : > { %2530 = vmatpush1.msra.mxu0 %v2515_v62  ;;  %v6050_v62 = vld [vmem:[%s10378_s9 + $0x2a0] sm:$0xff] }
 0x84b   : > { %2531 = vmatprep.subr.mxu0 %v2514_v63  ;;  %v8508_v63 = vsel %vm2725_vm14, 1.0, %v7794_v3 }
 0x84c   : > { %2532 = vmatpush1.msra.mxu0 %v2513_v0  ;;  %v8512_v0 = vsel %vm2617_vm15, 1.0, %v7794_v3 }
 0x84d   : > { %2533 = vmatprep.subr.mxu0 %v2512_v1  ;;  %v6049_v1 = vld [vmem:[%s10378_s9 + $0x298] sm:$0xff] }
 0x84e   : > { %2534 = vmatpush1.msra.mxu0 %v2511_v2  ;;  %v6048_v2 = vld [vmem:[%s10378_s9 + $0x290] sm:$0xff] }
 0x84f   : > { %2535 = vmatprep.subr.mxu0 %v2510_v4  ;;  %v6047_v4 = vld [vmem:[%s10378_s9 + $0x288] sm:$0xff] }
 0x850   : > { %2536 = vmatpush1.msra.mxu0 %v2509_v5  ;;  %v2859_v5 = vld [vmem:[%s10378_s9 + $0xf0] sm:$0xff] }
 0x851   : > { %2537 = vmatprep.subr.mxu0 %v2508_v7  ;;  %v6046_v7 = vld [vmem:[%s10378_s9 + $0x280] sm:$0xff] }
 0x852   : > { %2538 = vmatpush1.msra.mxu0 %v2507_v8  ;;  %v2858_v8 = vld [vmem:[%s10378_s9 + $0xe8] sm:$0xff] }
 0x853   : > { %2539 = vmatprep.subr.mxu0 %v2506_v9  ;;  %v6045_v9 = vld [vmem:[%s10378_s9 + $0x278] sm:$0xff] }
 0x854   : > { %2540 = vmatpush1.msra.mxu0 %v2505_v11  ;;  %v2857_v11 = vld [vmem:[%s10378_s9 + $0xe0] sm:$0xff] }
 0x855   : > { %2541 = vmatprep.subr.mxu0 %v2504_v12  ;;  %v6044_v12 = vld [vmem:[%s10378_s9 + $0x270] sm:$0xff] }
 0x856   : > { %2542 = vmatpush1.msra.mxu0 %v2503_v13  ;;  %v2856_v13 = vld [vmem:[%s10378_s9 + $0xd8] sm:$0xff] }
 0x857   : > { %2543 = vmatprep.subr.mxu0 %v2502_v14  ;;  %v6043_v14 = vld [vmem:[%s10378_s9 + $0x268] sm:$0xff] }
 0x858   : > { %2544 = vmatpush1.msra.mxu0 %v2501_v15  ;;  %v2855_v15 = vld [vmem:[%s10378_s9 + $0xd0] sm:$0xff] }
 0x859   : > { %2545 = vmatprep.subr.mxu0 %v2500_v16  ;;  %v6042_v16 = vld [vmem:[%s10378_s9 + $0x260] sm:$0xff] }
 0x85a   : > { %2546 = vmatpush1.msra.mxu0 %v2499_v17  ;;  %v2854_v17 = vld [vmem:[%s10378_s9 + $0xc8] sm:$0xff] }
 0x85b   : > { %2547 = vmatprep.subr.mxu0 %v2498_v18  ;;  %v6041_v18 = vld [vmem:[%s10378_s9 + $0x258] sm:$0xff] }
 0x85c   : > { %2548 = vmatpush1.msra.mxu0 %v2497_v21  ;;  %v2853_v21 = vld [vmem:[%s10378_s9 + $0xc0] sm:$0xff] }
 0x85d   : > { %2549 = vmatprep.subr.mxu0 %v2496_v22  ;;  %v6040_v22 = vld [vmem:[%s10378_s9 + $0x250] sm:$0xff] }
 0x85e   : > { %2550 = vmatpush1.msra.mxu0 %v2495_v23  ;;  %v2852_v23 = vld [vmem:[%s10378_s9 + $0xb8] sm:$0xff] }
 0x85f   : > { %2551 = vmatprep.subr.mxu0 %v2494_v24  ;;  %v6039_v24 = vld [vmem:[%s10378_s9 + $0x248] sm:$0xff] }
 0x860   : > { %2552 = vmatpush1.msra.mxu0 %v2493_v25  ;;  %v2851_v25 = vld [vmem:[%s10378_s9 + $0xb0] sm:$0xff] }
 0x861   : > { %2553 = vmatprep.subr.mxu0 %v2492_v26  ;;  %v6038_v26 = vld [vmem:[%s10378_s9 + $0x240] sm:$0xff] }
 0x862   : > { %2554 = vmatpush1.msra.mxu0 %v2491_v27  ;;  %v2850_v27 = vld [vmem:[%s10378_s9 + $0xa8] sm:$0xff] }
 0x903   : > { %v7138_v28 = vpop.f32.mrf.mxu0 }
 0x905   : > { %v2472_v29 = vpop.f32.mrf.mxu0 }
 0x906   : > { %2588 = vmatmul.mubr.f32.vlgmr.msra.gmra.mxu0 %v2472_v29  ;;  %v2849_v29 = vld [vmem:[%s10378_s9 + $0xa0] sm:$0xff] }
 0x907   : > { %2593 = vmatprep.mubr.f32.mxu0 %v7794_v3  ;;  %v7141_v30 = vpop.f32.mrf.mxu0 }
 0x909   : > { %v2482_v31 = vpop.f32.mrf.mxu0 }
 0x90a   : > { %2594 = vmatmul.mubr.f32.gmra.mxu0 %v7138_v28  ;;  %v6037_v28 = vld [vmem:[%s10378_s9 + $0x238] sm:$0xff] }
 0x90b   : > { %2599 = vmatprep.mubr.f32.mxu0 %v7794_v3 }
 0x90e   : > { %2600 = vmatmul.mubr.f32.gmra.mxu0 %v2482_v31  ;;  %v2848_v31 = vld [vmem:[%s10378_s9 + $0x98] sm:$0xff] }
 0x90f   : > { %2605 = vmatprep.mubr.f32.mxu0 %v7794_v3 }
 0x912   : > { %2606 = vmatmul.mubr.f32.gmra.mxu0 %v7141_v30  ;;  %v6036_v30 = vld [vmem:[%s10378_s9 + $0x230] sm:$0xff] }
 0x913   : > { %2804 = vmatprep.mubr.f32.mxu0 %v7794_v3 }
 0x9c6   : > { %v8408_v32 = vpop.f32.mrf.mxu0 }
 0x9c8   : > { %v8410_v33 = vpop.f32.mrf.mxu0 }
 0x9ca   : > { %v8412_v34 = vpop.f32.mrf.mxu0 }
 0x9cc   : > { %v8414_v35 = vpop.f32.mrf.mxu0 }
 0x9ce   : > { %v8416_v36 = vpop.f32.mrf.mxu0 }
 0x9d0   : > { %v8418_v37 = vpop.f32.mrf.mxu0 }
 0x9d2   : > { %v8420_v38 = vpop.f32.mrf.mxu0 }
 0x9d4   : > { %v8422_v39 = vpop.f32.mrf.mxu0 }
 0x9d5   : > { %2657 = vmatprep.subr.mxu1 %v8422_v39  ;;  %2764 = vmatprep.subr.mxu0 %v8422_v39 }
 0x9d6   : > { %2658 = vmatpush1.msra.mxu1 %v8420_v38  ;;  %2765 = vmatpush1.msra.mxu0 %v8420_v38 }
 0x9d7   : > { %2659 = vmatprep.subr.mxu1 %v8418_v37  ;;  %2766 = vmatprep.subr.mxu0 %v8418_v37 }
 0x9d8   : > { %2660 = vmatpush1.msra.mxu1 %v8416_v36  ;;  %2767 = vmatpush1.msra.mxu0 %v8416_v36 }
 0x9d9   : > { %2661 = vmatprep.subr.mxu1 %v8414_v35  ;;  %2768 = vmatprep.subr.mxu0 %v8414_v35 }
 0x9da   : > { %2662 = vmatpush1.msra.mxu1 %v8412_v34  ;;  %2769 = vmatpush1.msra.mxu0 %v8412_v34 }
 0x9db   : > { %2663 = vmatprep.subr.mxu1 %v8410_v33  ;;  %2770 = vmatprep.subr.mxu0 %v8410_v33 }
 0x9dc   : > { %2664 = vmatpush1.msra.mxu1 %v8408_v32  ;;  %2771 = vmatpush1.msra.mxu0 %v8408_v32 }
 0x9dd   : > { %6020 = vmatmul.mubr.msk.f32.vlgmr.msra.gmra.mxu1 %vm2622_vm11, %v8126_v19  ;;  %6026 = vmatmul.mubr.msk.f32.vlgmr.msra.gmra.mxu0 %vm2622_vm11, %v8129_v20 }
 0x9de   : > { %2958 = vmatprep.subr.mxu1 %v6061_v41  ;;  %2703 = vmatprep.mubr.f32.mxu1 %v7794_v3  ;;  %v6034_v41 = vld [vmem:[%s10378_s9 + $0x220] sm:$0xff] }
 0x9df   : > { %2959 = vmatpush1.msra.mxu1 %v6060_v44  ;;  %2810 = vmatprep.mubr.f32.mxu0 %v7794_v3  ;;  %v2845_v44 = vld [vmem:[%s10378_s9 + $0x80] sm:$0xff] }
 0x9e0   : > { %2960 = vmatprep.subr.mxu1 %v6059_v46  ;;  %3047 = vmatprep.subr.mxu0 %v2860_v47  ;;  %v2844_v46 = vld [vmem:[%s10378_s9 + $0x78] sm:$0xff]  ;;  %v6031_v47 = vld [vmem:[%s10378_s9 + $0x208] sm:$0xff] }
 0x9e1   : > { %2961 = vmatpush1.msra.mxu1 %v6058_v48  ;;  %6027 = vmatmul.mubr.msk.f32.gmra.mxu0 %vm2622_vm11, %v8292_v58  ;;  %v2843_v48 = vld [vmem:[%s10378_s9 + $0x70] sm:$0xff] }
 0x9e2   : > { %6021 = vmatmul.mubr.msk.f32.gmra.mxu1 %vm2622_vm11, %v8281_v56  ;;  %2962 = vmatprep.subr.mxu1 %v6057_v49  ;;  %v6030_v49 = vld [vmem:[%s10378_s9 + $0x200] sm:$0xff] }
 0x9e3   : > { %2963 = vmatpush1.msra.mxu1 %v6056_v51  ;;  %2709 = vmatprep.mubr.f32.mxu1 %v7794_v3  ;;  %v6093_v51 = vld [vmem:[%s10378_s9 + $0x3f8] sm:$0xff] }
 0x9e4   : > { %2964 = vmatprep.subr.mxu1 %v6055_v53  ;;  %2816 = vmatprep.mubr.f32.mxu0 %v7794_v3  ;;  %v6092_v53 = vld [vmem:[%s10378_s9 + $0x3f0] sm:$0xff] }
 0x9e5   : > { %2965 = vmatpush1.msra.mxu1 %v6054_v54  ;;  %6028 = vmatmul.mubr.msk.f32.gmra.mxu0 %vm2622_vm11, %v8482_v55  ;;  %v2840_v54 = vld [vmem:[%s10378_s9 + $0x58] sm:$0xff] }
 0x9e6   : > { %6022 = vmatmul.mubr.msk.f32.gmra.mxu1 %vm2622_vm11, %v8486_v57  ;;  %2966 = vmatprep.subr.mxu1 %v6053_v59  ;;  %v6091_v59 = vld [vmem:[%s10378_s9 + $0x3e8] sm:$0xff] }
 0x9e7   : > { %2967 = vmatpush1.msra.mxu1 %v6052_v60  ;;  %2715 = vmatprep.mubr.f32.mxu1 %v7794_v3  ;;  %v2839_v60 = vld [vmem:[%s10378_s9 + $0x50] sm:$0xff] }
 0x9e8   : > { %2968 = vmatprep.subr.mxu1 %v6051_v61  ;;  %2822 = vmatprep.mubr.f32.mxu0 %v7794_v3  ;;  %v6090_v61 = vld [vmem:[%s10378_s9 + $0x3e0] sm:$0xff] }
 0x9e9   : > { %2969 = vmatpush1.msra.mxu1 %v6050_v62  ;;  %6029 = vmatmul.mubr.msk.f32.gmra.mxu0 %vm2622_vm11, %v8508_v63  ;;  %v2838_v62 = vld [vmem:[%s10378_s9 + $0x48] sm:$0xff] }
 0x9ea   : > { %6023 = vmatmul.mubr.msk.f32.gmra.mxu1 %vm2622_vm11, %v8512_v0  ;;  %2970 = vmatprep.subr.mxu1 %v6049_v1  ;;  %v6089_v1 = vld [vmem:[%s10378_s9 + $0x3d8] sm:$0xff] }
 0x9eb   : > { %2971 = vmatpush1.msra.mxu1 %v6048_v2  ;;  %3022 = vmatprep.mubr.f32.mxu1 %v8410_v33  ;;  %v6035_v33 = vld [vmem:[%s10378_s9 + $0x228] sm:$0xff]  ;;  %v2837_v2 = vld [vmem:[%s10378_s9 + $0x40] sm:$0xff] }
 0x9ec   : > { %2972 = vmatprep.subr.mxu1 %v6047_v4  ;;  %3048 = vmatpush1.msra.mxu0 %v2859_v5  ;;  %v6088_v4 = vld [vmem:[%s10378_s9 + $0x3d0] sm:$0xff]  ;;  %v2836_v5 = vld [vmem:[%s10378_s9 + $0x38] sm:$0xff] }
 0x9ed   : > { %2973 = vmatpush1.msra.mxu1 %v6046_v7  ;;  %3049 = vmatprep.subr.mxu0 %v2858_v8  ;;  %v6087_v7 = vld [vmem:[%s10378_s9 + $0x3c8] sm:$0xff]  ;;  %v2835_v8 = vld [vmem:[%s10378_s9 + $0x30] sm:$0xff] }
 0x9ee   : > { %2974 = vmatprep.subr.mxu1 %v6045_v9  ;;  %3050 = vmatpush1.msra.mxu0 %v2857_v11  ;;  %v6086_v9 = vld [vmem:[%s10378_s9 + $0x3c0] sm:$0xff]  ;;  %v2834_v11 = vld [vmem:[%s10378_s9 + $0x28] sm:$0xff] }
 0x9ef   : > { %2975 = vmatpush1.msra.mxu1 %v6044_v12  ;;  %3051 = vmatprep.subr.mxu0 %v2856_v13  ;;  %v6085_v12 = vld [vmem:[%s10378_s9 + $0x3b8] sm:$0xff]  ;;  %v2833_v13 = vld [vmem:[%s10378_s9 + $0x20] sm:$0xff] }
 0x9f0   : > { %2976 = vmatprep.subr.mxu1 %v6043_v14  ;;  %3052 = vmatpush1.msra.mxu0 %v2855_v15  ;;  %v6084_v14 = vld [vmem:[%s10378_s9 + $0x3b0] sm:$0xff]  ;;  %v2832_v15 = vld [vmem:[%s10378_s9 + $0x18] sm:$0xff] }
 0x9f1   : > { %2977 = vmatpush1.msra.mxu1 %v6042_v16  ;;  %3053 = vmatprep.subr.mxu0 %v2854_v17  ;;  %v6083_v16 = vld [vmem:[%s10378_s9 + $0x3a8] sm:$0xff]  ;;  %v2831_v17 = vld [vmem:[%s10378_s9 + $0x10] sm:$0xff] }
 0x9f2   : > { %2978 = vmatprep.subr.mxu1 %v6041_v18  ;;  %3054 = vmatpush1.msra.mxu0 %v2853_v21  ;;  %v6082_v18 = vld [vmem:[%s10378_s9 + $0x3a0] sm:$0xff]  ;;  %v2830_v21 = vld [vmem:[%s10378_s9 + $0x8] sm:$0xff] }
 0x9f3   : > { %2979 = vmatpush1.msra.mxu1 %v6040_v22  ;;  %3055 = vmatprep.subr.mxu0 %v2852_v23  ;;  %v6081_v22 = vld [vmem:[%s10378_s9 + $0x398] sm:$0xff]  ;;  %v2829_v23 = vld [vmem:[%s10378_s9] sm:$0xff] }
 0x9f4   : > { %2980 = vmatprep.subr.mxu1 %v6039_v24  ;;  %3056 = vmatpush1.msra.mxu0 %v2851_v25  ;;  %v6080_v24 = vld [vmem:[%s10378_s9 + $0x390] sm:$0xff]  ;;  %v2892_v25 = vld [vmem:[%s10378_s9 + $0x1f8] sm:$0xff] }
 0x9f5   : > { %2981 = vmatpush1.msra.mxu1 %v6038_v26  ;;  %3057 = vmatprep.subr.mxu0 %v2850_v27  ;;  %v6079_v26 = vld [vmem:[%s10378_s9 + $0x388] sm:$0xff]  ;;  %v2891_v27 = vld [vmem:[%s10378_s9 + $0x1f0] sm:$0xff] }
 0x9f6   : > { %2982 = vmatprep.subr.mxu1 %v6037_v28  ;;  %3058 = vmatpush1.msra.mxu0 %v2849_v29  ;;  %v6078_v28 = vld [vmem:[%s10378_s9 + $0x380] sm:$0xff]  ;;  %v2890_v29 = vld [vmem:[%s10378_s9 + $0x1e8] sm:$0xff] }
 0x9f7   : > { %2983 = vmatpush1.msra.mxu1 %v6036_v30  ;;  %3059 = vmatprep.subr.mxu0 %v2848_v31  ;;  %v6077_v30 = vld [vmem:[%s10378_s9 + $0x378] sm:$0xff]  ;;  %v2889_v31 = vld [vmem:[%s10378_s9 + $0x1e0] sm:$0xff] }
 0x9f8   : > { %2984 = vmatprep.subr.mxu1 %v6035_v33  ;;  %3060 = vmatpush1.msra.mxu0 %v2847_v40  ;;  %v6076_v33 = vld [vmem:[%s10378_s9 + $0x370] sm:$0xff]  ;;  %v2888_v40 = vld [vmem:[%s10378_s9 + $0x1d8] sm:$0xff] }
 0x9f9   : > { %2985 = vmatpush1.msra.mxu1 %v6034_v41  ;;  %3061 = vmatprep.subr.mxu0 %v2846_v42  ;;  %v6075_v41 = vld [vmem:[%s10378_s9 + $0x368] sm:$0xff]  ;;  %v2887_v42 = vld [vmem:[%s10378_s9 + $0x1d0] sm:$0xff] }
 0x9fa   : > { %2986 = vmatprep.subr.mxu1 %v6033_v43  ;;  %3062 = vmatpush1.msra.mxu0 %v2845_v44  ;;  %v6074_v43 = vld [vmem:[%s10378_s9 + $0x360] sm:$0xff]  ;;  %v2886_v44 = vld [vmem:[%s10378_s9 + $0x1c8] sm:$0xff] }
 0x9fb   : > { %2987 = vmatpush1.msra.mxu1 %v6032_v45  ;;  %3063 = vmatprep.subr.mxu0 %v2844_v46  ;;  %v6073_v45 = vld [vmem:[%s10378_s9 + $0x358] sm:$0xff]  ;;  %v2885_v46 = vld [vmem:[%s10378_s9 + $0x1c0] sm:$0xff] }
 0x9fc   : > { %2988 = vmatprep.subr.mxu1 %v6031_v47  ;;  %3064 = vmatpush1.msra.mxu0 %v2843_v48  ;;  %v6072_v47 = vld [vmem:[%s10378_s9 + $0x350] sm:$0xff]  ;;  %v2884_v48 = vld [vmem:[%s10378_s9 + $0x1b8] sm:$0xff] }
 0x9fd   : > { %2989 = vmatpush1.msra.mxu1 %v6030_v49  ;;  %3065 = vmatprep.subr.mxu0 %v2842_v50  ;;  %v6071_v49 = vld [vmem:[%s10378_s9 + $0x348] sm:$0xff]  ;;  %v2883_v50 = vld [vmem:[%s10378_s9 + $0x1b0] sm:$0xff] }
 0x9fe   : > { %2990 = vmatprep.subr.mxu1 %v6093_v51  ;;  %3066 = vmatpush1.msra.mxu0 %v2841_v52  ;;  %v6070_v51 = vld [vmem:[%s10378_s9 + $0x340] sm:$0xff]  ;;  %v2882_v52 = vld [vmem:[%s10378_s9 + $0x1a8] sm:$0xff] }
 0x9ff   : > { %2991 = vmatpush2.msra.mxu1 %v6092_v53  ;;  %3067 = vmatprep.subr.mxu0 %v2840_v54  ;;  %v6069_v53 = vld [vmem:[%s10378_s9 + $0x338] sm:$0xff]  ;;  %v2881_v54 = vld [vmem:[%s10378_s9 + $0x1a0] sm:$0xff] }
 0xa00   : > { %2992 = vmatprep.subr.mxu1 %v6091_v59  ;;  %3068 = vmatpush1.msra.mxu0 %v2839_v60  ;;  %v6068_v59 = vld [vmem:[%s10378_s9 + $0x330] sm:$0xff]  ;;  %v2880_v60 = vld [vmem:[%s10378_s9 + $0x198] sm:$0xff] }
 0xa01   : > { %2993 = vmatpush2.msra.mxu1 %v6090_v61  ;;  %3069 = vmatprep.subr.mxu0 %v2838_v62  ;;  %v6067_v61 = vld [vmem:[%s10378_s9 + $0x328] sm:$0xff]  ;;  %v2879_v62 = vld [vmem:[%s10378_s9 + $0x190] sm:$0xff] }
 0xa02   : > { %2994 = vmatprep.subr.mxu1 %v6089_v1  ;;  %3070 = vmatpush1.msra.mxu0 %v2837_v2  ;;  %v6066_v1 = vld [vmem:[%s10378_s9 + $0x320] sm:$0xff]  ;;  %v2878_v2 = vld [vmem:[%s10378_s9 + $0x188] sm:$0xff] }
 0xa03   : > { %2995 = vmatpush2.msra.mxu1 %v6088_v4  ;;  %3071 = vmatprep.subr.mxu0 %v2836_v5  ;;  %v6065_v4 = vld [vmem:[%s10378_s9 + $0x318] sm:$0xff]  ;;  %v2877_v5 = vld [vmem:[%s10378_s9 + $0x180] sm:$0xff] }
 0xa04   : > { %2996 = vmatprep.subr.mxu1 %v6087_v7  ;;  %3072 = vmatpush1.msra.mxu0 %v2835_v8  ;;  %v6064_v7 = vld [vmem:[%s10378_s9 + $0x310] sm:$0xff]  ;;  %v2876_v8 = vld [vmem:[%s10378_s9 + $0x178] sm:$0xff] }
 0xa05   : > { %2997 = vmatpush2.msra.mxu1 %v6086_v9  ;;  %3073 = vmatprep.subr.mxu0 %v2834_v11  ;;  %v6063_v9 = vld [vmem:[%s10378_s9 + $0x308] sm:$0xff]  ;;  %v2875_v11 = vld [vmem:[%s10378_s9 + $0x170] sm:$0xff] }
 0xa06   : > { %2998 = vmatprep.subr.mxu1 %v6085_v12  ;;  %3074 = vmatpush1.msra.mxu0 %v2833_v13  ;;  %v6062_v12 = vld [vmem:[%s10378_s9 + $0x300] sm:$0xff]  ;;  %v2874_v13 = vld [vmem:[%s10378_s9 + $0x168] sm:$0xff] }
 0xa07   : > { %2999 = vmatpush2.msra.mxu1 %v6084_v14  ;;  %3075 = vmatprep.subr.mxu0 %v2832_v15  ;;  %v6125_v14 = vld [vmem:[%s10378_s9 + $0x4f8] sm:$0xff]  ;;  %v6124_v15 = vld [vmem:[%s10378_s9 + $0x4f0] sm:$0xff] }
 0xa08   : > { %3000 = vmatprep.subr.mxu1 %v6083_v16  ;;  %3076 = vmatpush1.msra.mxu0 %v2831_v17  ;;  %v6123_v16 = vld [vmem:[%s10378_s9 + $0x4e8] sm:$0xff]  ;;  %v2873_v17 = vld [vmem:[%s10378_s9 + $0x160] sm:$0xff] }
 0xa09   : > { %3001 = vmatpush2.msra.mxu1 %v6082_v18  ;;  %3077 = vmatprep.subr.mxu0 %v2830_v21  ;;  %v6122_v18 = vld [vmem:[%s10378_s9 + $0x4e0] sm:$0xff]  ;;  %v2872_v21 = vld [vmem:[%s10378_s9 + $0x158] sm:$0xff] }
 0xa0a   : > { %3002 = vmatprep.subr.mxu1 %v6081_v22  ;;  %3078 = vmatpush1.msra.mxu0 %v2829_v23  ;;  %v6121_v22 = vld [vmem:[%s10378_s9 + $0x4d8] sm:$0xff]  ;;  %v6119_v23 = vld [vmem:[%s10378_s9 + $0x4c8] sm:$0xff] }
 0xa0b   : > { %3003 = vmatpush2.msra.mxu1 %v6080_v24  ;;  %3079 = vmatprep.subr.mxu0 %v2892_v25  ;;  %v6118_v24 = vld [vmem:[%s10378_s9 + $0x4c0] sm:$0xff]  ;;  %v2870_v25 = vld [vmem:[%s10378_s9 + $0x148] sm:$0xff] }
 0xa0c   : > { %3004 = vmatprep.subr.mxu1 %v6079_v26  ;;  %3080 = vmatpush2.msra.mxu0 %v2891_v27  ;;  %v6117_v26 = vld [vmem:[%s10378_s9 + $0x4b8] sm:$0xff]  ;;  %v6115_v27 = vld [vmem:[%s10378_s9 + $0x4a8] sm:$0xff] }
 0xa0d   : > { %3005 = vmatpush2.msra.mxu1 %v6078_v28  ;;  %3081 = vmatprep.subr.mxu0 %v2890_v29  ;;  %v6114_v28 = vld [vmem:[%s10378_s9 + $0x4a0] sm:$0xff]  ;;  %v2868_v29 = vld [vmem:[%s10378_s9 + $0x138] sm:$0xff] }
 0xa0e   : > { %3006 = vmatprep.subr.mxu1 %v6077_v30  ;;  %3082 = vmatpush2.msra.mxu0 %v2889_v31  ;;  %v6113_v30 = vld [vmem:[%s10378_s9 + $0x498] sm:$0xff]  ;;  %v2867_v31 = vld [vmem:[%s10378_s9 + $0x130] sm:$0xff] }
 0xa0f   : > { %3007 = vmatpush2.msra.mxu1 %v6076_v33  ;;  %3083 = vmatprep.subr.mxu0 %v2888_v40  ;;  %v2866_v33 = vld [vmem:[%s10378_s9 + $0x128] sm:$0xff]  ;;  %v6110_v40 = vld [vmem:[%s10378_s9 + $0x480] sm:$0xff] }
 0xa10   : > { %3008 = vmatprep.subr.mxu1 %v6075_v41  ;;  %3084 = vmatpush2.msra.mxu0 %v2887_v42  ;;  %v2865_v41 = vld [vmem:[%s10378_s9 + $0x120] sm:$0xff]  ;;  %v6109_v42 = vld [vmem:[%s10378_s9 + $0x478] sm:$0xff] }
 0xa11   : > { %3009 = vmatpush2.msra.mxu1 %v6074_v43  ;;  %3085 = vmatprep.subr.mxu0 %v2886_v44  ;;  %v2864_v43 = vld [vmem:[%s10378_s9 + $0x118] sm:$0xff]  ;;  %v2863_v44 = vld [vmem:[%s10378_s9 + $0x110] sm:$0xff] }
 0xa12   : > { %3010 = vmatprep.subr.mxu1 %v6073_v45  ;;  %3086 = vmatpush2.msra.mxu0 %v2885_v46  ;;  %v6107_v45 = vld [vmem:[%s10378_s9 + $0x468] sm:$0xff] }
 0xa13   : > { %3011 = vmatpush2.msra.mxu1 %v6072_v47  ;;  %3087 = vmatprep.subr.mxu0 %v2884_v48  ;;  %v2862_v46 = vld [vmem:[%s10378_s9 + $0x108] sm:$0xff]  ;;  %v6106_v47 = vld [vmem:[%s10378_s9 + $0x460] sm:$0xff] }
 0xa14   : > { %3012 = vmatprep.subr.mxu1 %v6071_v49  ;;  %3088 = vmatpush2.msra.mxu0 %v2883_v50  ;;  %v2861_v48 = vld [vmem:[%s10378_s9 + $0x100] sm:$0xff]  ;;  %v6105_v49 = vld [vmem:[%s10378_s9 + $0x458] sm:$0xff]  ;;  %v6104_v50 = vld [vmem:[%s10378_s9 + $0x450] sm:$0xff] }
 0xa15   : > { %3013 = vmatpush2.msra.mxu1 %v6070_v51  ;;  %3089 = vmatprep.subr.mxu0 %v2882_v52  ;;  %v6103_v51 = vld [vmem:[%s10378_s9 + $0x448] sm:$0xff]  ;;  %v6102_v52 = vld [vmem:[%s10378_s9 + $0x440] sm:$0xff] }
 0xa16   : > { %3014 = vmatprep.subr.mxu1 %v6069_v53  ;;  %3090 = vmatpush2.msra.mxu0 %v2881_v54  ;;  %v6101_v53 = vld [vmem:[%s10378_s9 + $0x438] sm:$0xff]  ;;  %v6100_v54 = vld [vmem:[%s10378_s9 + $0x430] sm:$0xff] }
 0xa17   : > { %3015 = vmatpush2.msra.mxu1 %v6068_v59  ;;  %3091 = vmatprep.subr.mxu0 %v2880_v60  ;;  %v6099_v59 = vld [vmem:[%s10378_s9 + $0x428] sm:$0xff]  ;;  %v6098_v60 = vld [vmem:[%s10378_s9 + $0x420] sm:$0xff] }
 0xa18   : > { %3016 = vmatprep.subr.mxu1 %v6067_v61  ;;  %3092 = vmatpush2.msra.mxu0 %v2879_v62  ;;  %v6097_v61 = vld [vmem:[%s10378_s9 + $0x418] sm:$0xff]  ;;  %v6096_v62 = vld [vmem:[%s10378_s9 + $0x410] sm:$0xff] }
 0xa19   : > { %3017 = vmatpush2.msra.mxu1 %v6066_v1  ;;  %3093 = vmatprep.subr.mxu0 %v2878_v2  ;;  %v6095_v1 = vld [vmem:[%s10378_s9 + $0x408] sm:$0xff]  ;;  %v6094_v2 = vld [vmem:[%s10378_s9 + $0x400] sm:$0xff] }
 0xa1a   : > { %3018 = vmatprep.subr.mxu1 %v6065_v4  ;;  %3094 = vmatpush2.msra.mxu0 %v2877_v5  ;;  %v6157_v4 = vld [vmem:[%s10378_s9 + $0x5f8] sm:$0xff]  ;;  %v6156_v5 = vld [vmem:[%s10378_s9 + $0x5f0] sm:$0xff] }
 0xa1b   : > { %3019 = vmatpush2.msra.mxu1 %v6064_v7  ;;  %3095 = vmatprep.subr.mxu0 %v2876_v8  ;;  %v6155_v7 = vld [vmem:[%s10378_s9 + $0x5e8] sm:$0xff]  ;;  %v6154_v8 = vld [vmem:[%s10378_s9 + $0x5e0] sm:$0xff] }
 0xa1c   : > { %3020 = vmatprep.subr.mxu1 %v6063_v9  ;;  %3096 = vmatpush2.msra.mxu0 %v2875_v11  ;;  %v6153_v9 = vld [vmem:[%s10378_s9 + $0x5d8] sm:$0xff]  ;;  %v6152_v11 = vld [vmem:[%s10378_s9 + $0x5d0] sm:$0xff] }
 0xa1d   : > { %3021 = vmatpush2.msra.mxu1 %v6062_v12  ;;  %3097 = vmatprep.subr.mxu0 %v2874_v13  ;;  %v6151_v12 = vld [vmem:[%s10378_s9 + $0x5c8] sm:$0xff]  ;;  %v6150_v13 = vld [vmem:[%s10378_s9 + $0x5c0] sm:$0xff] }
 0xa1e   : > { %3023 = vmatmul.mubr.f32.vlgmr.msra.gmra.mxu1 %v8408_v32  ;;  %3201 = vmatprep.subr.mxu1 %v6125_v14  ;;  %v6120_v32 = vld [vmem:[%s10378_s9 + $0x4d0] sm:$0xff]  ;;  %v6149_v14 = vld [vmem:[%s10378_s9 + $0x5b8] sm:$0xff] }
 0xa1f   : > { %3028 = vmatprep.mubr.f32.mxu1 %v8414_v35  ;;  %3202 = vmatpush1.msra.mxu1 %v6124_v15  ;;  %v2871_v35 = vld [vmem:[%s10378_s9 + $0x150] sm:$0xff] }
 0xa20   : > { %3203 = vmatprep.subr.mxu1 %v6123_v16  ;;  %3098 = vmatpush2.msra.mxu0 %v2873_v17  ;;  %v6148_v15 = vld [vmem:[%s10378_s9 + $0x5b0] sm:$0xff]  ;;  %v6147_v16 = vld [vmem:[%s10378_s9 + $0x5a8] sm:$0xff]  ;;  %v6146_v17 = vld [vmem:[%s10378_s9 + $0x5a0] sm:$0xff] }
 0xa21   : > { %3204 = vmatpush1.msra.mxu1 %v6122_v18  ;;  %3099 = vmatprep.subr.mxu0 %v2872_v21  ;;  %v6145_v18 = vld [vmem:[%s10378_s9 + $0x598] sm:$0xff]  ;;  %v6144_v21 = vld [vmem:[%s10378_s9 + $0x590] sm:$0xff] }
 0xa22   : > { %3029 = vmatmul.mubr.f32.gmra.mxu1 %v8412_v34  ;;  %3205 = vmatprep.subr.mxu1 %v6121_v22  ;;  %v6116_v34 = vld [vmem:[%s10378_s9 + $0x4b0] sm:$0xff]  ;;  %v6143_v22 = vld [vmem:[%s10378_s9 + $0x588] sm:$0xff] }
 0xa23   : > { %3034 = vmatprep.mubr.f32.mxu1 %v8418_v37  ;;  %3206 = vmatpush1.msra.mxu1 %v6120_v32  ;;  %v2869_v37 = vld [vmem:[%s10378_s9 + $0x140] sm:$0xff] }
 0xa24   : > { %3207 = vmatprep.subr.mxu1 %v6119_v23  ;;  %3100 = vmatpush2.msra.mxu0 %v2871_v35  ;;  %v6142_v32 = vld [vmem:[%s10378_s9 + $0x580] sm:$0xff]  ;;  %v6141_v23 = vld [vmem:[%s10378_s9 + $0x578] sm:$0xff]  ;;  %v6140_v35 = vld [vmem:[%s10378_s9 + $0x570] sm:$0xff] }
 0xa25   : > { %3208 = vmatpush1.msra.mxu1 %v6118_v24  ;;  %3101 = vmatprep.subr.mxu0 %v2870_v25  ;;  %v6139_v24 = vld [vmem:[%s10378_s9 + $0x568] sm:$0xff]  ;;  %v6138_v25 = vld [vmem:[%s10378_s9 + $0x560] sm:$0xff] }
 0xa26   : > { %3035 = vmatmul.mubr.f32.gmra.mxu1 %v8416_v36  ;;  %3209 = vmatprep.subr.mxu1 %v6117_v26  ;;  %v6112_v36 = vld [vmem:[%s10378_s9 + $0x490] sm:$0xff]  ;;  %v6137_v26 = vld [vmem:[%s10378_s9 + $0x558] sm:$0xff] }
 0xa27   : > { %3040 = vmatprep.mubr.f32.mxu1 %v8422_v39  ;;  %3210 = vmatpush1.msra.mxu1 %v6116_v34  ;;  %v6111_v39 = vld [vmem:[%s10378_s9 + $0x488] sm:$0xff]  ;;  %v6136_v34 = vld [vmem:[%s10378_s9 + $0x550] sm:$0xff] }
 0xa28   : > { %3211 = vmatprep.subr.mxu1 %v6115_v27  ;;  %3102 = vmatpush2.msra.mxu0 %v2869_v37  ;;  %v6135_v27 = vld [vmem:[%s10378_s9 + $0x548] sm:$0xff]  ;;  %v6134_v37 = vld [vmem:[%s10378_s9 + $0x540] sm:$0xff] }
 0xa29   : > { %3212 = vmatpush1.msra.mxu1 %v6114_v28  ;;  %3103 = vmatprep.subr.mxu0 %v2868_v29  ;;  %v6133_v28 = vld [vmem:[%s10378_s9 + $0x538] sm:$0xff]  ;;  %v6132_v29 = vld [vmem:[%s10378_s9 + $0x530] sm:$0xff] }
 0xa2a   : > { %3041 = vmatmul.mubr.f32.gmra.mxu1 %v8420_v38  ;;  %3213 = vmatprep.subr.mxu1 %v6113_v30  ;;  %v6108_v38 = vld [vmem:[%s10378_s9 + $0x470] sm:$0xff]  ;;  %v6131_v30 = vld [vmem:[%s10378_s9 + $0x528] sm:$0xff] }
 0xa2b   : > { %3214 = vmatpush1.msra.mxu1 %v6112_v36  ;;  %3104 = vmatpush2.msra.mxu0 %v2867_v31  ;;  %v6130_v36 = vld [vmem:[%s10378_s9 + $0x520] sm:$0xff]  ;;  %v6129_v31 = vld [vmem:[%s10378_s9 + $0x518] sm:$0xff] }
 0xa2c   : > { %3215 = vmatprep.subr.mxu1 %v6111_v39  ;;  %3105 = vmatprep.subr.mxu0 %v2866_v33  ;;  %v6128_v39 = vld [vmem:[%s10378_s9 + $0x510] sm:$0xff]  ;;  %v6127_v33 = vld [vmem:[%s10378_s9 + $0x508] sm:$0xff] }
 0xa2d   : > { %3216 = vmatpush1.msra.mxu1 %v6110_v40  ;;  %3106 = vmatpush2.msra.mxu0 %v2865_v41  ;;  %v6126_v40 = vld [vmem:[%s10378_s9 + $0x500] sm:$0xff]  ;;  %s7796_s9 = smov [#allocation19]  }
 0xa2e   : > { %3217 = vmatprep.subr.mxu1 %v6109_v42  ;;  %3107 = vmatprep.subr.mxu0 %v2864_v43  ;;  %s7694_s10 = sshll.u32 %s7796_s9, 4  ;;  %s7695_s10 = int_to_ptr.vmem [resolvable:$false] %s7694_s10 }
 0xa2f   : > { %3218 = vmatpush1.msra.mxu1 %v6108_v38  ;;  %3108 = vmatpush2.msra.mxu0 %v2863_v44  ;;  %p7697_p7 = scmp.lt.s32.totalorder %s5738_s4, %s7695_s10 }
 0xa30   : > { %3219 = vmatprep.subr.mxu1 %v6107_v45  ;;  %3109 = vmatprep.subr.mxu0 %v2862_v46 }
 0xa31   : > { %3220 = vmatpush1.msra.mxu1 %v6106_v47  ;;  %3110 = vmatpush2.msra.mxu0 %v2861_v48 }
 0xa32   : > { %3221 = vmatprep.subr.mxu1 %v6105_v49 }
 0xa33   : > { %3222 = vmatpush1.msra.mxu1 %v6104_v50 }
 0xa34   : > { %3223 = vmatprep.subr.mxu1 %v6103_v51 }
 0xa35   : > { %3224 = vmatpush1.msra.mxu1 %v6102_v52 }
 0xa36   : > { %3225 = vmatprep.subr.mxu1 %v6101_v53 }
 0xa37   : > { %3226 = vmatpush1.msra.mxu1 %v6100_v54 }
 0xa38   : > { %3227 = vmatprep.subr.mxu1 %v6099_v59 }
 0xa39   : > { %3228 = vmatpush1.msra.mxu1 %v6098_v60  ;;  %v3534_v60 = vld [vmem:[#allocation16 + $0x1f8] sm:$0xff] }
 0xa3a   : > { %3229 = vmatprep.subr.mxu1 %v6097_v61  ;;  %v3533_v61 = vld [vmem:[#allocation16 + $0x1f0] sm:$0xff] }
 0xa3b   : > { %3230 = vmatpush1.msra.mxu1 %v6096_v62  ;;  %v3530_v62 = vld [vmem:[#allocation16 + $0x1d8] sm:$0xff] }
 0xa3c   : > { %3231 = vmatprep.subr.mxu1 %v6095_v1  ;;  %v3529_v1 = vld [vmem:[#allocation16 + $0x1d0] sm:$0xff] }
 0xa3d   : > { %3232 = vmatpush1.msra.mxu1 %v6094_v2  ;;  %v3526_v2 = vld [vmem:[#allocation16 + $0x1b8] sm:$0xff] }
 0xa3e   : > { %3233 = vmatprep.subr.mxu1 %v6157_v4  ;;  %v3525_v4 = vld [vmem:[#allocation16 + $0x1b0] sm:$0xff] }
 0xa3f   : > { %3234 = vmatpush2.msra.mxu1 %v6156_v5  ;;  %v3522_v5 = vld [vmem:[#allocation16 + $0x198] sm:$0xff] }
 0xa40   : > { %3235 = vmatprep.subr.mxu1 %v6155_v7  ;;  %v3521_v7 = vld [vmem:[#allocation16 + $0x190] sm:$0xff] }
 0xa41   : > { %3236 = vmatpush2.msra.mxu1 %v6154_v8  ;;  %v3518_v8 = vld [vmem:[#allocation16 + $0x178] sm:$0xff] }
 0xa42   : > { %3237 = vmatprep.subr.mxu1 %v6153_v9  ;;  %v3517_v9 = vld [vmem:[#allocation16 + $0x170] sm:$0xff] }
 0xa43   : > { %3238 = vmatpush2.msra.mxu1 %v6152_v11  ;;  %v3514_v11 = vld [vmem:[#allocation16 + $0x158] sm:$0xff] }
 0xa44   : > { %3239 = vmatprep.subr.mxu1 %v6151_v12  ;;  %v3513_v12 = vld [vmem:[#allocation16 + $0x150] sm:$0xff] }
 0xa45   : > { %3240 = vmatpush2.msra.mxu1 %v6150_v13  ;;  %v3510_v13 = vld [vmem:[#allocation16 + $0x138] sm:$0xff] }
 0xa46   : > { %3241 = vmatprep.subr.mxu1 %v6149_v14  ;;  %v3509_v14 = vld [vmem:[#allocation16 + $0x130] sm:$0xff] }
 0xa47   : > { %3242 = vmatpush2.msra.mxu1 %v6148_v15  ;;  %v3506_v15 = vld [vmem:[#allocation16 + $0x118] sm:$0xff] }
 0xa48   : > { %3243 = vmatprep.subr.mxu1 %v6147_v16  ;;  %v3505_v16 = vld [vmem:[#allocation16 + $0x110] sm:$0xff] }
 0xa49   : > { %3244 = vmatpush2.msra.mxu1 %v6146_v17  ;;  %v3502_v17 = vld [vmem:[#allocation16 + $0xf8] sm:$0xff] }
 0xa4a   : > { %3245 = vmatprep.subr.mxu1 %v6145_v18  ;;  %v3501_v18 = vld [vmem:[#allocation16 + $0xf0] sm:$0xff] }
 0xa4b   : > { %3246 = vmatpush2.msra.mxu1 %v6144_v21  ;;  %v3498_v21 = vld [vmem:[#allocation16 + $0xd8] sm:$0xff] }
 0xa4c   : > { %3247 = vmatprep.subr.mxu1 %v6143_v22  ;;  %v3497_v22 = vld [vmem:[#allocation16 + $0xd0] sm:$0xff] }
 0xa4d   : > { %3248 = vmatpush2.msra.mxu1 %v6142_v32  ;;  %v3494_v32 = vld [vmem:[#allocation16 + $0xb8] sm:$0xff] }
 0xa4e   : > { %3249 = vmatprep.subr.mxu1 %v6141_v23  ;;  %v3493_v23 = vld [vmem:[#allocation16 + $0xb0] sm:$0xff] }
 0xa4f   : > { %3250 = vmatpush2.msra.mxu1 %v6140_v35  ;;  %v3490_v35 = vld [vmem:[#allocation16 + $0x98] sm:$0xff] }
 0xa50   : > { %3251 = vmatprep.subr.mxu1 %v6139_v24  ;;  %v3489_v24 = vld [vmem:[#allocation16 + $0x90] sm:$0xff] }
 0xa51   : > { %3252 = vmatpush2.msra.mxu1 %v6138_v25  ;;  %v3486_v25 = vld [vmem:[#allocation16 + $0x78] sm:$0xff] }
 0xa52   : > { %3253 = vmatprep.subr.mxu1 %v6137_v26  ;;  %v3485_v26 = vld [vmem:[#allocation16 + $0x70] sm:$0xff] }
 0xa53   : > { %3254 = vmatpush2.msra.mxu1 %v6136_v34  ;;  %v3482_v34 = vld [vmem:[#allocation16 + $0x58] sm:$0xff] }
 0xa54   : > { %3255 = vmatprep.subr.mxu1 %v6135_v27  ;;  %v3481_v27 = vld [vmem:[#allocation16 + $0x50] sm:$0xff] }
 0xa55   : > { %3256 = vmatpush2.msra.mxu1 %v6134_v37  ;;  %v3478_v37 = vld [vmem:[#allocation16 + $0x38] sm:$0xff] }
 0xa56   : > { %3257 = vmatprep.subr.mxu1 %v6133_v28  ;;  %v3477_v28 = vld [vmem:[#allocation16 + $0x30] sm:$0xff] }
 0xa57   : > { %3258 = vmatpush2.msra.mxu1 %v6132_v29  ;;  %v3474_v29 = vld [vmem:[#allocation16 + $0x18] sm:$0xff] }
 0xa58   : > { %3259 = vmatprep.subr.mxu1 %v6131_v30  ;;  %v3473_v30 = vld [vmem:[#allocation16 + $0x10] sm:$0xff] }
 0xa59   : > { %3260 = vmatpush2.msra.mxu1 %v6130_v36  ;;  %v3598_v36 = vld [vmem:[#allocation16 + $0x3f8] sm:$0xff] }
 0xa5a   : > { %3261 = vmatprep.subr.mxu1 %v6129_v31  ;;  %v3597_v31 = vld [vmem:[#allocation16 + $0x3f0] sm:$0xff] }
 0xa5b   : > { %3262 = vmatpush2.msra.mxu1 %v6128_v39  ;;  %v3594_v39 = vld [vmem:[#allocation16 + $0x3d8] sm:$0xff] }
 0xa5c   : > { %3263 = vmatprep.subr.mxu1 %v6127_v33  ;;  %v3593_v33 = vld [vmem:[#allocation16 + $0x3d0] sm:$0xff] }
 0xa5d   : > { %3264 = vmatpush2.msra.mxu1 %v6126_v40  ;;  %v3590_v40 = vld [vmem:[#allocation16 + $0x3b8] sm:$0xff] }
 0xa5e   : > { %3712 = vmatprep.subr.mxu1 %v3534_v60  ;;  %v3562_v60 = vld [vmem:[#allocation16 + $0x2d8] sm:$0xff] }
 0xa9d   : > { %v2699_v41 = vpop.f32.mrf.mxu1  ;;  %v2806_v42 = vpop.f32.mrf.mxu0 }
 0xa9f   : > { %v2701_v43 = vpop.f32.mrf.mxu1  ;;  %v2808_v38 = vpop.f32.mrf.mxu0 }
 0xaa0   : > { %3111 = vmatprep.mubr.f32.mxu0 %v2701_v43  ;;  %3265 = vmatprep.mubr.f32.mxu1 %v2808_v38  ;;  %v3585_v43 = vld [vmem:[#allocation16 + $0x390] sm:$0xff] }
 0xaa1   : > { %v2812_v44 = vpop.f32.mrf.mxu0  ;;  %3112 = vmatmul.mubr.f32.vlgmr.msra.gmra.mxu0 %v2699_v41  ;;  %3266 = vmatmul.mubr.f32.vlgmr.msra.gmra.mxu1 %v2806_v42  ;;  %v3589_v41 = vld [vmem:[#allocation16 + $0x3b0] sm:$0xff]  ;;  %v3586_v42 = vld [vmem:[#allocation16 + $0x398] sm:$0xff] }
 0xaa2   : > { %v2705_v45 = vpop.f32.mrf.mxu1  ;;  %3713 = vmatpush1.msra.mxu1 %v3533_v61  ;;  %v3561_v61 = vld [vmem:[#allocation16 + $0x2d0] sm:$0xff] }
 0xaa3   : > { %v2814_v46 = vpop.f32.mrf.mxu0  ;;  %3714 = vmatprep.subr.mxu1 %v3530_v62 }
 0xaa4   : > { %v2707_v47 = vpop.f32.mrf.mxu1  ;;  %3271 = vmatprep.mubr.f32.mxu1 %v2814_v46  ;;  %3715 = vmatpush1.msra.mxu1 %v3529_v1  ;;  %v3578_v46 = vld [vmem:[#allocation16 + $0x358] sm:$0xff] }
 0xaa5   : > { %3117 = vmatprep.mubr.f32.mxu0 %v2707_v47  ;;  %v2818_v48 = vpop.f32.mrf.mxu0  ;;  %3272 = vmatmul.mubr.f32.gmra.mxu1 %v2812_v44  ;;  %v3582_v44 = vld [vmem:[#allocation16 + $0x378] sm:$0xff]  ;;  %v3577_v47 = vld [vmem:[#allocation16 + $0x350] sm:$0xff] }
 0xaa6   : > { %v2711_v49 = vpop.f32.mrf.mxu1  ;;  %3118 = vmatmul.mubr.f32.gmra.mxu0 %v2705_v45  ;;  %3716 = vmatprep.subr.mxu1 %v3526_v2  ;;  %v3581_v45 = vld [vmem:[#allocation16 + $0x370] sm:$0xff]  ;;  %v3558_v1 = vld [vmem:[#allocation16 + $0x2b8] sm:$0xff] }
 0xaa7   : > { %v2820_v50 = vpop.f32.mrf.mxu0  ;;  %3717 = vmatpush1.msra.mxu1 %v3525_v4  ;;  %v3557_v2 = vld [vmem:[#allocation16 + $0x2b0] sm:$0xff]  ;;  %v3554_v4 = vld [vmem:[#allocation16 + $0x298] sm:$0xff] }
 0xaa8   : > { %v2713_v51 = vpop.f32.mrf.mxu1  ;;  %3277 = vmatprep.mubr.f32.mxu1 %v2820_v50  ;;  %3718 = vmatprep.subr.mxu1 %v3522_v5  ;;  %v3573_v50 = vld [vmem:[#allocation16 + $0x330] sm:$0xff] }
 0xaa9   : > { %3123 = vmatprep.mubr.f32.mxu0 %v2713_v51  ;;  %v2824_v52 = vpop.f32.mrf.mxu0  ;;  %3278 = vmatmul.mubr.f32.gmra.mxu1 %v2818_v48  ;;  %v3570_v51 = vld [vmem:[#allocation16 + $0x318] sm:$0xff]  ;;  %v3553_v5 = vld [vmem:[#allocation16 + $0x290] sm:$0xff] }
 0xaaa   : > { %v2717_v53 = vpop.f32.mrf.mxu1  ;;  %3124 = vmatmul.mubr.f32.gmra.mxu0 %v2711_v49  ;;  %3719 = vmatpush1.msra.mxu1 %v3521_v7  ;;  %v3574_v49 = vld [vmem:[#allocation16 + $0x338] sm:$0xff] }
 0xaab   : > { %v2826_v54 = vpop.f32.mrf.mxu0  ;;  %3720 = vmatprep.subr.mxu1 %v3518_v8  ;;  %v3550_v8 = vld [vmem:[#allocation16 + $0x278] sm:$0xff] }
 0xaac   : > { %v2719_v59 = vpop.f32.mrf.mxu1  ;;  %3283 = vmatprep.mubr.f32.mxu1 %v2826_v54  ;;  %3721 = vmatpush1.msra.mxu1 %v3517_v9  ;;  %v3566_v54 = vld [vmem:[#allocation16 + $0x2f8] sm:$0xff]  ;;  %v3549_v9 = vld [vmem:[#allocation16 + $0x270] sm:$0xff] }
 0xaad   : > { %3129 = vmatprep.mubr.f32.mxu0 %v2719_v59  ;;  %3284 = vmatmul.mubr.f32.gmra.mxu1 %v2824_v52  ;;  %v3569_v52 = vld [vmem:[#allocation16 + $0x310] sm:$0xff] }
 0xaae   : > { %3130 = vmatmul.mubr.f32.gmra.mxu0 %v2717_v53  ;;  %3722 = vmatprep.subr.mxu1 %v3514_v11  ;;  %v3565_v59 = vld [vmem:[#allocation16 + $0x2f0] sm:$0xff]  ;;  %v3546_v11 = vld [vmem:[#allocation16 + $0x258] sm:$0xff] }
 0xaaf   : > { %3422 = vmatprep.mubr.f32.mxu0 %v7794_v3  ;;  %3723 = vmatpush1.msra.mxu1 %v3513_v12  ;;  %v3545_v12 = vld [vmem:[#allocation16 + $0x250] sm:$0xff] }
 0xab0   : > { %3724 = vmatprep.subr.mxu1 %v3510_v13 }
 0xab1   : > { %3725 = vmatpush1.msra.mxu1 %v3509_v14 }
 0xab2   : > { %3726 = vmatprep.subr.mxu1 %v3506_v15 }
 0xab3   : > { %3727 = vmatpush1.msra.mxu1 %v3505_v16 }
 0xab4   : > { %3728 = vmatprep.subr.mxu1 %v3502_v17 }
 0xab5   : > { %3729 = vmatpush1.msra.mxu1 %v3501_v18 }
 0xab6   : > { %3730 = vmatprep.subr.mxu1 %v3498_v21 }
 0xab7   : > { %3731 = vmatpush1.msra.mxu1 %v3497_v22 }
 0xab8   : > { %3732 = vmatprep.subr.mxu1 %v3494_v32 }
 0xab9   : > { %3733 = vmatpush1.msra.mxu1 %v3493_v23 }
 0xaba   : > { %3734 = vmatprep.subr.mxu1 %v3490_v35 }
 0xabb   : > { %3735 = vmatpush1.msra.mxu1 %v3489_v24 }
 0xabc   : > { %3736 = vmatprep.subr.mxu1 %v3486_v25 }
 0xabd   : > { %3737 = vmatpush1.msra.mxu1 %v3485_v26 }
 0xabe   : > { %3738 = vmatprep.subr.mxu1 %v3482_v34 }
 0xabf   : > { %3739 = vmatpush1.msra.mxu1 %v3481_v27 }
 0xac0   : > { %3740 = vmatprep.subr.mxu1 %v3478_v37  ;;  %v3302_v37 = vsub.s32 0, %v8103_v6 }
 0xac1   : > { %3741 = vmatpush1.msra.mxu1 %v3477_v28 }
 0xac2   : > { %3742 = vmatprep.subr.mxu1 %v3474_v29 }
 0xac3   : > { %3743 = vmatpush1.msra.mxu1 %v3473_v30 }
 0xac4   : > { %3744 = vmatprep.subr.mxu1 %v3598_v36  ;;  %v3298_v36 = vld [vmem:[#allocation10] sm:$0x3] }
 0xac5   : > { %3745 = vmatpush2.msra.mxu1 %v3597_v31  ;;  %v3306_v31 = vsub.s32 1, %v8103_v6 }
 0xac6   : > { %3746 = vmatprep.subr.mxu1 %v3594_v39 }
 0xac7   : > { %3747 = vmatpush2.msra.mxu1 %v3593_v33 }
 0xac8   : > { %3748 = vmatprep.subr.mxu1 %v3590_v40 }
 0xac9   : > { %3749 = vmatpush2.msra.mxu1 %v3589_v41 }
 0xaca   : > { %3750 = vmatprep.subr.mxu1 %v3586_v42 }
 0xacb   : > { %3751 = vmatpush2.msra.mxu1 %v3585_v43 }
 0xacc   : > { %3752 = vmatprep.subr.mxu1 %v3582_v44 }
 0xacd   : > { %3753 = vmatpush2.msra.mxu1 %v3581_v45 }
 0xace   : > { %3754 = vmatprep.subr.mxu1 %v3578_v46 }
 0xacf   : > { %3755 = vmatpush2.msra.mxu1 %v3577_v47  ;;  %v3303_v47 = vrot.slane %v3298_v36, %v3302_v37  ;;  %v3512_v37 = vld [vmem:[#allocation16 + $0x148] sm:$0xff] }
 0xad0   : > { %3756 = vmatprep.subr.mxu1 %v3574_v49 }
 0xad1   : > { %3757 = vmatpush2.msra.mxu1 %v3573_v50 }
 0xad2   : > { %3758 = vmatprep.subr.mxu1 %v3570_v51  ;;  %v3307_v51 = vrot.slane %v3298_v36, %v3306_v31  ;;  %v3507_v36 = vld [vmem:[#allocation16 + $0x120] sm:$0xff]  ;;  %v3504_v31 = vld [vmem:[#allocation16 + $0x108] sm:$0xff] }
 0xad3   : > { %3759 = vmatpush2.msra.mxu1 %v3569_v52 }
 0xad4   : > { %3760 = vmatprep.subr.mxu1 %v3566_v54 }
 0xad5   : > { %3761 = vmatpush2.msra.mxu1 %v3565_v59 }
 0xad6   : > { %3762 = vmatprep.subr.mxu1 %v3562_v60 }
 0xad7   : > { %3763 = vmatpush2.msra.mxu1 %v3561_v61 }
 0xad8   : > { %3764 = vmatprep.subr.mxu1 %v3558_v1 }
 0xad9   : > { %3765 = vmatpush2.msra.mxu1 %v3557_v2 }
 0xada   : > { %3766 = vmatprep.subr.mxu1 %v3554_v4 }
 0xadb   : > { %3767 = vmatpush2.msra.mxu1 %v3553_v5 }
 0xadc   : > { %3768 = vmatprep.subr.mxu1 %v3550_v8 }
 0xadd   : > { %3769 = vmatpush2.msra.mxu1 %v3549_v9 }
 0xade   : > { %v9065_v38 = vpop.f32.mrf.mxu1  ;;  %3770 = vmatprep.subr.mxu1 %v3546_v11 }
 0xadf   : > { %3771 = vmatpush2.msra.mxu1 %v3545_v12 }
 0xae0   : > { %v9067_v48 = vpop.f32.mrf.mxu1 }
 0xae2   : > { %v3030_v53 = vpop.f32.mrf.mxu1 }
 0xae4   : > { %v3032_v62 = vpop.f32.mrf.mxu1 }
 0xae6   : > { %v3036_v7 = vpop.f32.mrf.mxu1 }
 0xae8   : > { %v3038_v13 = vpop.f32.mrf.mxu1 }
 0xaea   : > { %v3042_v14 = vpop.f32.mrf.mxu1 }
 0xaec   : > { %v3044_v15 = vpop.f32.mrf.mxu1 }
 0xb61   : > { %v3113_v16 = vpop.f32.mrf.mxu0  ;;  %v3267_v17 = vpop.f32.mrf.mxu1 }
 0xb62   : > { %v3114_v46 = vadd.f32 %v3113_v16, %v9065_v38  ;;  %v3326_v16 = vld [vmem:[%s10298_s16] sm:$0xff] }
 0xb63   : > { %v3115_v18 = vpop.f32.mrf.mxu0  ;;  %v3269_v21 = vpop.f32.mrf.mxu1 }
 0xb64   : > { %v3116_v42 = vadd.f32 %v3115_v18, %v9067_v48  ;;  %v3531_v18 = vld [vmem:[#allocation16 + $0x1e0] sm:$0xff] }
 0xb65   : > { %v3273_v22 = vpop.f32.mrf.mxu1 }
 0xb66   : > { %v3119_v32 = vpop.f32.mrf.mxu0  ;;  %v3291_v61 = vadd.f32 %v3269_v21, %v3116_v42  ;;  %v3528_v21 = vld [vmem:[#allocation16 + $0x1c8] sm:$0xff] }
 0xb67   : > { %v3275_v23 = vpop.f32.mrf.mxu1  ;;  %v3120_v40 = vadd.f32 %v3119_v32, %v3030_v53  ;;  %v3290_v53 = vadd.f32 %v3267_v17, %v3114_v46  ;;  %v3532_v17 = vld [vmem:[#allocation16 + $0x1e8] sm:$0xff]  ;;  %v3327_v32 = vld [vmem:[%s10298_s16 + $0x8] sm:$0xff] }
 0xb68   : > { %v3121_v35 = vpop.f32.mrf.mxu0  ;;  %v3311_v8 = vadd.f32 %v3307_v51, %v3291_v61  ;;  %v3496_v42 = vld [vmem:[#allocation16 + $0xc8] sm:$0xff]  ;;  %v3491_v46 = vld [vmem:[#allocation16 + $0xa0] sm:$0xff] }
 0xb69   : > { %v3279_v24 = vpop.f32.mrf.mxu1  ;;  %v3122_v39 = vadd.f32 %v3121_v35, %v3032_v62  ;;  %v3292_v59 = vadd.f32 %v3273_v22, %v3120_v40  ;;  %v3310_v38 = vadd.f32 %v3303_v47, %v3290_v53  ;;  %v3527_v22 = vld [vmem:[#allocation16 + $0x1c0] sm:$0xff]  ;;  %v3500_v40 = vld [vmem:[#allocation16 + $0xe8] sm:$0xff] }
 0xb6a   : > { %v3125_v25 = vpop.f32.mrf.mxu0  ;;  %v3523_v35 = vld [vmem:[#allocation16 + $0x1a0] sm:$0xff]  ;;  %v3476_v61 = vld [vmem:[#allocation16 + $0x28] sm:$0xff] }
 0xb6b   : > { %v3281_v26 = vpop.f32.mrf.mxu1  ;;  %v3126_v28 = vadd.f32 %v3125_v25, %v3036_v7  ;;  %v3293_v52 = vadd.f32 %v3275_v23, %v3122_v39  ;;  %v3312_v5 = vadd.f32 %v3303_v47, %v3292_v59  ;;  %v3524_v23 = vld [vmem:[#allocation16 + $0x1a8] sm:$0xff]  ;;  %v3519_v25 = vld [vmem:[#allocation16 + $0x180] sm:$0xff] }
 0xb6c   : > { %v3127_v34 = vpop.f32.mrf.mxu0  ;;  %v3503_v39 = vld [vmem:[#allocation16 + $0x100] sm:$0xff] }
 0xb6d   : > { %v3128_v27 = vadd.f32 %v3127_v34, %v3038_v13  ;;  %v3285_v30 = vpop.f32.mrf.mxu1  ;;  %v3294_v49 = vadd.f32 %v3279_v24, %v3126_v28  ;;  %v3313_v4 = vadd.f32 %v3307_v51, %v3293_v52  ;;  %v3320_v13 = vmax.f32 %v3312_v5, 0.0  ;;  %v3520_v24 = vld [vmem:[#allocation16 + $0x188] sm:$0xff]  ;;  %v3511_v28 = vld [vmem:[#allocation16 + $0x140] sm:$0xff] }
 0xb6e   : > { %v3131_v29 = vpop.f32.mrf.mxu0  ;;  %v3516_v34 = vld [vmem:[#allocation16 + $0x168] sm:$0xff]  ;;  %v3483_v52 = vld [vmem:[#allocation16 + $0x60] sm:$0xff] }
 0xb6f   : > { %v3132_v33 = vadd.f32 %v3131_v29, %v3042_v14  ;;  %v3295_v43 = vadd.f32 %v3281_v26, %v3128_v27  ;;  %v3287_v50 = vpop.f32.mrf.mxu1  ;;  %v3314_v2 = vadd.f32 %v3303_v47, %v3294_v49  ;;  %v3321_v12 = vmax.f32 %v3313_v4, 0.0  ;;  %v3328_v26 = vld [vmem:[%s10298_s16 + $0x10] sm:$0xff]  ;;  %v3329_v29 = vld [vmem:[%s10298_s16 + $0x18] sm:$0xff] }
 0xb70   : > { %v3133_v41 = vpop.f32.mrf.mxu0  ;;  %v3319_v14 = vmax.f32 %v3311_v8, 0.0  ;;  %v3515_v27 = vld [vmem:[#allocation16 + $0x160] sm:$0xff] }
 0xb71   : > { %v3296_v44 = vadd.f32 %v3285_v30, %v3132_v33  ;;  %v3134_v45 = vadd.f32 %v3133_v41, %v3044_v15  ;;  %v3315_v62 = vadd.f32 %v3307_v51, %v3295_v43  ;;  %v3322_v11 = vmax.f32 %v3314_v2, 0.0  ;;  %v3508_v30 = vld [vmem:[#allocation16 + $0x128] sm:$0xff]  ;;  %v3330_v33 = vld [vmem:[%s10298_s16 + $0x20] sm:$0xff]  ;;  %v3499_v41 = vld [vmem:[#allocation16 + $0xe0] sm:$0xff] }
 0xb72   : > { %v3318_v15 = vmax.f32 %v3310_v38, 0.0  ;;  %v3495_v43 = vld [vmem:[#allocation16 + $0xc0] sm:$0xff]  ;;  %v3596_v2 = vld [vmem:[#allocation16 + $0x3e8] sm:$0xff] }
 0xb73   : > { %v3297_v54 = vadd.f32 %v3287_v50, %v3134_v45  ;;  %v3316_v60 = vadd.f32 %v3303_v47, %v3296_v44  ;;  %v3323_v9 = vmax.f32 %v3315_v62, 0.0  ;;  %v3331_v44 = vld [vmem:[%s10298_s16 + $0x28] sm:$0xff]  ;;  %v3492_v45 = vld [vmem:[#allocation16 + $0xa8] sm:$0xff] }
 0xb74   : > { %v3488_v47 = vld [vmem:[#allocation16 + $0x88] sm:$0xff]  ;;  %v3487_v49 = vld [vmem:[#allocation16 + $0x80] sm:$0xff] }
 0xb75   : > { %v3317_v1 = vadd.f32 %v3307_v51, %v3297_v54  ;;  %v3324_v7 = vmax.f32 %v3316_v60, 0.0  ;;  %v3332_v50 = vld [vmem:[%s10298_s16 + $0x30] sm:$0xff]  ;;  %v3333_v60 = vld [vmem:[%s10298_s16 + $0x38] sm:$0xff] }
 0xb76   : > { %v3484_v51 = vld [vmem:[#allocation16 + $0x68] sm:$0xff]  ;;  %v3479_v59 = vld [vmem:[#allocation16 + $0x40] sm:$0xff] }
 0xb77   : > { %v3325_v48 = vmax.f32 %v3317_v1, 0.0  ;;  %v3480_v54 = vld [vmem:[#allocation16 + $0x48] sm:$0xff]  ;;  %v3475_v62 = vld [vmem:[#allocation16 + $0x20] sm:$0xff] }
 0xb78   : > { %v3472_v1 = vld [vmem:[#allocation16 + $0x8] sm:$0xff]  ;;  %v3471_v53 = vld [vmem:[#allocation16] sm:$0xff] }
 0xb79   : > { %3382 = vmatprep.subr.mxu0 %v3325_v48  ;;  %v3595_v4 = vld [vmem:[#allocation16 + $0x3e0] sm:$0xff]  ;;  %v3592_v48 = vld [vmem:[#allocation16 + $0x3c8] sm:$0xff] }
 0xb7a   : > { %3383 = vmatpush1.msra.mxu0 %v3324_v7  ;;  %v3591_v5 = vld [vmem:[#allocation16 + $0x3c0] sm:$0xff]  ;;  %v3588_v7 = vld [vmem:[#allocation16 + $0x3a8] sm:$0xff] }
 0xb7b   : > { %3384 = vmatprep.subr.mxu0 %v3323_v9  ;;  %v3587_v8 = vld [vmem:[#allocation16 + $0x3a0] sm:$0xff]  ;;  %v3584_v9 = vld [vmem:[#allocation16 + $0x388] sm:$0xff] }
 0xb7c   : > { %3385 = vmatpush1.msra.mxu0 %v3322_v11  ;;  %v3583_v38 = vld [vmem:[#allocation16 + $0x380] sm:$0xff]  ;;  %v3580_v11 = vld [vmem:[#allocation16 + $0x368] sm:$0xff] }
 0xb7d   : > { %3386 = vmatprep.subr.mxu0 %v3321_v12  ;;  %v3579_v12 = vld [vmem:[#allocation16 + $0x360] sm:$0xff] }
 0xb7e   : > { %3387 = vmatpush1.msra.mxu0 %v3320_v13  ;;  %v3576_v13 = vld [vmem:[#allocation16 + $0x348] sm:$0xff] }
 0xb7f   : > { %3388 = vmatprep.subr.mxu0 %v3319_v14  ;;  %v3575_v14 = vld [vmem:[#allocation16 + $0x340] sm:$0xff] }
 0xb80   : > { %3389 = vmatpush1.msra.mxu0 %v3318_v15  ;;  %v3572_v15 = vld [vmem:[#allocation16 + $0x328] sm:$0xff] }
 0xb81   : > { %6158 = vmatmul.mubr.msk.f32.vlgmr.msra.gmra.mxu0 %vm2622_vm11, %v3326_v16  ;;  %3599 = vmatprep.subr.mxu0 %v3532_v17  ;;  %v3571_v16 = vld [vmem:[#allocation16 + $0x320] sm:$0xff]  ;;  %v3568_v17 = vld [vmem:[#allocation16 + $0x308] sm:$0xff] }
 0xb82   : > { %3428 = vmatprep.mubr.f32.mxu0 %v7794_v3  ;;  %3600 = vmatpush1.msra.mxu0 %v3531_v18  ;;  %v3567_v18 = vld [vmem:[#allocation16 + $0x300] sm:$0xff] }
 0xb83   : > { %3601 = vmatprep.subr.mxu0 %v3528_v21  ;;  %v3564_v21 = vld [vmem:[#allocation16 + $0x2e8] sm:$0xff] }
 0xb84   : > { %3602 = vmatpush1.msra.mxu0 %v3527_v22  ;;  %v3563_v22 = vld [vmem:[#allocation16 + $0x2e0] sm:$0xff] }
 0xb85   : > { %6159 = vmatmul.mubr.msk.f32.gmra.mxu0 %vm2622_vm11, %v3327_v32  ;;  %3603 = vmatprep.subr.mxu0 %v3524_v23  ;;  %v3560_v32 = vld [vmem:[#allocation16 + $0x2c8] sm:$0xff]  ;;  %v3559_v23 = vld [vmem:[#allocation16 + $0x2c0] sm:$0xff] }
 0xb86   : > { %3434 = vmatprep.mubr.f32.mxu0 %v7794_v3  ;;  %3604 = vmatpush1.msra.mxu0 %v3523_v35  ;;  %v3556_v35 = vld [vmem:[#allocation16 + $0x2a8] sm:$0xff] }
 0xb87   : > { %3605 = vmatprep.subr.mxu0 %v3520_v24  ;;  %v3555_v24 = vld [vmem:[#allocation16 + $0x2a0] sm:$0xff] }
 0xb88   : > { %3606 = vmatpush1.msra.mxu0 %v3519_v25  ;;  %v3552_v25 = vld [vmem:[#allocation16 + $0x288] sm:$0xff] }
 0xb89   : > { %6160 = vmatmul.mubr.msk.f32.gmra.mxu0 %vm2622_vm11, %v3328_v26  ;;  %3607 = vmatprep.subr.mxu0 %v3516_v34  ;;  %v3551_v26 = vld [vmem:[#allocation16 + $0x280] sm:$0xff]  ;;  %v3548_v34 = vld [vmem:[#allocation16 + $0x268] sm:$0xff] }
 0xb8a   : > { %3440 = vmatprep.mubr.f32.mxu0 %v7794_v3  ;;  %3608 = vmatpush1.msra.mxu0 %v3515_v27  ;;  %v3547_v27 = vld [vmem:[#allocation16 + $0x260] sm:$0xff] }
 0xb8b   : > { %3609 = vmatprep.subr.mxu0 %v3512_v37  ;;  %v3544_v37 = vld [vmem:[#allocation16 + $0x248] sm:$0xff] }
 0xb8c   : > { %3610 = vmatpush1.msra.mxu0 %v3511_v28  ;;  %v3543_v28 = vld [vmem:[#allocation16 + $0x240] sm:$0xff] }
 0xb8d   : > { %6161 = vmatmul.mubr.msk.f32.gmra.mxu0 %vm2622_vm11, %v3329_v29  ;;  %3611 = vmatprep.subr.mxu0 %v3508_v30  ;;  %v3540_v29 = vld [vmem:[#allocation16 + $0x228] sm:$0xff]  ;;  %v3542_v30 = vld [vmem:[#allocation16 + $0x238] sm:$0xff] }
 0xb8e   : > { %3446 = vmatprep.mubr.f32.mxu0 %v7794_v3  ;;  %3612 = vmatpush1.msra.mxu0 %v3507_v36  ;;  %v3539_v36 = vld [vmem:[#allocation16 + $0x220] sm:$0xff] }
 0xb8f   : > { %3613 = vmatprep.subr.mxu0 %v3504_v31  ;;  %3772 = vmatprep.subr.mxu1 %v3542_v30  ;;  %v3541_v31 = vld [vmem:[#allocation16 + $0x230] sm:$0xff] }
 0xb90   : > { %3614 = vmatpush1.msra.mxu0 %v3503_v39  ;;  %3773 = vmatpush2.msra.mxu1 %v3541_v31  ;;  %v3536_v39 = vld [vmem:[#allocation16 + $0x208] sm:$0xff] }
 0xb91   : > { %6162 = vmatmul.mubr.msk.f32.gmra.mxu0 %vm2622_vm11, %v3330_v33  ;;  %3615 = vmatprep.subr.mxu0 %v3500_v40  ;;  %v3538_v33 = vld [vmem:[#allocation16 + $0x218] sm:$0xff]  ;;  %v3535_v40 = vld [vmem:[#allocation16 + $0x200] sm:$0xff] }
 0xb92   : > { %3452 = vmatprep.mubr.f32.mxu0 %v7794_v3  ;;  %3616 = vmatpush1.msra.mxu0 %v3499_v41  ;;  %v3537_v41 = vld [vmem:[#allocation16 + $0x210] sm:$0xff] }
 0xb93   : > { %3617 = vmatprep.subr.mxu0 %v3496_v42  ;;  %3774 = vmatprep.subr.mxu1 %v3538_v33  ;;  %v6236_v33 = vld [vmem:[%s10379_s11 + $0x2f0] sm:$0xff] }
 0xb94   : > { %3618 = vmatpush1.msra.mxu0 %v3495_v43  ;;  %3775 = vmatpush2.msra.mxu1 %v3537_v41  ;;  %v6235_v41 = vld [vmem:[%s10379_s11 + $0x2e8] sm:$0xff] }
 0xb95   : > { %6163 = vmatmul.mubr.msk.f32.gmra.mxu0 %vm2622_vm11, %v3331_v44  ;;  %3619 = vmatprep.subr.mxu0 %v3492_v45 }
 0xb96   : > { %3458 = vmatprep.mubr.f32.mxu0 %v7794_v3  ;;  %3620 = vmatpush1.msra.mxu0 %v3491_v46 }
 0xb97   : > { %3621 = vmatprep.subr.mxu0 %v3488_v47 }
 0xb98   : > { %3622 = vmatpush1.msra.mxu0 %v3487_v49 }
 0xb99   : > { %6164 = vmatmul.mubr.msk.f32.gmra.mxu0 %vm2622_vm11, %v3332_v50  ;;  %3623 = vmatprep.subr.mxu0 %v3484_v51 }
 0xb9a   : > { %3464 = vmatprep.mubr.f32.mxu0 %v7794_v3  ;;  %3624 = vmatpush1.msra.mxu0 %v3483_v52 }
 0xb9b   : > { %3625 = vmatprep.subr.mxu0 %v3480_v54 }
 0xb9c   : > { %3626 = vmatpush1.msra.mxu0 %v3479_v59 }
 0xb9d   : > { %6165 = vmatmul.mubr.msk.f32.gmra.mxu0 %vm2622_vm11, %v3333_v60  ;;  %3627 = vmatprep.subr.mxu0 %v3476_v61 }
 0xb9e   : > { %3628 = vmatpush1.msra.mxu0 %v3475_v62 }
 0xb9f   : > { %3629 = vmatprep.subr.mxu0 %v3472_v1 }
 0xba0   : > { %3630 = vmatpush1.msra.mxu0 %v3471_v53 }
 0xba1   : > { %3631 = vmatprep.subr.mxu0 %v3596_v2 }
 0xba2   : > { %3632 = vmatpush2.msra.mxu0 %v3595_v4 }
 0xba3   : > { %3633 = vmatprep.subr.mxu0 %v3592_v48 }
 0xba4   : > { %3634 = vmatpush2.msra.mxu0 %v3591_v5 }
 0xba5   : > { %3635 = vmatprep.subr.mxu0 %v3588_v7 }
 0xba6   : > { %3636 = vmatpush2.msra.mxu0 %v3587_v8 }
 0xba7   : > { %3637 = vmatprep.subr.mxu0 %v3584_v9 }
 0xba8   : > { %3638 = vmatpush2.msra.mxu0 %v3583_v38 }
 0xba9   : > { %3639 = vmatprep.subr.mxu0 %v3580_v11 }
 0xbaa   : > { %3640 = vmatpush2.msra.mxu0 %v3579_v12 }
 0xbab   : > { %3641 = vmatprep.subr.mxu0 %v3576_v13 }
 0xbac   : > { %3642 = vmatpush2.msra.mxu0 %v3575_v14 }
 0xbad   : > { %3643 = vmatprep.subr.mxu0 %v3572_v15 }
 0xbae   : > { %3644 = vmatpush2.msra.mxu0 %v3571_v16 }
 0xbaf   : > { %3645 = vmatprep.subr.mxu0 %v3568_v17 }
 0xbb0   : > { %3646 = vmatpush2.msra.mxu0 %v3567_v18 }
 0xbb1   : > { %3647 = vmatprep.subr.mxu0 %v3564_v21 }
 0xbb2   : > { %3648 = vmatpush2.msra.mxu0 %v3563_v22 }
 0xbb3   : > { %3649 = vmatprep.subr.mxu0 %v3560_v32 }
 0xbb4   : > { %3650 = vmatpush2.msra.mxu0 %v3559_v23 }
 0xbb5   : > { %3651 = vmatprep.subr.mxu0 %v3556_v35 }
 0xbb6   : > { %3652 = vmatpush2.msra.mxu0 %v3555_v24 }
 0xbb7   : > { %3653 = vmatprep.subr.mxu0 %v3552_v25 }
 0xbb8   : > { %3654 = vmatpush2.msra.mxu0 %v3551_v26 }
 0xbb9   : > { %3655 = vmatprep.subr.mxu0 %v3548_v34 }
 0xbba   : > { %3656 = vmatpush2.msra.mxu0 %v3547_v27 }
 0xbbb   : > { %3657 = vmatprep.subr.mxu0 %v3544_v37 }
 0xbbc   : > { %3658 = vmatpush2.msra.mxu0 %v3543_v28 }
 0xbbd   : > { %3659 = vmatprep.subr.mxu0 %v3540_v29 }
 0xbbe   : > { %3660 = vmatpush2.msra.mxu0 %v3539_v36  ;;  %v6237_v36 = vld [vmem:[%s10379_s11 + $0x2f8] sm:$0xff] }
 0xbbf   : > { %3661 = vmatprep.subr.mxu0 %v3536_v39  ;;  %v6221_v39 = vld [vmem:[%s10379_s11 + $0x278] sm:$0xff] }
 0xbc0   : > { %3662 = vmatpush2.msra.mxu0 %v3535_v40  ;;  %v6220_v40 = vld [vmem:[%s10379_s11 + $0x270] sm:$0xff] }
 0xc41   : > { %v3424_v42 = vpop.f32.mrf.mxu0 }
 0xc43   : > { %v3426_v43 = vpop.f32.mrf.mxu0 }
 0xc44   : > { %3663 = vmatprep.mubr.f32.mxu0 %v3426_v43  ;;  %3776 = vmatprep.mubr.f32.mxu1 %v3426_v43  ;;  %v6234_v43 = vld [vmem:[%s10379_s11 + $0x2e0] sm:$0xff] }
 0xc45   : > { %v3430_v44 = vpop.f32.mrf.mxu0  ;;  %3664 = vmatmul.mubr.f32.vlgmr.msra.gmra.mxu0 %v3424_v42  ;;  %3777 = vmatmul.mubr.f32.vlgmr.msra.gmra.mxu1 %v3424_v42  ;;  %v6219_v42 = vld [vmem:[%s10379_s11 + $0x268] sm:$0xff] }
 0xc47   : > { %v3432_v45 = vpop.f32.mrf.mxu0 }
 0xc48   : > { %3669 = vmatprep.mubr.f32.mxu0 %v3432_v45  ;;  %3782 = vmatprep.mubr.f32.mxu1 %v3432_v45  ;;  %v6233_v45 = vld [vmem:[%s10379_s11 + $0x2d8] sm:$0xff] }
 0xc49   : > { %v3436_v46 = vpop.f32.mrf.mxu0  ;;  %3670 = vmatmul.mubr.f32.gmra.mxu0 %v3430_v44  ;;  %3783 = vmatmul.mubr.f32.gmra.mxu1 %v3430_v44  ;;  %v6218_v44 = vld [vmem:[%s10379_s11 + $0x260] sm:$0xff] }
 0xc4b   : > { %v3438_v47 = vpop.f32.mrf.mxu0 }
 0xc4c   : > { %3675 = vmatprep.mubr.f32.mxu0 %v3438_v47  ;;  %3788 = vmatprep.mubr.f32.mxu1 %v3438_v47  ;;  %v6217_v47 = vld [vmem:[%s10379_s11 + $0x258] sm:$0xff] }
 0xc4d   : > { %v3442_v49 = vpop.f32.mrf.mxu0  ;;  %3676 = vmatmul.mubr.f32.gmra.mxu0 %v3436_v46  ;;  %3789 = vmatmul.mubr.f32.gmra.mxu1 %v3436_v46  ;;  %v3825_v46 = vadd.s32 32, %v8103_v6 }
 0xc4f   : > { %v3444_v50 = vpop.f32.mrf.mxu0 }
 0xc50   : > { %3681 = vmatprep.mubr.f32.mxu0 %v3444_v50  ;;  %3794 = vmatprep.mubr.f32.mxu1 %v3444_v50  ;;  %v6216_v50 = vld [vmem:[%s10379_s11 + $0x250] sm:$0xff] }
 0xc51   : > { %v3448_v51 = vpop.f32.mrf.mxu0  ;;  %3682 = vmatmul.mubr.f32.gmra.mxu0 %v3442_v49  ;;  %3795 = vmatmul.mubr.f32.gmra.mxu1 %v3442_v49  ;;  %v6232_v49 = vld [vmem:[%s10379_s11 + $0x2d0] sm:$0xff] }
 0xc53   : > { %v3450_v52 = vpop.f32.mrf.mxu0 }
 0xc54   : > { %3687 = vmatprep.mubr.f32.mxu0 %v3450_v52  ;;  %3800 = vmatprep.mubr.f32.mxu1 %v3450_v52  ;;  %v4091_v52 = vadd.s32 1, %v3825_v46 }
 0xc55   : > { %v3454_v54 = vpop.f32.mrf.mxu0  ;;  %3688 = vmatmul.mubr.f32.gmra.mxu0 %v3448_v51  ;;  %3801 = vmatmul.mubr.f32.gmra.mxu1 %v3448_v51  ;;  %v3829_v51 = vadd.s32 4294967295, %v3825_v46  ;;  %v6212_v46 = vld [vmem:[%s10379_s11 + $0x230] sm:$0xff] }
 0xc56   : > { %vm4095_vm1 = vcmp.eq.s32.totalorder %v8111_v10, %v4091_v52  ;;  %v6211_v52 = vld [vmem:[%s10379_s11 + $0x228] sm:$0xff] }
 0xc57   : > { %v3456_v59 = vpop.f32.mrf.mxu0  ;;  %vm3833_vm0 = vcmp.eq.s32.totalorder %v8111_v10, %v3829_v51 }
 0xc58   : > { %3693 = vmatprep.mubr.f32.mxu0 %v3456_v59  ;;  %3806 = vmatprep.mubr.f32.mxu1 %v3456_v59  ;;  %v6231_v59 = vld [vmem:[%s10379_s11 + $0x2c8] sm:$0xff] }
 0xc59   : > { %v3460_v60 = vpop.f32.mrf.mxu0  ;;  %3694 = vmatmul.mubr.f32.gmra.mxu0 %v3454_v54  ;;  %3807 = vmatmul.mubr.f32.gmra.mxu1 %v3454_v54  ;;  %v3826_v54 = vadd.s32 40, %v8103_v6 }
 0xc5b   : > { %v3462_v61 = vpop.f32.mrf.mxu0 }
 0xc5c   : > { %3699 = vmatprep.mubr.f32.mxu0 %v3462_v61  ;;  %3812 = vmatprep.mubr.f32.mxu1 %v3462_v61  ;;  %v6230_v61 = vld [vmem:[%s10379_s11 + $0x2c0] sm:$0xff] }
 0xc5d   : > { %v3466_v62 = vpop.f32.mrf.mxu0  ;;  %3700 = vmatmul.mubr.f32.gmra.mxu0 %v3460_v60  ;;  %3813 = vmatmul.mubr.f32.gmra.mxu1 %v3460_v60  ;;  %v6215_v60 = vld [vmem:[%s10379_s11 + $0x248] sm:$0xff] }
 0xc5f   : > { %v3468_v1 = vpop.f32.mrf.mxu0 }
 0xc60   : > { %3705 = vmatprep.mubr.f32.mxu0 %v3468_v1  ;;  %3818 = vmatprep.mubr.f32.mxu1 %v3468_v1  ;;  %v3827_v1 = vadd.s32 48, %v8103_v6 }
 0xc61   : > { %3706 = vmatmul.mubr.f32.gmra.mxu0 %v3466_v62  ;;  %3819 = vmatmul.mubr.f32.gmra.mxu1 %v3466_v62  ;;  %v3830_v62 = vadd.s32 4294967295, %v3826_v54 }
 0xc62   : > { %3929 = vmatprep.mubr.f32.mxu0 %v7794_v3  ;;  %4191 = vmatprep.mubr.f32.mxu1 %v7794_v3 }
 0xc63   : > { %vm3834_vm2 = vcmp.eq.s32.totalorder %v8111_v10, %v3830_v62 }
 0xd05   : > { %v9114_v53 = vpop.f32.mrf.mxu0  ;;  %v9116_v2 = vpop.f32.mrf.mxu1 }
 0xd07   : > { %v9118_v4 = vpop.f32.mrf.mxu0  ;;  %v9120_v48 = vpop.f32.mrf.mxu1 }
 0xd09   : > { %v9122_v5 = vpop.f32.mrf.mxu0  ;;  %v9124_v7 = vpop.f32.mrf.mxu1 }
 0xd0b   : > { %v9126_v8 = vpop.f32.mrf.mxu0  ;;  %v9128_v9 = vpop.f32.mrf.mxu1 }
 0xd0d   : > { %v9130_v38 = vpop.f32.mrf.mxu0  ;;  %v9132_v11 = vpop.f32.mrf.mxu1 }
 0xd0f   : > { %v9134_v12 = vpop.f32.mrf.mxu0  ;;  %v9136_v13 = vpop.f32.mrf.mxu1 }
 0xd11   : > { %v9138_v14 = vpop.f32.mrf.mxu0  ;;  %v9140_v15 = vpop.f32.mrf.mxu1 }
 0xd13   : > { %v9142_v16 = vpop.f32.mrf.mxu0  ;;  %v9144_v17 = vpop.f32.mrf.mxu1 }
 0xd15   : > { %v9146_v18 = vpop.f32.mrf.mxu0  ;;  %v9148_v21 = vpop.f32.mrf.mxu1 }
 0xd17   : > { %v9150_v22 = vpop.f32.mrf.mxu0  ;;  %v9154_v23 = vpop.f32.mrf.mxu1 }
 0xd19   : > { %v9152_v32 = vpop.f32.mrf.mxu0  ;;  %v9160_v25 = vpop.f32.mrf.mxu1 }
 0xd1b   : > { %v9156_v35 = vpop.f32.mrf.mxu0  ;;  %v9166_v27 = vpop.f32.mrf.mxu1 }
 0xd1d   : > { %v9158_v24 = vpop.f32.mrf.mxu0  ;;  %v9176_v28 = vpop.f32.mrf.mxu1 }
 0xd1f   : > { %v9162_v26 = vpop.f32.mrf.mxu0  ;;  %v9186_v29 = vpop.f32.mrf.mxu1 }
 0xd21   : > { %v9164_v34 = vpop.f32.mrf.mxu0  ;;  %v9196_v30 = vpop.f32.mrf.mxu1 }
 0xd23   : > { %v9168_v37 = vpop.f32.mrf.mxu0  ;;  %v9209_v31 = vpop.f32.mrf.mxu1 }
 0xd24   : > { %3881 = vmatprep.subr.mxu0 %v9168_v37  ;;  %4143 = vmatprep.subr.mxu1 %v9168_v37 }
 0xd25   : > { %3882 = vmatpush1.msra.mxu0 %v9164_v34  ;;  %4144 = vmatpush1.msra.mxu1 %v9164_v34 }
 0xd26   : > { %3883 = vmatprep.subr.mxu0 %v9162_v26  ;;  %4145 = vmatprep.subr.mxu1 %v9162_v26 }
 0xd27   : > { %3884 = vmatpush1.msra.mxu0 %v9158_v24  ;;  %4146 = vmatpush1.msra.mxu1 %v9158_v24 }
 0xd28   : > { %3885 = vmatprep.subr.mxu0 %v9156_v35  ;;  %4147 = vmatprep.subr.mxu1 %v9156_v35 }
 0xd29   : > { %3886 = vmatpush1.msra.mxu0 %v9152_v32  ;;  %4148 = vmatpush1.msra.mxu1 %v9152_v32 }
 0xd2a   : > { %3887 = vmatprep.subr.mxu0 %v9150_v22  ;;  %4149 = vmatprep.subr.mxu1 %v9150_v22 }
 0xd2b   : > { %3888 = vmatpush1.msra.mxu0 %v9146_v18  ;;  %4150 = vmatpush1.msra.mxu1 %v9146_v18 }
 0xd2c   : > { %3889 = vmatprep.subr.mxu0 %v9142_v16  ;;  %4151 = vmatprep.subr.mxu1 %v9142_v16 }
 0xd2d   : > { %3890 = vmatpush1.msra.mxu0 %v9138_v14  ;;  %4152 = vmatpush1.msra.mxu1 %v9138_v14 }
 0xd2e   : > { %3891 = vmatprep.subr.mxu0 %v9134_v12  ;;  %4153 = vmatprep.subr.mxu1 %v9134_v12 }
 0xd2f   : > { %3892 = vmatpush1.msra.mxu0 %v9130_v38  ;;  %4154 = vmatpush1.msra.mxu1 %v9130_v38 }
 0xd30   : > { %3893 = vmatprep.subr.mxu0 %v9126_v8  ;;  %4155 = vmatprep.subr.mxu1 %v9126_v8 }
 0xd31   : > { %3894 = vmatpush1.msra.mxu0 %v9122_v5  ;;  %4156 = vmatpush1.msra.mxu1 %v9122_v5 }
 0xd32   : > { %3895 = vmatprep.subr.mxu0 %v9118_v4  ;;  %4157 = vmatprep.subr.mxu1 %v9118_v4 }
 0xd33   : > { %3896 = vmatpush1.msra.mxu0 %v9114_v53  ;;  %4158 = vmatpush1.msra.mxu1 %v9114_v53 }
 0xd34   : > { %6170 = vmatmul.mubr.msk.f32.vlgmr.msra.gmra.mxu0 %vm1521_vm7, %v8126_v19  ;;  %3994 = vmatprep.subr.mxu0 %v9209_v31 }
 0xd35   : > { %6190 = vmatmul.mubr.msk.f32.vlgmr.msra.gmra.mxu1 %vm1521_vm7, %v8129_v20  ;;  %6512 = vmatprep.subr.mxu1 %v6237_v36  ;;  %v4092_v36 = vadd.s32 1, %v3826_v54 }
 0xd36   : > { %3995 = vmatpush1.msra.mxu0 %v9196_v30  ;;  %6513 = vmatpush3.msra.mxu1 %v6221_v39  ;;  %v6214_v39 = vld [vmem:[%s10379_s11 + $0x240] sm:$0xff] }
 0xd37   : > { %3996 = vmatprep.subr.mxu0 %v9186_v29  ;;  %6514 = vmatprep.subr.mxu1 %v6236_v33  ;;  %v9301_v33 = vsel %vm3833_vm0, 1.0, %v7794_v3  ;;  %vm4096_vm3 = vcmp.eq.s32.totalorder %v8111_v10, %v4092_v36  ;;  %v6209_v36 = vld [vmem:[%s10379_s11 + $0x218] sm:$0xff] }
 0xd38   : > { %3935 = vmatprep.mubr.f32.mxu0 %v7794_v3  ;;  %3997 = vmatpush1.msra.mxu0 %v9176_v28 }
 0xd39   : > { %4197 = vmatprep.mubr.f32.mxu1 %v7794_v3  ;;  %6515 = vmatpush3.msra.mxu1 %v6220_v40  ;;  %v9304_v40 = vsel %vm4095_vm1, 1.0, %v7794_v3 }
 0xd3a   : > { %6171 = vmatmul.mubr.msk.f32.gmra.mxu0 %vm1521_vm7, %v8281_v56  ;;  %3998 = vmatprep.subr.mxu0 %v9166_v27 }
 0xd3b   : > { %6191 = vmatmul.mubr.msk.f32.gmra.mxu1 %vm1521_vm7, %v8292_v58  ;;  %6516 = vmatprep.subr.mxu1 %v6235_v41  ;;  %v6229_v41 = vld [vmem:[%s10379_s11 + $0x2b8] sm:$0xff] }
 0xd3c   : > { %3999 = vmatpush1.msra.mxu0 %v9160_v25  ;;  %6517 = vmatpush3.msra.mxu1 %v6219_v42  ;;  %v3831_v42 = vadd.s32 4294967295, %v3827_v1 }
 0xd3d   : > { %4000 = vmatprep.subr.mxu0 %v9154_v23  ;;  %6518 = vmatprep.subr.mxu1 %v6234_v43  ;;  %v3828_v43 = vadd.s32 56, %v8103_v6  ;;  %v6228_v6 = vld [vmem:[%s10379_s11 + $0x2b0] sm:$0xff] }
 0xd3e   : > { %3941 = vmatprep.mubr.f32.mxu0 %v7794_v3  ;;  %4001 = vmatpush1.msra.mxu0 %v9148_v21  ;;  %vm3835_vm4 = vcmp.eq.s32.totalorder %v8111_v10, %v3831_v42 }
 0xd3f   : > { %4203 = vmatprep.mubr.f32.mxu1 %v7794_v3  ;;  %6519 = vmatpush3.msra.mxu1 %v6218_v44  ;;  %v6213_v44 = vld [vmem:[%s10379_s11 + $0x238] sm:$0xff]  ;;  %v3832_v51 = vadd.s32 4294967295, %v3828_v43  ;;  %v4094_v54 = vadd.s32 1, %v3828_v43  ;;  %v6223_v43 = vld [vmem:[%s10379_s11 + $0x288] sm:$0xff] }
 0xd40   : > { %6172 = vmatmul.mubr.msk.f32.gmra.mxu0 %vm1521_vm7, %v8486_v57  ;;  %4002 = vmatprep.subr.mxu0 %v9144_v17 }
 0xd41   : > { %6192 = vmatmul.mubr.msk.f32.gmra.mxu1 %vm1521_vm7, %v8482_v55  ;;  %6520 = vmatprep.subr.mxu1 %v6233_v45  ;;  %v4093_v45 = vadd.s32 1, %v3827_v1  ;;  %v6225_v1 = vld [vmem:[%s10379_s11 + $0x298] sm:$0xff]  ;;  %vm3836_vm6 = vcmp.eq.s32.totalorder %v8111_v10, %v3832_v51  ;;  %vm4098_vm8 = vcmp.eq.s32.totalorder %v8111_v10, %v4094_v54  ;;  %v6264_v51 = vld [vmem:[%s10379_s11 + $0x3d0] sm:$0xff] }
 0xd42   : > { %4003 = vmatpush1.msra.mxu0 %v9140_v15  ;;  %6521 = vmatpush3.msra.mxu1 %v6217_v47  ;;  %v9330_v47 = vsel %vm3834_vm2, 1.0, %v7794_v3  ;;  %v9382_v42 = vsel %vm3836_vm6, 1.0, %v7794_v3  ;;  %v6248_v54 = vld [vmem:[%s10379_s11 + $0x350] sm:$0xff] }
 0xd43   : > { %4004 = vmatprep.subr.mxu0 %v9136_v13  ;;  %6522 = vmatprep.subr.mxu1 %v6232_v49  ;;  %v9334_v49 = vsel %vm4096_vm3, 1.0, %v7794_v3  ;;  %vm4097_vm5 = vcmp.eq.s32.totalorder %v8111_v10, %v4093_v45  ;;  %v9386_v10 = vsel %vm4098_vm8, 1.0, %v7794_v3  ;;  %v6222_v45 = vld [vmem:[%s10379_s11 + $0x280] sm:$0xff] }
 0xd44   : > { %3947 = vmatprep.mubr.f32.mxu0 %v7794_v3  ;;  %4005 = vmatpush1.msra.mxu0 %v9132_v11  ;;  %v9360_v62 = vsel %vm4097_vm5, 1.0, %v7794_v3 }
 0xd45   : > { %4209 = vmatprep.mubr.f32.mxu1 %v7794_v3  ;;  %6523 = vmatpush3.msra.mxu1 %v6216_v50  ;;  %v6227_v50 = vld [vmem:[%s10379_s11 + $0x2a8] sm:$0xff] }
 0xd46   : > { %6173 = vmatmul.mubr.msk.f32.gmra.mxu0 %vm1521_vm7, %v8512_v0  ;;  %4006 = vmatprep.subr.mxu0 %v9128_v9 }
 0xd47   : > { %6193 = vmatmul.mubr.msk.f32.gmra.mxu1 %vm1521_vm7, %v8508_v63  ;;  %6524 = vmatprep.subr.mxu1 %v6231_v59  ;;  %v6226_v59 = vld [vmem:[%s10379_s11 + $0x2a0] sm:$0xff] }
 0xd48   : > { %4007 = vmatpush1.msra.mxu0 %v9124_v7  ;;  %6525 = vmatpush3.msra.mxu1 %v6215_v60  ;;  %v6210_v60 = vld [vmem:[%s10379_s11 + $0x220] sm:$0xff] }
 0xd49   : > { %4008 = vmatprep.subr.mxu0 %v9120_v48  ;;  %6526 = vmatprep.subr.mxu1 %v6230_v61  ;;  %v9356_v61 = vsel %vm3835_vm4, 1.0, %v7794_v3 }
 0xd4a   : > { %3953 = vmatprep.mubr.f32.mxu0 %v7794_v3  ;;  %4009 = vmatpush1.msra.mxu0 %v9116_v2 }
 0xd4b   : > { %4215 = vmatprep.mubr.f32.mxu1 %v7794_v3  ;;  %6527 = vmatpush3.msra.mxu1 %v6214_v39  ;;  %v6224_v39 = vld [vmem:[%s10379_s11 + $0x290] sm:$0xff] }
 0xd4c   : > { %6174 = vmatmul.mubr.msk.f32.gmra.mxu0 %vm1521_vm7, %v9301_v33  ;;  %6194 = vmatmul.mubr.msk.f32.gmra.mxu1 %vm1521_vm7, %v9304_v40 }
 0xd4d   : > { %4256 = vmatprep.subr.mxu0 %v9209_v31  ;;  %6528 = vmatprep.subr.mxu1 %v6229_v41  ;;  %v6208_v41 = vld [vmem:[%s10379_s11 + $0x210] sm:$0xff] }
 0xd4e   : > { %6529 = vmatpush3.msra.mxu1 %v6213_v44  ;;  %3959 = vmatprep.mubr.f32.mxu0 %v7794_v3  ;;  %v6207_v44 = vld [vmem:[%s10379_s11 + $0x208] sm:$0xff] }
 0xd4f   : > { %6530 = vmatprep.subr.mxu1 %v6228_v6  ;;  %4221 = vmatprep.mubr.f32.mxu1 %v7794_v3  ;;  %v6206_v6 = vld [vmem:[%s10379_s11 + $0x200] sm:$0xff] }
 0xd50   : > { %6531 = vmatpush3.msra.mxu1 %v6212_v46  ;;  %6175 = vmatmul.mubr.msk.f32.gmra.mxu0 %vm1521_vm7, %v9330_v47  ;;  %v6250_v46 = vld [vmem:[%s10379_s11 + $0x360] sm:$0xff] }
 0xd51   : > { %6195 = vmatmul.mubr.msk.f32.gmra.mxu1 %vm1521_vm7, %v9334_v49  ;;  %6532 = vmatprep.subr.mxu1 %v6227_v50  ;;  %v6265_v50 = vld [vmem:[%s10379_s11 + $0x3d8] sm:$0xff] }
 0xd52   : > { %6533 = vmatpush3.msra.mxu1 %v6211_v52  ;;  %3965 = vmatprep.mubr.f32.mxu0 %v7794_v3  ;;  %v4376_v52 = vld [vmem:[%s10379_s11 + $0xb8] sm:$0xff] }
 0xd53   : > { %6534 = vmatprep.subr.mxu1 %v6226_v59  ;;  %4227 = vmatprep.mubr.f32.mxu1 %v7794_v3  ;;  %v4360_v59 = vld [vmem:[%s10379_s11 + $0x38] sm:$0xff] }
 0xd54   : > { %6535 = vmatpush3.msra.mxu1 %v6210_v60  ;;  %6176 = vmatmul.mubr.msk.f32.gmra.mxu0 %vm1521_vm7, %v9356_v61  ;;  %v6263_v60 = vld [vmem:[%s10379_s11 + $0x3c8] sm:$0xff] }
 0xd55   : > { %6196 = vmatmul.mubr.msk.f32.gmra.mxu1 %vm1521_vm7, %v9360_v62  ;;  %6536 = vmatprep.subr.mxu1 %v6225_v1  ;;  %v4375_v1 = vld [vmem:[%s10379_s11 + $0xb0] sm:$0xff] }
 0xd56   : > { %6537 = vmatpush3.msra.mxu1 %v6209_v36  ;;  %3971 = vmatprep.mubr.f32.mxu0 %v7794_v3  ;;  %v6246_v36 = vld [vmem:[%s10379_s11 + $0x340] sm:$0xff] }
 0xd57   : > { %6538 = vmatprep.subr.mxu1 %v6224_v39  ;;  %4233 = vmatprep.mubr.f32.mxu1 %v7794_v3  ;;  %v4359_v39 = vld [vmem:[%s10379_s11 + $0x30] sm:$0xff] }
 0xd58   : > { %6539 = vmatpush3.msra.mxu1 %v6208_v41  ;;  %6177 = vmatmul.mubr.msk.f32.gmra.mxu0 %vm1521_vm7, %v9382_v42  ;;  %v6261_v41 = vld [vmem:[%s10379_s11 + $0x3b8] sm:$0xff] }
 0xd59   : > { %6197 = vmatmul.mubr.msk.f32.gmra.mxu1 %vm1521_vm7, %v9386_v10  ;;  %6540 = vmatprep.subr.mxu1 %v6223_v43  ;;  %v4374_v43 = vld [vmem:[%s10379_s11 + $0xa8] sm:$0xff] }
 0xd5a   : > { %6541 = vmatpush3.msra.mxu1 %v6207_v44  ;;  %4546 = vmatprep.mubr.f32.mxu1 %v9118_v4  ;;  %v4382_v4 = vld [vmem:[%s10379_s11 + $0xe8] sm:$0xff]  ;;  %v6244_v44 = vld [vmem:[%s10379_s11 + $0x330] sm:$0xff] }
 0xd5b   : > { %6542 = vmatprep.subr.mxu1 %v6222_v45  ;;  %4042 = vmatprep.mubr.f32.mxu0 %v7794_v3  ;;  %v4358_v45 = vld [vmem:[%s10379_s11 + $0x28] sm:$0xff] }
 0xd5c   : > { %6543 = vmatpush3.msra.mxu1 %v6206_v6  ;;  %6178 = vmatmul.mubr.msk.f32.vlgmr.msra.gmra.mxu0 %vm1521_vm7, %v8126_v19  ;;  %v6269_v19 = vld [vmem:[%s10379_s11 + $0x3f8] sm:$0xff]  ;;  %v6259_v6 = vld [vmem:[%s10379_s11 + $0x3a8] sm:$0xff] }
 0xd5d   : > { %4257 = vmatpush1.msra.mxu0 %v9196_v30  ;;  %4547 = vmatmul.mubr.f32.vlgmr.msra.gmra.mxu1 %v9114_v53  ;;  %v4367_v53 = vld [vmem:[%s10379_s11 + $0x70] sm:$0xff] }
 0xd5e   : > { %4258 = vmatprep.subr.mxu0 %v9186_v29  ;;  %4551 = vmatprep.mubr.f32.mxu1 %v9126_v8  ;;  %v4381_v8 = vld [vmem:[%s10379_s11 + $0xe0] sm:$0xff] }
 0xd5f   : > { %4259 = vmatpush1.msra.mxu0 %v9176_v28  ;;  %4048 = vmatprep.mubr.f32.mxu0 %v7794_v3 }
 0xd60   : > { %4260 = vmatprep.subr.mxu0 %v9166_v27  ;;  %6179 = vmatmul.mubr.msk.f32.gmra.mxu0 %vm1521_vm7, %v8281_v56  ;;  %v4384_v56 = vld [vmem:[%s10379_s11 + $0xf8] sm:$0xff] }
 0xd61   : > { %4261 = vmatpush1.msra.mxu0 %v9160_v25  ;;  %4552 = vmatmul.mubr.f32.gmra.mxu1 %v9122_v5  ;;  %v4366_v5 = vld [vmem:[%s10379_s11 + $0x68] sm:$0xff] }
 0xd62   : > { %4262 = vmatprep.subr.mxu0 %v9154_v23  ;;  %4556 = vmatprep.mubr.f32.mxu1 %v9134_v12  ;;  %v4380_v12 = vld [vmem:[%s10379_s11 + $0xd8] sm:$0xff] }
 0xd63   : > { %4263 = vmatpush1.msra.mxu0 %v9148_v21  ;;  %4054 = vmatprep.mubr.f32.mxu0 %v7794_v3 }
 0xd64   : > { %4264 = vmatprep.subr.mxu0 %v9144_v17  ;;  %6180 = vmatmul.mubr.msk.f32.gmra.mxu0 %vm1521_vm7, %v8486_v57  ;;  %v4368_v57 = vld [vmem:[%s10379_s11 + $0x78] sm:$0xff] }
 0xd65   : > { %4265 = vmatpush1.msra.mxu0 %v9140_v15  ;;  %4557 = vmatmul.mubr.f32.gmra.mxu1 %v9130_v38  ;;  %v4365_v38 = vld [vmem:[%s10379_s11 + $0x60] sm:$0xff] }
 0xd66   : > { %4266 = vmatprep.subr.mxu0 %v9136_v13  ;;  %4561 = vmatprep.mubr.f32.mxu1 %v9142_v16  ;;  %v4379_v16 = vld [vmem:[%s10379_s11 + $0xd0] sm:$0xff] }
 0xd67   : > { %4267 = vmatpush1.msra.mxu0 %v9132_v11  ;;  %4060 = vmatprep.mubr.f32.mxu0 %v7794_v3 }
 0xd68   : > { %4268 = vmatprep.subr.mxu0 %v9128_v9  ;;  %6181 = vmatmul.mubr.msk.f32.gmra.mxu0 %vm1521_vm7, %v8512_v0  ;;  %v4383_v0 = vld [vmem:[%s10379_s11 + $0xf0] sm:$0xff] }
 0xd69   : > { %4269 = vmatpush1.msra.mxu0 %v9124_v7  ;;  %4562 = vmatmul.mubr.f32.gmra.mxu1 %v9138_v14  ;;  %v4364_v14 = vld [vmem:[%s10379_s11 + $0x58] sm:$0xff] }
 0xd6a   : > { %4270 = vmatprep.subr.mxu0 %v9120_v48  ;;  %4566 = vmatprep.mubr.f32.mxu1 %v9150_v22  ;;  %v6253_v22 = vld [vmem:[%s10379_s11 + $0x378] sm:$0xff] }
 0xd6b   : > { %4271 = vmatpush1.msra.mxu0 %v9116_v2  ;;  %4066 = vmatprep.mubr.f32.mxu0 %v7794_v3 }
 0xd6c   : > { %6182 = vmatmul.mubr.msk.f32.gmra.mxu0 %vm1521_vm7, %v9301_v33  ;;  %6568 = vmatprep.subr.mxu0 %v6269_v19  ;;  %v4377_v33 = vld [vmem:[%s10379_s11 + $0xc0] sm:$0xff] }
 0xd6d   : > { %4567 = vmatmul.mubr.f32.gmra.mxu1 %v9146_v18  ;;  %4072 = vmatprep.mubr.f32.mxu0 %v7794_v3  ;;  %v4363_v18 = vld [vmem:[%s10379_s11 + $0x50] sm:$0xff]  ;;  %v6258_v19 = vld [vmem:[%s10379_s11 + $0x3a0] sm:$0xff] }
 0xd6e   : > { %4571 = vmatprep.mubr.f32.mxu1 %v9156_v35  ;;  %6624 = vmatprep.subr.mxu1 %v4384_v56  ;;  %v4378_v35 = vld [vmem:[%s10379_s11 + $0xc8] sm:$0xff]  ;;  %v4373_v56 = vld [vmem:[%s10379_s11 + $0xa0] sm:$0xff] }
 0xd6f   : > { %6625 = vmatpush3.msra.mxu1 %v4368_v57  ;;  %v6242_v57 = vld [vmem:[%s10379_s11 + $0x320] sm:$0xff] }
 0xd70   : > { %6183 = vmatmul.mubr.msk.f32.gmra.mxu0 %vm1521_vm7, %v9330_v47  ;;  %6626 = vmatprep.subr.mxu1 %v4383_v0  ;;  %v4361_v47 = vld [vmem:[%s10379_s11 + $0x40] sm:$0xff] }
 0xd71   : > { %4572 = vmatmul.mubr.f32.gmra.mxu1 %v9152_v32  ;;  %4078 = vmatprep.mubr.f32.mxu0 %v7794_v3  ;;  %v6268_v32 = vld [vmem:[%s10379_s11 + $0x3f0] sm:$0xff]  ;;  %v4357_v0 = vld [vmem:[%s10379_s11 + $0x20] sm:$0xff] }
 0xd72   : > { %4576 = vmatprep.mubr.f32.mxu1 %v9162_v26  ;;  %6627 = vmatpush3.msra.mxu1 %v4367_v53  ;;  %v4362_v26 = vld [vmem:[%s10379_s11 + $0x48] sm:$0xff]  ;;  %v6257_v53 = vld [vmem:[%s10379_s11 + $0x398] sm:$0xff] }
 0xd73   : > { %6628 = vmatprep.subr.mxu1 %v4382_v4  ;;  %v6256_v4 = vld [vmem:[%s10379_s11 + $0x390] sm:$0xff] }
 0xd74   : > { %6184 = vmatmul.mubr.msk.f32.gmra.mxu0 %vm1521_vm7, %v9356_v61  ;;  %6629 = vmatpush3.msra.mxu1 %v4366_v5  ;;  %v6262_v61 = vld [vmem:[%s10379_s11 + $0x3c0] sm:$0xff]  ;;  %v4372_v5 = vld [vmem:[%s10379_s11 + $0x98] sm:$0xff] }
 0xd75   : > { %4577 = vmatmul.mubr.f32.gmra.mxu1 %v9158_v24  ;;  %4084 = vmatprep.mubr.f32.mxu0 %v7794_v3  ;;  %v6252_v24 = vld [vmem:[%s10379_s11 + $0x370] sm:$0xff] }
 0xd76   : > { %4581 = vmatprep.mubr.f32.mxu1 %v9168_v37  ;;  %6630 = vmatprep.subr.mxu1 %v4381_v8  ;;  %v6266_v37 = vld [vmem:[%s10379_s11 + $0x3e0] sm:$0xff]  ;;  %v6240_v8 = vld [vmem:[%s10379_s11 + $0x310] sm:$0xff] }
 0xd77   : > { %6631 = vmatpush3.msra.mxu1 %v4365_v38  ;;  %v4356_v38 = vld [vmem:[%s10379_s11 + $0x18] sm:$0xff] }
 0xd78   : > { %6185 = vmatmul.mubr.msk.f32.gmra.mxu0 %vm1521_vm7, %v9382_v42  ;;  %6632 = vmatprep.subr.mxu1 %v4380_v12  ;;  %v6260_v42 = vld [vmem:[%s10379_s11 + $0x3b0] sm:$0xff]  ;;  %v6255_v12 = vld [vmem:[%s10379_s11 + $0x388] sm:$0xff] }
 0xd79   : > { %4582 = vmatmul.mubr.f32.gmra.mxu1 %v9164_v34  ;;  %4304 = vmatprep.mubr.f32.mxu0 %v7794_v3  ;;  %v6267_v34 = vld [vmem:[%s10379_s11 + $0x3e8] sm:$0xff] }
 0xd7a   : > { %6633 = vmatpush3.msra.mxu1 %v4364_v14  ;;  %v6254_v14 = vld [vmem:[%s10379_s11 + $0x380] sm:$0xff] }
 0xd7b   : > { %6634 = vmatprep.subr.mxu1 %v4379_v16  ;;  %v6238_v16 = vld [vmem:[%s10379_s11 + $0x300] sm:$0xff] }
 0xd7c   : > { %6198 = vmatmul.mubr.msk.f32.vlgmr.msra.gmra.mxu0 %vm1521_vm7, %v8129_v20  ;;  %6635 = vmatpush3.msra.mxu1 %v4363_v18  ;;  %v6251_v20 = vld [vmem:[%s10379_s11 + $0x368] sm:$0xff]  ;;  %v4355_v18 = vld [vmem:[%s10379_s11 + $0x10] sm:$0xff] }
 0xd7d   : > { %6569 = vmatpush3.msra.mxu0 %v6253_v22  ;;  %4310 = vmatprep.mubr.f32.mxu0 %v7794_v3  ;;  %v4370_v22 = vld [vmem:[%s10379_s11 + $0x88] sm:$0xff] }
 0xd7e   : > { %6570 = vmatprep.subr.mxu0 %v6268_v32  ;;  %6636 = vmatprep.subr.mxu1 %v4378_v35  ;;  %v4369_v32 = vld [vmem:[%s10379_s11 + $0x80] sm:$0xff] }
 0xd7f   : > { %6571 = vmatpush3.msra.mxu0 %v6252_v24  ;;  %6637 = vmatpush3.msra.mxu1 %v4362_v26  ;;  %v4353_v35 = vld [vmem:[%s10379_s11] sm:$0xff]  ;;  %v4400_v24 = vld [vmem:[%s10379_s11 + $0x178] sm:$0xff]  ;;  %v4415_v26 = vld [vmem:[%s10379_s11 + $0x1f0] sm:$0xff] }
 0xd80   : > { %6199 = vmatmul.mubr.msk.f32.gmra.mxu0 %vm1521_vm7, %v8292_v58  ;;  %6572 = vmatprep.subr.mxu0 %v6267_v34  ;;  %v6249_v58 = vld [vmem:[%s10379_s11 + $0x358] sm:$0xff]  ;;  %v4414_v34 = vld [vmem:[%s10379_s11 + $0x1e8] sm:$0xff] }
 0xd81   : > { %6573 = vmatpush3.msra.mxu0 %v6251_v20  ;;  %4316 = vmatprep.mubr.f32.mxu0 %v7794_v3  ;;  %v4398_v20 = vld [vmem:[%s10379_s11 + $0x168] sm:$0xff] }
 0xd82   : > { %6574 = vmatprep.subr.mxu0 %v6266_v37  ;;  %6638 = vmatprep.subr.mxu1 %v4377_v33  ;;  %v4413_v37 = vld [vmem:[%s10379_s11 + $0x1e0] sm:$0xff] }
 0xd83   : > { %6575 = vmatpush3.msra.mxu0 %v6250_v46  ;;  %6639 = vmatpush3.msra.mxu1 %v4361_v47  ;;  %v4397_v33 = vld [vmem:[%s10379_s11 + $0x160] sm:$0xff]  ;;  %v4411_v46 = vld [vmem:[%s10379_s11 + $0x1d0] sm:$0xff] }
 0xd84   : > { %6200 = vmatmul.mubr.msk.f32.gmra.mxu0 %vm1521_vm7, %v8482_v55  ;;  %6576 = vmatprep.subr.mxu0 %v6265_v50  ;;  %v6247_v55 = vld [vmem:[%s10379_s11 + $0x348] sm:$0xff]  ;;  %v4395_v47 = vld [vmem:[%s10379_s11 + $0x150] sm:$0xff]  ;;  %v4409_v50 = vld [vmem:[%s10379_s11 + $0x1c0] sm:$0xff] }
 0xd85   : > { %6577 = vmatpush3.msra.mxu0 %v6249_v58  ;;  %4322 = vmatprep.mubr.f32.mxu0 %v7794_v3  ;;  %v4393_v58 = vld [vmem:[%s10379_s11 + $0x140] sm:$0xff] }
 0xd86   : > { %6578 = vmatprep.subr.mxu0 %v6264_v51  ;;  %6640 = vmatprep.subr.mxu1 %v4376_v52  ;;  %v4407_v51 = vld [vmem:[%s10379_s11 + $0x1b0] sm:$0xff] }
 0xd87   : > { %6579 = vmatpush3.msra.mxu0 %v6248_v54  ;;  %6641 = vmatpush3.msra.mxu1 %v4360_v59  ;;  %v4391_v52 = vld [vmem:[%s10379_s11 + $0x130] sm:$0xff]  ;;  %v4405_v54 = vld [vmem:[%s10379_s11 + $0x1a0] sm:$0xff] }
 0xd88   : > { %6201 = vmatmul.mubr.msk.f32.gmra.mxu0 %vm1521_vm7, %v8508_v63  ;;  %6580 = vmatprep.subr.mxu0 %v6263_v60  ;;  %v6245_v63 = vld [vmem:[%s10379_s11 + $0x338] sm:$0xff]  ;;  %v4389_v59 = vld [vmem:[%s10379_s11 + $0x120] sm:$0xff]  ;;  %v4403_v60 = vld [vmem:[%s10379_s11 + $0x190] sm:$0xff] }
 0xd89   : > { %6581 = vmatpush3.msra.mxu0 %v6247_v55  ;;  %4328 = vmatprep.mubr.f32.mxu0 %v7794_v3  ;;  %v4387_v55 = vld [vmem:[%s10379_s11 + $0x110] sm:$0xff] }
 0xd8a   : > { %6582 = vmatprep.subr.mxu0 %v6262_v61  ;;  %6642 = vmatprep.subr.mxu1 %v4375_v1  ;;  %v4401_v61 = vld [vmem:[%s10379_s11 + $0x180] sm:$0xff] }
 0xd8b   : > { %6583 = vmatpush3.msra.mxu0 %v6246_v36  ;;  %6643 = vmatpush3.msra.mxu1 %v4359_v39  ;;  %v4385_v1 = vld [vmem:[%s10379_s11 + $0x100] sm:$0xff] }
 0xd8c   : > { %6202 = vmatmul.mubr.msk.f32.gmra.mxu0 %vm1521_vm7, %v9304_v40  ;;  %6584 = vmatprep.subr.mxu0 %v6261_v41  ;;  %v6243_v40 = vld [vmem:[%s10379_s11 + $0x328] sm:$0xff] }
 0xd8d   : > { %6585 = vmatpush3.msra.mxu0 %v6245_v63  ;;  %4334 = vmatprep.mubr.f32.mxu0 %v7794_v3  ;;  %v6285_v63 = vld [vmem:[%s10379_s11 + $0x478] sm:$0xff] }
 0xd8e   : > { %6586 = vmatprep.subr.mxu0 %v6260_v42  ;;  %6644 = vmatprep.subr.mxu1 %v4374_v43  ;;  %v6300_v43 = vld [vmem:[%s10379_s11 + $0x4f0] sm:$0xff] }
 0xd8f   : > { %6587 = vmatpush3.msra.mxu0 %v6244_v44  ;;  %6645 = vmatpush3.msra.mxu1 %v4358_v45  ;;  %v6284_v44 = vld [vmem:[%s10379_s11 + $0x470] sm:$0xff]  ;;  %v6299_v45 = vld [vmem:[%s10379_s11 + $0x4e8] sm:$0xff] }
 0xd90   : > { %6203 = vmatmul.mubr.msk.f32.gmra.mxu0 %vm1521_vm7, %v9334_v49  ;;  %6588 = vmatprep.subr.mxu0 %v6259_v6  ;;  %v6241_v49 = vld [vmem:[%s10379_s11 + $0x318] sm:$0xff] }
 0xd91   : > { %6589 = vmatpush3.msra.mxu0 %v6243_v40  ;;  %4340 = vmatprep.mubr.f32.mxu0 %v7794_v3  ;;  %v6283_v40 = vld [vmem:[%s10379_s11 + $0x468] sm:$0xff] }
 0xd92   : > { %6590 = vmatprep.subr.mxu0 %v6258_v19  ;;  %6646 = vmatprep.subr.mxu1 %v4373_v56  ;;  %v6298_v56 = vld [vmem:[%s10379_s11 + $0x4e0] sm:$0xff] }
 0xd93   : > { %6591 = vmatpush3.msra.mxu0 %v6242_v57  ;;  %6647 = vmatpush3.msra.mxu1 %v4357_v0  ;;  %v6282_v0 = vld [vmem:[%s10379_s11 + $0x460] sm:$0xff] }
 0xd94   : > { %6204 = vmatmul.mubr.msk.f32.gmra.mxu0 %vm1521_vm7, %v9360_v62  ;;  %6592 = vmatprep.subr.mxu0 %v6257_v53  ;;  %v6239_v62 = vld [vmem:[%s10379_s11 + $0x308] sm:$0xff] }
 0xd95   : > { %6593 = vmatpush3.msra.mxu0 %v6241_v49  ;;  %4346 = vmatprep.mubr.f32.mxu0 %v7794_v3  ;;  %v4371_v3 = vld [vmem:[%s10379_s11 + $0x90] sm:$0xff]  ;;  %v6297_v49 = vld [vmem:[%s10379_s11 + $0x4d8] sm:$0xff] }
 0xd96   : > { %6594 = vmatprep.subr.mxu0 %v6256_v4  ;;  %6648 = vmatprep.subr.mxu1 %v4372_v5  ;;  %v6281_v4 = vld [vmem:[%s10379_s11 + $0x458] sm:$0xff]  ;;  %v6296_v5 = vld [vmem:[%s10379_s11 + $0x4d0] sm:$0xff] }
 0xd97   : > { %6595 = vmatpush3.msra.mxu0 %v6240_v8  ;;  %6649 = vmatpush3.msra.mxu1 %v4356_v38  ;;  %v6280_v38 = vld [vmem:[%s10379_s11 + $0x450] sm:$0xff] }
 0xd98   : > { %6205 = vmatmul.mubr.msk.f32.gmra.mxu0 %vm1521_vm7, %v9386_v10  ;;  %6596 = vmatprep.subr.mxu0 %v6255_v12  ;;  %v4354_v10 = vld [vmem:[%s10379_s11 + $0x8] sm:$0xff] }
 0xd99   : > { %6597 = vmatpush3.msra.mxu0 %v6239_v62  ;;  %4651 = vmatprep.mubr.f32.mxu0 %v9120_v48  ;;  %v4416_v48 = vld [vmem:[%s10379_s11 + $0x1f8] sm:$0xff]  ;;  %v6295_v62 = vld [vmem:[%s10379_s11 + $0x4c8] sm:$0xff] }
 0xd9a   : > { %6598 = vmatprep.subr.mxu0 %v6254_v14  ;;  %6650 = vmatprep.subr.mxu1 %v4371_v3  ;;  %v6279_v3 = vld [vmem:[%s10379_s11 + $0x448] sm:$0xff] }
 0xd9b   : > { %6599 = vmatpush3.msra.mxu0 %v6238_v16  ;;  %6651 = vmatpush3.msra.mxu1 %v4355_v18  ;;  %v6294_v18 = vld [vmem:[%s10379_s11 + $0x4c0] sm:$0xff] }
 0xd9c   : > { %4652 = vmatmul.mubr.f32.vlgmr.msra.gmra.mxu0 %v9116_v2  ;;  %6652 = vmatprep.subr.mxu1 %v4370_v22  ;;  %v4399_v2 = vld [vmem:[%s10379_s11 + $0x170] sm:$0xff]  ;;  %v6278_v22 = vld [vmem:[%s10379_s11 + $0x440] sm:$0xff] }
 0xd9d   : > { %4656 = vmatprep.mubr.f32.mxu0 %v9128_v9  ;;  %6653 = vmatpush3.msra.mxu1 %v4354_v10  ;;  %v6301_v9 = vld [vmem:[%s10379_s11 + $0x4f8] sm:$0xff] }
 0xd9e   : > { %6654 = vmatprep.subr.mxu1 %v4369_v32  ;;  %6680 = vmatprep.subr.mxu0 %v4416_v48  ;;  %v6293_v10 = vld [vmem:[%s10379_s11 + $0x4b8] sm:$0xff] }
 0xd9f   : > { %6655 = vmatpush3.msra.mxu1 %v4353_v35  ;;  %6681 = vmatpush3.msra.mxu0 %v4400_v24  ;;  %v6277_v48 = vld [vmem:[%s10379_s11 + $0x438] sm:$0xff]  ;;  %v6292_v24 = vld [vmem:[%s10379_s11 + $0x4b0] sm:$0xff] }
 0xda0   : > { %4657 = vmatmul.mubr.f32.gmra.mxu0 %v9124_v7  ;;  %6682 = vmatprep.subr.mxu0 %v4415_v26  ;;  %v4412_v7 = vld [vmem:[%s10379_s11 + $0x1d8] sm:$0xff] }
 0xda1   : > { %4661 = vmatprep.mubr.f32.mxu0 %v9136_v13  ;;  %6683 = vmatpush3.msra.mxu0 %v4399_v2  ;;  %v4396_v13 = vld [vmem:[%s10379_s11 + $0x158] sm:$0xff]  ;;  %v6276_v2 = vld [vmem:[%s10379_s11 + $0x430] sm:$0xff] }
 0xda2   : > { %6684 = vmatprep.subr.mxu0 %v4414_v34  ;;  %6736 = vmatprep.subr.mxu1 %v6301_v9  ;;  %v6291_v9 = vld [vmem:[%s10379_s11 + $0x4a8] sm:$0xff] }
 0xda3   : > { %6685 = vmatpush3.msra.mxu0 %v4398_v20  ;;  %v6275_v20 = vld [vmem:[%s10379_s11 + $0x428] sm:$0xff] }
 0xda4   : > { %4662 = vmatmul.mubr.f32.gmra.mxu0 %v9132_v11  ;;  %6686 = vmatprep.subr.mxu0 %v4413_v37  ;;  %v4410_v11 = vld [vmem:[%s10379_s11 + $0x1c8] sm:$0xff]  ;;  %v6290_v37 = vld [vmem:[%s10379_s11 + $0x4a0] sm:$0xff] }
 0xda5   : > { %4666 = vmatprep.mubr.f32.mxu0 %v9144_v17  ;;  %6687 = vmatpush3.msra.mxu0 %v4397_v33  ;;  %v4394_v17 = vld [vmem:[%s10379_s11 + $0x148] sm:$0xff] }
 0xda6   : > { %6688 = vmatprep.subr.mxu0 %v4412_v7 }
 0xda7   : > { %6689 = vmatpush3.msra.mxu0 %v4396_v13  ;;  %v6274_v13 = vld [vmem:[%s10379_s11 + $0x420] sm:$0xff] }
 0xda8   : > { %4667 = vmatmul.mubr.f32.gmra.mxu0 %v9140_v15  ;;  %6690 = vmatprep.subr.mxu0 %v4411_v46  ;;  %v4408_v15 = vld [vmem:[%s10379_s11 + $0x1b8] sm:$0xff] }
 0xda9   : > { %4671 = vmatprep.mubr.f32.mxu0 %v9154_v23  ;;  %6691 = vmatpush3.msra.mxu0 %v4395_v47  ;;  %v4392_v23 = vld [vmem:[%s10379_s11 + $0x138] sm:$0xff] }
 0xdaa   : > { %6692 = vmatprep.subr.mxu0 %v4410_v11  ;;  %v6289_v46 = vld [vmem:[%s10379_s11 + $0x498] sm:$0xff] }
 0xdab   : > { %6693 = vmatpush3.msra.mxu0 %v4394_v17  ;;  %v6273_v17 = vld [vmem:[%s10379_s11 + $0x418] sm:$0xff] }
 0xdac   : > { %4672 = vmatmul.mubr.f32.gmra.mxu0 %v9148_v21  ;;  %6694 = vmatprep.subr.mxu0 %v4409_v50  ;;  %v4406_v21 = vld [vmem:[%s10379_s11 + $0x1a8] sm:$0xff]  ;;  %v6288_v50 = vld [vmem:[%s10379_s11 + $0x490] sm:$0xff] }
 0xdad   : > { %4676 = vmatprep.mubr.f32.mxu0 %v9166_v27  ;;  %6695 = vmatpush3.msra.mxu0 %v4393_v58  ;;  %v4390_v27 = vld [vmem:[%s10379_s11 + $0x128] sm:$0xff] }
 0xdae   : > { %6696 = vmatprep.subr.mxu0 %v4408_v15  ;;  %v6272_v15 = vld [vmem:[%s10379_s11 + $0x410] sm:$0xff] }
 0xdaf   : > { %6697 = vmatpush3.msra.mxu0 %v4392_v23 }
 0xdb0   : > { %4677 = vmatmul.mubr.f32.gmra.mxu0 %v9160_v25  ;;  %6698 = vmatprep.subr.mxu0 %v4407_v51  ;;  %v4404_v25 = vld [vmem:[%s10379_s11 + $0x198] sm:$0xff]  ;;  %v6287_v51 = vld [vmem:[%s10379_s11 + $0x488] sm:$0xff] }
 0xdb1   : > { %4681 = vmatprep.mubr.f32.mxu0 %v9186_v29  ;;  %6699 = vmatpush3.msra.mxu0 %v4391_v52  ;;  %v4388_v29 = vld [vmem:[%s10379_s11 + $0x118] sm:$0xff] }
 0xdb2   : > { %6700 = vmatprep.subr.mxu0 %v4406_v21  ;;  %v6271_v21 = vld [vmem:[%s10379_s11 + $0x408] sm:$0xff] }
 0xdb3   : > { %6701 = vmatpush3.msra.mxu0 %v4390_v27 }
 0xdb4   : > { %4682 = vmatmul.mubr.f32.gmra.mxu0 %v9176_v28  ;;  %6702 = vmatprep.subr.mxu0 %v4405_v54  ;;  %v4402_v28 = vld [vmem:[%s10379_s11 + $0x188] sm:$0xff]  ;;  %v6286_v54 = vld [vmem:[%s10379_s11 + $0x480] sm:$0xff] }
 0xdb5   : > { %4686 = vmatprep.mubr.f32.mxu0 %v9209_v31  ;;  %6703 = vmatpush3.msra.mxu0 %v4389_v59  ;;  %v4386_v31 = vld [vmem:[%s10379_s11 + $0x108] sm:$0xff] }
 0xdb6   : > { %6704 = vmatprep.subr.mxu0 %v4404_v25  ;;  %v6270_v25 = vld [vmem:[%s10379_s11 + $0x400] sm:$0xff] }
 0xdb7   : > { %6705 = vmatpush3.msra.mxu0 %v4388_v29 }
 0xdb8   : > { %4687 = vmatmul.mubr.f32.gmra.mxu0 %v9196_v30  ;;  %6706 = vmatprep.subr.mxu0 %v4403_v60  ;;  %v6333_v30 = vld [vmem:[%s10379_s11 + $0x5f8] sm:$0xff] }
 0xdb9   : > { %6707 = vmatpush3.msra.mxu0 %v4387_v55 }
 0xdba   : > { %6708 = vmatprep.subr.mxu0 %v4402_v28 }
 0xdbb   : > { %6709 = vmatpush3.msra.mxu0 %v4386_v31 }
 0xdbc   : > { %6710 = vmatprep.subr.mxu0 %v4401_v61 }
 0xdbd   : > { %6711 = vmatpush3.msra.mxu0 %v4385_v1 }
 0xdbe   : > { %6792 = vmatprep.subr.mxu0 %v6333_v30 }
 0xdf4   : > { %v3931_v36 = vpop.f32.mrf.mxu0 }
 0xdf5   : > { %v9794_v39 = vpop.f32.mrf.mxu1 }
 0xdf6   : > { %v3933_v41 = vpop.f32.mrf.mxu0 }
 0xdf7   : > { %v9799_v42 = vpop.f32.mrf.mxu1  ;;  %4756 = vmatprep.mubr.f32.mxu1 %v3933_v41 }
 0xdf8   : > { %4757 = vmatmul.mubr.f32.vlgmr.msra.gmra.mxu1 %v3931_v36 }
 0xdf9   : > { %6737 = vmatpush3.msra.mxu1 %v6285_v63  ;;  %v6317_v63 = vld [vmem:[%s10379_s11 + $0x578] sm:$0xff] }
 0xdfa   : > { %v3937_v6 = vpop.f32.mrf.mxu0  ;;  %6738 = vmatprep.subr.mxu1 %v6300_v43 }
 0xdfb   : > { %v9813_v19 = vpop.f32.mrf.mxu1  ;;  %6739 = vmatpush3.msra.mxu1 %v6284_v44  ;;  %v6332_v44 = vld [vmem:[%s10379_s11 + $0x5f0] sm:$0xff] }
 0xdfc   : > { %v3939_v57 = vpop.f32.mrf.mxu0  ;;  %6740 = vmatprep.subr.mxu1 %v6299_v45 }
 0xdfd   : > { %v9821_v53 = vpop.f32.mrf.mxu1  ;;  %4761 = vmatprep.mubr.f32.mxu1 %v3939_v57  ;;  %6741 = vmatpush3.msra.mxu1 %v6283_v40  ;;  %v6316_v40 = vld [vmem:[%s10379_s11 + $0x570] sm:$0xff] }
 0xdfe   : > { %4762 = vmatmul.mubr.f32.gmra.mxu1 %v3937_v6  ;;  %6742 = vmatprep.subr.mxu1 %v6298_v56  ;;  %v6331_v56 = vld [vmem:[%s10379_s11 + $0x5e8] sm:$0xff] }
 0xdff   : > { %6743 = vmatpush3.msra.mxu1 %v6282_v0  ;;  %v6315_v0 = vld [vmem:[%s10379_s11 + $0x568] sm:$0xff] }
 0xe00   : > { %v3943_v8 = vpop.f32.mrf.mxu0  ;;  %6744 = vmatprep.subr.mxu1 %v6297_v49 }
 0xe01   : > { %v9835_v12 = vpop.f32.mrf.mxu1  ;;  %6745 = vmatpush3.msra.mxu1 %v6281_v4 }
 0xe02   : > { %v3945_v14 = vpop.f32.mrf.mxu0  ;;  %6746 = vmatprep.subr.mxu1 %v6296_v5 }
 0xe03   : > { %v9843_v16 = vpop.f32.mrf.mxu1  ;;  %4766 = vmatprep.mubr.f32.mxu1 %v3945_v14  ;;  %6747 = vmatpush3.msra.mxu1 %v6280_v38  ;;  %v6329_v38 = vld [vmem:[%s10379_s11 + $0x5d8] sm:$0xff] }
 0xe04   : > { %4767 = vmatmul.mubr.f32.gmra.mxu1 %v3943_v8  ;;  %6748 = vmatprep.subr.mxu1 %v6295_v62  ;;  %v6313_v14 = vld [vmem:[%s10379_s11 + $0x558] sm:$0xff] }
 0xe05   : > { %6749 = vmatpush3.msra.mxu1 %v6279_v3 }
 0xe06   : > { %v3949_v32 = vpop.f32.mrf.mxu0  ;;  %6750 = vmatprep.subr.mxu1 %v6294_v18  ;;  %v6328_v18 = vld [vmem:[%s10379_s11 + $0x5d0] sm:$0xff] }
 0xe07   : > { %v9857_v35 = vpop.f32.mrf.mxu1  ;;  %6751 = vmatpush3.msra.mxu1 %v6278_v22 }
 0xe08   : > { %v3951_v26 = vpop.f32.mrf.mxu0  ;;  %6752 = vmatprep.subr.mxu1 %v6293_v10 }
 0xe09   : > { %v9865_v34 = vpop.f32.mrf.mxu1  ;;  %4771 = vmatprep.mubr.f32.mxu1 %v3951_v26  ;;  %6753 = vmatpush3.msra.mxu1 %v6277_v48 }
 0xe0a   : > { %4772 = vmatmul.mubr.f32.gmra.mxu1 %v3949_v32  ;;  %6754 = vmatprep.subr.mxu1 %v6292_v24  ;;  %v6311_v24 = vld [vmem:[%s10379_s11 + $0x548] sm:$0xff] }
 0xe0b   : > { %6755 = vmatpush3.msra.mxu1 %v6276_v2  ;;  %v6326_v2 = vld [vmem:[%s10379_s11 + $0x5c0] sm:$0xff] }
 0xe0c   : > { %v3955_v33 = vpop.f32.mrf.mxu0  ;;  %v9876_v7 = vpop.f32.mrf.mxu1  ;;  %6756 = vmatprep.subr.mxu1 %v6291_v9 }
 0xe0d   : > { %6757 = vmatpush3.msra.mxu1 %v6275_v20 }
 0xe0e   : > { %v3957_v47 = vpop.f32.mrf.mxu0  ;;  %v9884_v11 = vpop.f32.mrf.mxu1  ;;  %6758 = vmatprep.subr.mxu1 %v6290_v37 }
 0xe0f   : > { %4776 = vmatprep.mubr.f32.mxu1 %v3957_v47  ;;  %6759 = vmatpush3.msra.mxu1 %v6274_v13  ;;  %v6309_v13 = vld [vmem:[%s10379_s11 + $0x538] sm:$0xff]  ;;  %v6324_v47 = vld [vmem:[%s10379_s11 + $0x5b0] sm:$0xff] }
 0xe10   : > { %v3961_v58 = vpop.f32.mrf.mxu0  ;;  %4777 = vmatmul.mubr.f32.gmra.mxu1 %v3955_v33  ;;  %6760 = vmatprep.subr.mxu1 %v6289_v46 }
 0xe11   : > { %v9895_v23 = vpop.f32.mrf.mxu1  ;;  %6761 = vmatpush3.msra.mxu1 %v6273_v17 }
 0xe12   : > { %v3963_v52 = vpop.f32.mrf.mxu0  ;;  %6762 = vmatprep.subr.mxu1 %v6288_v50 }
 0xe13   : > { %v9903_v27 = vpop.f32.mrf.mxu1  ;;  %4781 = vmatprep.mubr.f32.mxu1 %v3963_v52  ;;  %6763 = vmatpush3.msra.mxu1 %v6272_v15 }
 0xe14   : > { %v3967_v59 = vpop.f32.mrf.mxu0  ;;  %4782 = vmatmul.mubr.f32.gmra.mxu1 %v3961_v58  ;;  %6764 = vmatprep.subr.mxu1 %v6287_v51  ;;  %v6307_v51 = vld [vmem:[%s10379_s11 + $0x528] sm:$0xff] }
 0xe15   : > { %v9911_v29 = vpop.f32.mrf.mxu1  ;;  %6765 = vmatpush3.msra.mxu1 %v6271_v21  ;;  %v6322_v21 = vld [vmem:[%s10379_s11 + $0x5a0] sm:$0xff] }
 0xe16   : > { %v3969_v60 = vpop.f32.mrf.mxu0  ;;  %6766 = vmatprep.subr.mxu1 %v6286_v54 }
 0xe17   : > { %v9913_v55 = vpop.f32.mrf.mxu1  ;;  %4786 = vmatprep.mubr.f32.mxu1 %v3969_v60  ;;  %6767 = vmatpush3.msra.mxu1 %v6270_v25 }
 0xe18   : > { %v3973_v28 = vpop.f32.mrf.mxu0  ;;  %4787 = vmatmul.mubr.f32.gmra.mxu1 %v3967_v59 }
 0xe19   : > { %v9915_v31 = vpop.f32.mrf.mxu1 }
 0xe1a   : > { %v3975_v61 = vpop.f32.mrf.mxu0 }
 0xe1b   : > { %v9917_v1 = vpop.f32.mrf.mxu1  ;;  %4791 = vmatprep.mubr.f32.mxu1 %v3975_v61 }
 0xe1c   : > { %v4044_v30 = vpop.f32.mrf.mxu0  ;;  %4792 = vmatmul.mubr.f32.gmra.mxu1 %v3973_v28  ;;  %v6305_v28 = vld [vmem:[%s10379_s11 + $0x518] sm:$0xff] }
 0xe1d   : > { %v6544_v36 = vpop.f32.mrf.mxu1  ;;  %5031 = vmatprep.mubr.f32.mxu1 %v9799_v42 }
 0xe1e   : > { %v4046_v41 = vpop.f32.mrf.mxu0 }
 0xe1f   : > { %v6545_v43 = vpop.f32.mrf.mxu1  ;;  %4861 = vmatprep.mubr.f32.mxu0 %v4046_v41 }
 0xe20   : > { %v9926_v45 = vadd.f32 %v6545_v43, %v6544_v36  ;;  %v4050_v6 = vpop.f32.mrf.mxu0  ;;  %4862 = vmatmul.mubr.f32.vlgmr.msra.gmra.mxu0 %v4044_v30  ;;  %5032 = vmatmul.mubr.f32.vlgmr.msra.gmra.mxu1 %v9794_v39  ;;  %v6330_v39 = vld [vmem:[%s10379_s11 + $0x5e0] sm:$0xff]  ;;  %v6320_v30 = vld [vmem:[%s10379_s11 + $0x590] sm:$0xff]  ;;  %v6303_v43 = vld [vmem:[%s10379_s11 + $0x508] sm:$0xff] }
 0xe21   : > { %v6547_v42 = vpop.f32.mrf.mxu1  ;;  %6793 = vmatpush3.msra.mxu0 %v6317_v63  ;;  %5036 = vmatprep.mubr.f32.mxu1 %v9821_v53  ;;  %v6314_v53 = vld [vmem:[%s10379_s11 + $0x560] sm:$0xff] }
 0xe22   : > { %v4052_v57 = vpop.f32.mrf.mxu0  ;;  %6794 = vmatprep.subr.mxu0 %v6332_v44  ;;  %v6318_v44 = vld [vmem:[%s10379_s11 + $0x580] sm:$0xff] }
 0xe23   : > { %v6548_v49 = vpop.f32.mrf.mxu1  ;;  %4866 = vmatprep.mubr.f32.mxu0 %v4052_v57  ;;  %6795 = vmatpush3.msra.mxu0 %v6316_v40 }
 0xe24   : > { %v9942_v4 = vadd.f32 %v6548_v49, %v6547_v42  ;;  %v4056_v5 = vpop.f32.mrf.mxu0  ;;  %4867 = vmatmul.mubr.f32.gmra.mxu0 %v4050_v6  ;;  %6796 = vmatprep.subr.mxu0 %v6331_v56 }
 0xe25   : > { %v6550_v8 = vpop.f32.mrf.mxu1  ;;  %6797 = vmatpush3.msra.mxu0 %v6315_v0  ;;  %5037 = vmatmul.mubr.f32.gmra.mxu1 %v9813_v19  ;;  %v6312_v19 = vld [vmem:[%s10379_s11 + $0x550] sm:$0xff] }
 0xe26   : > { %v4058_v62 = vpop.f32.mrf.mxu0  ;;  %6798 = vmatprep.subr.mxu0 %v6330_v39  ;;  %5041 = vmatprep.mubr.f32.mxu1 %v9843_v16  ;;  %v6327_v16 = vld [vmem:[%s10379_s11 + $0x5c8] sm:$0xff] }
 0xe27   : > { %v6551_v3 = vpop.f32.mrf.mxu1  ;;  %4871 = vmatprep.mubr.f32.mxu0 %v4058_v62  ;;  %6799 = vmatpush3.msra.mxu0 %v6314_v53 }
 0xe28   : > { %v9958_v22 = vadd.f32 %v6551_v3, %v6550_v8  ;;  %v4062_v10 = vpop.f32.mrf.mxu0  ;;  %4872 = vmatmul.mubr.f32.gmra.mxu0 %v4056_v5  ;;  %6800 = vmatprep.subr.mxu0 %v6329_v38 }
 0xe29   : > { %v6553_v32 = vpop.f32.mrf.mxu1  ;;  %6801 = vmatpush3.msra.mxu0 %v6313_v14  ;;  %5042 = vmatmul.mubr.f32.gmra.mxu1 %v9835_v12  ;;  %v6310_v12 = vld [vmem:[%s10379_s11 + $0x540] sm:$0xff] }
 0xe2a   : > { %v4064_v48 = vpop.f32.mrf.mxu0  ;;  %6802 = vmatprep.subr.mxu0 %v6328_v18  ;;  %5046 = vmatprep.mubr.f32.mxu1 %v9865_v34  ;;  %v6325_v34 = vld [vmem:[%s10379_s11 + $0x5b8] sm:$0xff] }
 0xe2b   : > { %v6554_v26 = vpop.f32.mrf.mxu1  ;;  %4876 = vmatprep.mubr.f32.mxu0 %v4064_v48  ;;  %6803 = vmatpush3.msra.mxu0 %v6312_v19 }
 0xe2c   : > { %v9974_v9 = vadd.f32 %v6554_v26, %v6553_v32  ;;  %v4068_v20 = vpop.f32.mrf.mxu0  ;;  %4877 = vmatmul.mubr.f32.gmra.mxu0 %v4062_v10  ;;  %6804 = vmatprep.subr.mxu0 %v6327_v16 }
 0xe2d   : > { %v6556_v37 = vpop.f32.mrf.mxu1  ;;  %6805 = vmatpush3.msra.mxu0 %v6311_v24  ;;  %5047 = vmatmul.mubr.f32.gmra.mxu1 %v9857_v35  ;;  %v6308_v35 = vld [vmem:[%s10379_s11 + $0x530] sm:$0xff] }
 0xe2e   : > { %v4070_v33 = vpop.f32.mrf.mxu0  ;;  %6806 = vmatprep.subr.mxu0 %v6326_v2  ;;  %5051 = vmatprep.mubr.f32.mxu1 %v9884_v11  ;;  %v6323_v11 = vld [vmem:[%s10379_s11 + $0x5a8] sm:$0xff] }
 0xe2f   : > { %v6557_v46 = vpop.f32.mrf.mxu1  ;;  %4881 = vmatprep.mubr.f32.mxu0 %v4070_v33  ;;  %6807 = vmatpush3.msra.mxu0 %v6310_v12 }
 0xe30   : > { %v9990_v17 = vadd.f32 %v6557_v46, %v6556_v37  ;;  %v4074_v50 = vpop.f32.mrf.mxu0  ;;  %4882 = vmatmul.mubr.f32.gmra.mxu0 %v4068_v20  ;;  %6808 = vmatprep.subr.mxu0 %v6325_v34 }
 0xe31   : > { %v6559_v58 = vpop.f32.mrf.mxu1  ;;  %6809 = vmatpush3.msra.mxu0 %v6309_v13  ;;  %5052 = vmatmul.mubr.f32.gmra.mxu1 %v9876_v7  ;;  %v6306_v7 = vld [vmem:[%s10379_s11 + $0x520] sm:$0xff] }
 0xe32   : > { %v4076_v15 = vpop.f32.mrf.mxu0  ;;  %6810 = vmatprep.subr.mxu0 %v6324_v47  ;;  %5056 = vmatprep.mubr.f32.mxu1 %v9903_v27  ;;  %v6321_v27 = vld [vmem:[%s10379_s11 + $0x598] sm:$0xff] }
 0xe33   : > { %v6560_v52 = vpop.f32.mrf.mxu1  ;;  %4886 = vmatprep.mubr.f32.mxu0 %v4076_v15  ;;  %6811 = vmatpush3.msra.mxu0 %v6308_v35 }
 0xe34   : > { %v10006_v54 = vadd.f32 %v6560_v52, %v6559_v58  ;;  %v4080_v59 = vpop.f32.mrf.mxu0  ;;  %4887 = vmatmul.mubr.f32.gmra.mxu0 %v4074_v50  ;;  %6812 = vmatprep.subr.mxu0 %v6323_v11 }
 0xe35   : > { %v6562_v25 = vpop.f32.mrf.mxu1  ;;  %6813 = vmatpush3.msra.mxu0 %v6307_v51  ;;  %5057 = vmatmul.mubr.f32.gmra.mxu1 %v9895_v23  ;;  %v6304_v23 = vld [vmem:[%s10379_s11 + $0x510] sm:$0xff] }
 0xe36   : > { %v4082_v60 = vpop.f32.mrf.mxu0  ;;  %6814 = vmatprep.subr.mxu0 %v6322_v21  ;;  %5061 = vmatprep.mubr.f32.mxu1 %v9913_v55  ;;  %v6319_v55 = vld [vmem:[%s10379_s11 + $0x588] sm:$0xff] }
 0xe37   : > { %v6563_v61 = vpop.f32.mrf.mxu1  ;;  %4891 = vmatprep.mubr.f32.mxu0 %v4082_v60  ;;  %6815 = vmatpush3.msra.mxu0 %v6306_v7 }
 0xe38   : > { %v10022_v36 = vadd.f32 %v6563_v61, %v6562_v25  ;;  %v4086_v41 = vpop.f32.mrf.mxu0  ;;  %4892 = vmatmul.mubr.f32.gmra.mxu0 %v4080_v59  ;;  %6816 = vmatprep.subr.mxu0 %v6321_v27 }
 0xe39   : > { %6817 = vmatpush3.msra.mxu0 %v6305_v28  ;;  %5062 = vmatmul.mubr.f32.gmra.mxu1 %v9911_v29  ;;  %v6302_v29 = vld [vmem:[%s10379_s11 + $0x500] sm:$0xff]  ;;  %v10059_v21 = vpop.f32.mrf.mxu1  ;;  %s7696_s11 = scalar_lea.vmem %s7695_s10, 128 }
 0xe3a   : > { %v4088_v63 = vpop.f32.mrf.mxu0  ;;  %6818 = vmatprep.subr.mxu0 %v6320_v30  ;;  %5066 = vmatprep.mubr.f32.mxu1 %v9917_v1  ;;  %p7698_p6 = scmp.lt.s32.totalorder %s7696_s11, %s7690_s8 }
 0xe3b   : > { %4896 = vmatprep.mubr.f32.mxu0 %v4088_v63  ;;  %6819 = vmatpush3.msra.mxu0 %v6304_v23 }
 0xe3c   : > { %v4306_v6 = vpop.f32.mrf.mxu0  ;;  %4897 = vmatmul.mubr.f32.gmra.mxu0 %v4086_v41  ;;  %6820 = vmatprep.subr.mxu0 %v6319_v55  ;;  %p7699_p12 = por %p7698_p6, %p7697_p7 }
 0xe3d   : > { %6821 = vmatpush3.msra.mxu0 %v6303_v43  ;;  %5067 = vmatmul.mubr.f32.gmra.mxu1 %v9915_v31  ;;  %v5412_v43 = vld [vmem:[#allocation17 + $0x18] sm:$0xff] }
 0xe3e   : > { %v4308_v40 = vpop.f32.mrf.mxu0  ;;  %6822 = vmatprep.subr.mxu0 %v6318_v44  ;;  %v5411_v44 = vld [vmem:[#allocation17 + $0x10] sm:$0xff]  ;;  %p7700_p5 = pnand %p7699_p12, %p7693_p4 }
 0xe3f   : > { %6823 = vmatpush3.msra.mxu0 %v6302_v29  ;;  %5136 = vmatprep.mubr.f32.mxu0 %v4308_v40  ;;  %v5410_v29 = vld [vmem:[#allocation17 + $0x8] sm:$0xff] }
 0xe40   : > { %v4312_v1 = vpop.f32.mrf.mxu0  ;;  %5137 = vmatmul.mubr.f32.vlgmr.msra.gmra.mxu0 %v4306_v6  ;;  %7182 = vmatprep.subr.mxu0 %v5412_v43 }
 0xe41   : > { %7183 = vmatpush3.msra.mxu0 %v5412_v43 }
 0xe42   : > { %v4314_v42 = vpop.f32.mrf.mxu0  ;;  %7184 = vmatprep.subr.mxu0 %v5411_v44 }
 0xe43   : > { %5141 = vmatprep.mubr.f32.mxu0 %v4314_v42  ;;  %7185 = vmatpush3.msra.mxu0 %v5411_v44 }
 0xe44   : > { %v4318_v56 = vpop.f32.mrf.mxu0  ;;  %5142 = vmatmul.mubr.f32.gmra.mxu0 %v4312_v1  ;;  %7186 = vmatprep.subr.mxu0 %v5410_v29 }
 0xe45   : > { %7187 = vmatpush3.msra.mxu0 %v5410_v29 }
 0xe46   : > { %v4320_v57 = vpop.f32.mrf.mxu0 }
 0xe47   : > { %5146 = vmatprep.mubr.f32.mxu0 %v4320_v57 }
 0xe48   : > { %v4324_v0 = vpop.f32.mrf.mxu0  ;;  %5147 = vmatmul.mubr.f32.gmra.mxu0 %v4318_v56 }
 0xe4a   : > { %v4326_v49 = vpop.f32.mrf.mxu0 }
 0xe4b   : > { %5151 = vmatprep.mubr.f32.mxu0 %v4326_v49 }
 0xe4c   : > { %v4330_v39 = vpop.f32.mrf.mxu0  ;;  %5152 = vmatmul.mubr.f32.gmra.mxu0 %v4324_v0 }
 0xe4e   : > { %v4332_v5 = vpop.f32.mrf.mxu0 }
 0xe4f   : > { %5156 = vmatprep.mubr.f32.mxu0 %v4332_v5 }
 0xe50   : > { %v4336_v31 = vpop.f32.mrf.mxu0  ;;  %5157 = vmatmul.mubr.f32.gmra.mxu0 %v4330_v39 }
 0xe52   : > { %v4338_v53 = vpop.f32.mrf.mxu0 }
 0xe53   : > { %5161 = vmatprep.mubr.f32.mxu0 %v4338_v53 }
 0xe54   : > { %v4342_v8 = vpop.f32.mrf.mxu0  ;;  %5162 = vmatmul.mubr.f32.gmra.mxu0 %v4336_v31 }
 0xe56   : > { %v4344_v38 = vpop.f32.mrf.mxu0 }
 0xe57   : > { %5166 = vmatprep.mubr.f32.mxu0 %v4344_v38 }
 0xe58   : > { %v4348_v62 = vpop.f32.mrf.mxu0  ;;  %5167 = vmatmul.mubr.f32.gmra.mxu0 %v4342_v8 }
 0xe5a   : > { %v4350_v14 = vpop.f32.mrf.mxu0 }
 0xe5b   : > { %5171 = vmatprep.mubr.f32.mxu0 %v4350_v14 }
 0xe5c   : > { %v6600_v3 = vpop.f32.mrf.mxu0  ;;  %5172 = vmatmul.mubr.f32.gmra.mxu0 %v4348_v62 }
 0xe5e   : > { %v6601_v18 = vpop.f32.mrf.mxu0 }
 0xe5f   : > { %v6602_v10 = vadd.f32 %v6601_v18, %v6600_v3 }
 0xe60   : > { %v6603_v19 = vpop.f32.mrf.mxu0 }
 0xe61   : > { %v4654_v32 = vadd.f32 %v6602_v10, %v9926_v45 }
 0xe62   : > { %v6604_v16 = vpop.f32.mrf.mxu0 }
 0xe63   : > { %v6605_v48 = vadd.f32 %v6604_v16, %v6603_v19 }
 0xe64   : > { %v6606_v24 = vpop.f32.mrf.mxu0 }
 0xe65   : > { %v4659_v26 = vadd.f32 %v6605_v48, %v9942_v4 }
 0xe66   : > { %v6607_v2 = vpop.f32.mrf.mxu0 }
 0xe67   : > { %v6608_v20 = vadd.f32 %v6607_v2, %v6606_v24 }
 0xe68   : > { %v6609_v12 = vpop.f32.mrf.mxu0 }
 0xe69   : > { %v10045_v37 = vadd.f32 %v6608_v20, %v9958_v22 }
 0xe6a   : > { %v6610_v34 = vpop.f32.mrf.mxu0 }
 0xe6b   : > { %v6611_v33 = vadd.f32 %v6610_v34, %v6609_v12 }
 0xe6c   : > { %v6612_v13 = vpop.f32.mrf.mxu0 }
 0xe6d   : > { %v10048_v46 = vadd.f32 %v6611_v33, %v9974_v9  ;;  %v10061_v9 = vpop.f32.mrf.mxu1 }
 0xe6e   : > { %v6613_v47 = vpop.f32.mrf.mxu0 }
 0xe6f   : > { %v6614_v50 = vadd.f32 %v6613_v47, %v6612_v13 }
 0xe70   : > { %v6615_v45 = vpop.f32.mrf.mxu0 }
 0xe71   : > { %v10051_v35 = vadd.f32 %v6614_v50, %v9990_v17  ;;  %v5200_v17 = vld [vmem:[%s10299_s17] sm:$0xff] }
 0xe72   : > { %v6616_v58 = vpop.f32.mrf.mxu0  ;;  %7158 = vmatprep.mubr.msk.f32.mxu1 %vm1521_vm7, %v5200_v17 }
 0xe73   : > { %v6617_v4 = vadd.f32 %v6616_v58, %v6615_v45 }
 0xe74   : > { %v6618_v11 = vpop.f32.mrf.mxu0 }
 0xe75   : > { %v10054_v15 = vadd.f32 %v6617_v4, %v10006_v54 }
 0xe76   : > { %v6619_v22 = vpop.f32.mrf.mxu0 }
 0xe77   : > { %v6620_v51 = vadd.f32 %v6619_v22, %v6618_v11 }
 0xe78   : > { %v6621_v42 = vpop.f32.mrf.mxu0 }
 0xe79   : > { %v10057_v52 = vadd.f32 %v6620_v51, %v10022_v36 }
 0xe7a   : > { %v6622_v0 = vpop.f32.mrf.mxu0 }
 0xeb8   : > { %v6656_v59 = vpop.f32.mrf.mxu1 }
 0xeba   : > { %v6657_v7 = vpop.f32.mrf.mxu1 }
 0xebb   : > { %v6658_v25 = vadd.f32 %v6657_v7, %v6656_v59 }
 0xebd   : > { %v4759_v54 = vadd.f32 %v6658_v25, %v4654_v32 }
 0xebe   : > { %v6659_v27 = vpop.f32.mrf.mxu1 }
 0xec0   : > { %v6660_v60 = vpop.f32.mrf.mxu1 }
 0xec1   : > { %v6661_v28 = vadd.f32 %v6660_v60, %v6659_v27 }
 0xec3   : > { %v4764_v61 = vadd.f32 %v6661_v28, %v4659_v26 }
 0xec4   : > { %v6662_v30 = vpop.f32.mrf.mxu1 }
 0xec6   : > { %v6663_v36 = vpop.f32.mrf.mxu1 }
 0xec7   : > { %v6664_v3 = vadd.f32 %v6663_v36, %v6662_v30 }
 0xec9   : > { %v4769_v48 = vadd.f32 %v6664_v3, %v10045_v37 }
 0xeca   : > { %v10067_v41 = vpop.f32.mrf.mxu1 }
 0xecc   : > { %v10069_v23 = vpop.f32.mrf.mxu1 }
 0xed0   : > { %v10071_v55 = vpop.f32.mrf.mxu1 }
 0xed2   : > { %v10073_v63 = vpop.f32.mrf.mxu1 }
 0xed4   : > { %v10075_v6 = vpop.f32.mrf.mxu1 }
 0xed6   : > { %v10077_v40 = vpop.f32.mrf.mxu1 }
 0xed8   : > { %v6674_v1 = vpop.f32.mrf.mxu1 }
 0xeda   : > { %v6675_v56 = vpop.f32.mrf.mxu1 }
 0xedc   : > { %v6677_v57 = vpop.f32.mrf.mxu1 }
 0xede   : > { %v6678_v49 = vpop.f32.mrf.mxu1 }
 0xee0   : > { %v6712_v39 = vpop.f32.mrf.mxu0  ;;  %v10079_v5 = vpop.f32.mrf.mxu1 }
 0xee1   : > { %10380 = vst [vmem:[#allocation34_spill] sm:$0xff] %v10079_v5 }
 0xee2   : > { %v6713_v31 = vpop.f32.mrf.mxu0  ;;  %v10081_v38 = vpop.f32.mrf.mxu1 }
 0xee3   : > { %v6714_v53 = vadd.f32 %v6713_v31, %v6712_v39  ;;  %10381 = vst [vmem:[#allocation35_spill] sm:$0xff] %v10081_v38  ;;  %v6673_v38 = vadd.f32 %v10077_v40, %v10075_v6 }
 0xee4   : > { %v6715_v8 = vpop.f32.mrf.mxu0 }
 0xee5   : > { %v10083_v62 = vadd.f32 %v6714_v53, %v4759_v54  ;;  %v10085_v19 = vpop.f32.mrf.mxu1  ;;  %v4784_v6 = vadd.f32 %v6673_v38, %v10054_v15 }
 0xee6   : > { %v6716_v14 = vpop.f32.mrf.mxu0 }
 0xee7   : > { %10382 = vst [vmem:[#allocation36_spill] sm:$0xff] %v10083_v62  ;;  %v6717_v18 = vadd.f32 %v6716_v14, %v6715_v8  ;;  %v10092_v2 = vpop.f32.mrf.mxu1  ;;  %v6623_v14 = vadd.f32 %v6622_v0, %v6621_v42  ;;  %v6670_v42 = vadd.f32 %v10073_v63, %v10071_v55 }
 0xee8   : > { %v6718_v10 = vpop.f32.mrf.mxu0  ;;  %10384 = vst [vmem:[#allocation38_spill] sm:$0xff] %v10092_v2 }
 0xee9   : > { %v10087_v32 = vadd.f32 %v6717_v18, %v4764_v61  ;;  %v10098_v33 = vpop.f32.mrf.mxu1 }
 0xeea   : > { %v6719_v16 = vpop.f32.mrf.mxu0 }
 0xeeb   : > { %10383 = vst [vmem:[#allocation37_spill] sm:$0xff] %v10087_v32  ;;  %v6720_v24 = vadd.f32 %v6719_v16, %v6718_v10  ;;  %v10100_v50 = vpop.f32.mrf.mxu1  ;;  %v6567_v10 = vadd.f32 %v10061_v9, %v10059_v21  ;;  %v6676_v16 = vadd.f32 %v6675_v56, %v6674_v1 }
 0xeec   : > { %v10090_v26 = vpop.f32.mrf.mxu0 }
 0xeed   : > { %v10094_v20 = vadd.f32 %v6720_v24, %v4769_v48  ;;  %v6777_v4 = vpop.f32.mrf.mxu1  ;;  %v6679_v48 = vadd.f32 %v6678_v49, %v6677_v57  ;;  %v4689_v32 = vadd.f32 %v6623_v14, %v6567_v10  ;;  %v4789_v9 = vadd.f32 %v6676_v16, %v10057_v52 }
 0xeee   : > { %v10096_v12 = vpop.f32.mrf.mxu0 }
 0xeef   : > { %10385 = vst [vmem:[#allocation39_spill] sm:$0xff] %v10094_v20  ;;  %v6778_v22 = vpop.f32.mrf.mxu1  ;;  %v6667_v20 = vadd.f32 %v10069_v23, %v10067_v41  ;;  %v4794_v1 = vadd.f32 %v6679_v48, %v4689_v32  ;;  %v6723_v52 = vadd.f32 %v10096_v12, %v10090_v26  ;;  %v10388_v26 = vld [vmem:[#allocation38_spill] sm:$0xff] }
 0xef0   : > { %v6724_v34 = vpop.f32.mrf.mxu0  ;;  %v6773_v12 = vadd.f32 %v10388_v26, %v10085_v19 }
 0xef1   : > { %v6780_v59 = vpop.f32.mrf.mxu1  ;;  %v4774_v15 = vadd.f32 %v6667_v20, %v10048_v46  ;;  %v10391_v20 = vld [vmem:[#allocation34_spill] sm:$0xff] }
 0xef2   : > { %v6725_v13 = vpop.f32.mrf.mxu0 }
 0xef3   : > { %v6781_v54 = vpop.f32.mrf.mxu1  ;;  %v6726_v40 = vadd.f32 %v6725_v13, %v6724_v34  ;;  %v6334_v34 = vld [vmem:[#allocation11] ss:$0 sm:$0xff] }
 0xef4   : > { %v6727_v47 = vpop.f32.mrf.mxu0 }
 0xef5   : > { %v6783_v28 = vpop.f32.mrf.mxu1 }
 0xef6   : > { %v6728_v45 = vpop.f32.mrf.mxu0 }
 0xef7   : > { %v6784_v36 = vpop.f32.mrf.mxu1  ;;  %v6729_v56 = vadd.f32 %v6728_v45, %v6727_v47  ;;  %v6779_v47 = vadd.f32 %v6778_v22, %v6777_v4 }
 0xef8   : > { %v6730_v58 = vpop.f32.mrf.mxu0  ;;  %v6785_v57 = vadd.f32 %v6784_v36, %v6783_v28 }
 0xef9   : > { %v6786_v29 = vpop.f32.mrf.mxu1  ;;  %v4889_v32 = vadd.f32 %v6729_v56, %v4784_v6  ;;  %v5207_v56 = vld [vmem:[%s10299_s17 + $0x38] sm:$0xff]  ;;  %v5214_v6 = vld [vmem:[%s10299_s17 + $0x70] sm:$0xff] }
 0xefa   : > { %v6731_v37 = vpop.f32.mrf.mxu0 }
 0xefb   : > { %v6787_v53 = vpop.f32.mrf.mxu1  ;;  %v6732_v5 = vadd.f32 %v6731_v37, %v6730_v58  ;;  %v6782_v37 = vadd.f32 %v6781_v54, %v6780_v59  ;;  %v4879_v54 = vadd.f32 %v6723_v52, %v4774_v15 }
 0xefc   : > { %v6733_v11 = vpop.f32.mrf.mxu0  ;;  %v6788_v2 = vadd.f32 %v6787_v53, %v6786_v29  ;;  %v10394_v29 = vld [vmem:[#allocation37_spill] sm:$0xff]  ;;  %v10395_v53 = vld [vmem:[#allocation36_spill] sm:$0xff] }
 0xefd   : > { %v6789_v3 = vpop.f32.mrf.mxu1  ;;  %v4894_v58 = vadd.f32 %v6732_v5, %v4789_v9  ;;  %v6776_v5 = vadd.f32 %v10100_v50, %v10098_v33  ;;  %v5205_v9 = vld [vmem:[%s10299_s17 + $0x28] sm:$0xff] }
 0xefe   : > { %v6734_v51 = vpop.f32.mrf.mxu0 }
 0xeff   : > { %v6735_v0 = vadd.f32 %v6734_v51, %v6733_v11  ;;  %v4779_v51 = vadd.f32 %v6670_v42, %v10051_v35  ;;  %v5202_v42 = vld [vmem:[%s10299_s17 + $0x10] sm:$0xff] }
 0xf00   : > { %v10102_v17 = vpop.f32.mrf.mxu0 }
 0xf01   : > { %10386 = vst [vmem:[#allocation40_spill] sm:$0xff] %v10102_v17  ;;  %v4899_v10 = vadd.f32 %v6735_v0, %v4794_v1  ;;  %v4884_v38 = vadd.f32 %v6726_v40, %v4779_v51  ;;  %v5203_v0 = vld [vmem:[%s10299_s17 + $0x18] sm:$0xff]  ;;  %v5206_v1 = vld [vmem:[%s10299_s17 + $0x30] sm:$0xff] }
 0xf02   : > { %v10104_v7 = vpop.f32.mrf.mxu0  ;;  %v5215_v40 = vld [vmem:[%s10299_s17 + $0x78] sm:$0xff] }
 0xf03   : > { %10387 = vst [vmem:[#allocation41_spill] sm:$0xff] %v10104_v7  ;;  %v6790_v7 = vpop.f32.mrf.mxu1 }
 0xf04   : > { %v6827_v25 = vpop.f32.mrf.mxu0  ;;  %v6791_v41 = vadd.f32 %v6790_v7, %v6789_v3 }
 0xf06   : > { %v6828_v27 = vpop.f32.mrf.mxu0 }
 0xf07   : > { %v6829_v13 = vadd.f32 %v6828_v27, %v6827_v25 }
 0xf08   : > { %v6830_v60 = vpop.f32.mrf.mxu0  ;;  %v10389_v4 = vld [vmem:[#allocation40_spill] sm:$0xff] }
 0xf09   : > { %v5144_v50 = vadd.f32 %v6829_v13, %v6773_v12 }
 0xf0a   : > { %v6831_v61 = vpop.f32.mrf.mxu0  ;;  %v10390_v22 = vld [vmem:[#allocation41_spill] sm:$0xff] }
 0xf0b   : > { %v6832_v45 = vadd.f32 %v6831_v61, %v6830_v60  ;;  %v6826_v60 = vadd.f32 %v10390_v22, %v10389_v4 }
 0xf0c   : > { %v6833_v30 = vpop.f32.mrf.mxu0 }
 0xf0d   : > { %v5149_v28 = vadd.f32 %v6832_v45, %v6776_v5 }
 0xf0e   : > { %v6834_v43 = vpop.f32.mrf.mxu0 }
 0xf0f   : > { %v6835_v55 = vadd.f32 %v6834_v43, %v6833_v30  ;;  %v10392_v30 = vld [vmem:[#allocation35_spill] sm:$0xff] }
 0xf10   : > { %v6836_v44 = vpop.f32.mrf.mxu0  ;;  %v6770_v33 = vadd.f32 %v10392_v30, %v10391_v20  ;;  %v10393_v43 = vld [vmem:[#allocation39_spill] sm:$0xff] }
 0xf12   : > { %v6837_v39 = vpop.f32.mrf.mxu0  ;;  %v5139_v36 = vadd.f32 %v6826_v60, %v6770_v33 }
 0xf13   : > { %v6838_v14 = vadd.f32 %v6837_v39, %v6836_v44  ;;  %v5179_v44 = vadd.f32 %v5149_v28, %v10393_v43  ;;  %v5178_v39 = vadd.f32 %v5144_v50, %v10394_v29 }
 0xf14   : > { %v6839_v31 = vpop.f32.mrf.mxu0 }
 0xf15   : > { %v5159_v7 = vadd.f32 %v6838_v14, %v6782_v37  ;;  %v5194_v3 = vadd.f32 %v6334_v34, %v5179_v44  ;;  %v5193_v16 = vadd.f32 %v6334_v34, %v5178_v39  ;;  %v5210_v14 = vld [vmem:[%s10299_s17 + $0x50] sm:$0xff] }
 0xf16   : > { %v6840_v8 = vpop.f32.mrf.mxu0 }
 0xf17   : > { %v6841_v21 = vadd.f32 %v6840_v8, %v6839_v31  ;;  %v5181_v61 = vadd.f32 %v5159_v7, %v4884_v38  ;;  %v5177_v8 = vadd.f32 %v5139_v36, %v10395_v53 }
 0xf18   : > { %v6842_v18 = vpop.f32.mrf.mxu0 }
 0xf19   : > { %v5164_v63 = vadd.f32 %v6841_v21, %v6785_v57  ;;  %v5196_v19 = vadd.f32 %v6334_v34, %v5181_v61  ;;  %v5192_v48 = vadd.f32 %v6334_v34, %v5177_v8  ;;  %v5204_v21 = vld [vmem:[%s10299_s17 + $0x20] sm:$0xff] }
 0xf1a   : > { %v6843_v24 = vpop.f32.mrf.mxu0  ;;  %v5208_v57 = vld [vmem:[%s10299_s17 + $0x40] sm:$0xff] }
 0xf1b   : > { %v6844_v62 = vadd.f32 %v6843_v24, %v6842_v18  ;;  %v5182_v59 = vadd.f32 %v5164_v63, %v4889_v32  ;;  %v5201_v24 = vld [vmem:[%s10299_s17 + $0x8] sm:$0xff] }
 0xf1c   : > { %v6845_v17 = vpop.f32.mrf.mxu0 }
 0xf1d   : > { %v5169_v23 = vadd.f32 %v6844_v62, %v6788_v2  ;;  %v5197_v27 = vadd.f32 %v6334_v34, %v5182_v59 }
 0xf1e   : > { %v6846_v49 = vpop.f32.mrf.mxu0 }
 0xf1f   : > { %v6847_v18 = vadd.f32 %v6846_v49, %v6845_v17  ;;  %v5183_v62 = vadd.f32 %v5169_v23, %v4894_v58  ;;  %v5154_v17 = vadd.f32 %v6835_v55, %v6779_v47  ;;  %v5209_v49 = vld [vmem:[%s10299_s17 + $0x48] sm:$0xff]  ;;  %v5212_v23 = vld [vmem:[%s10299_s17 + $0x60] sm:$0xff] }
 0xf20   : > { %v5409_v58 = vld [vmem:[#allocation17] sm:$0xff] }
 0xf21   : > { %v5174_v11 = vadd.f32 %v6847_v18, %v6791_v41  ;;  %v5198_v46 = vadd.f32 %v6334_v34, %v5183_v62  ;;  %v5180_v25 = vadd.f32 %v5154_v17, %v4879_v54  ;;  %v5211_v41 = vld [vmem:[%s10299_s17 + $0x58] sm:$0xff]  ;;  %v5213_v18 = vld [vmem:[%s10299_s17 + $0x68] sm:$0xff]  ;;  %7188 = vmatprep.subr.mxu0 %v5409_v58 }
 0xf22   : > { %7189 = vmatpush3.msra.mxu0 %v5409_v58 }
 0xf23   : > { %v5184_v2 = vadd.f32 %v5174_v11, %v4899_v10  ;;  %v5195_v31 = vadd.f32 %v6334_v34, %v5180_v25 }
 0xf25   : > { %v5199_v35 = vadd.f32 %v6334_v34, %v5184_v2 }
 0xf27   : > { %7142 = vmatprep.subr.mxu1 %v5199_v35 }
 0xf28   : > { %7143 = vmatpush3.msra.mxu1 %v5199_v35 }
 0xf29   : > { %7144 = vmatprep.subr.mxu1 %v5198_v46 }
 0xf2a   : > { %7145 = vmatpush3.msra.mxu1 %v5198_v46 }
 0xf2b   : > { %7146 = vmatprep.subr.mxu1 %v5197_v27 }
 0xf2c   : > { %7147 = vmatpush3.msra.mxu1 %v5197_v27 }
 0xf2d   : > { %7148 = vmatprep.subr.mxu1 %v5196_v19 }
 0xf2e   : > { %7149 = vmatpush3.msra.mxu1 %v5196_v19 }
 0xf2f   : > { %7150 = vmatprep.subr.mxu1 %v5195_v31 }
 0xf30   : > { %7151 = vmatpush3.msra.mxu1 %v5195_v31 }
 0xf31   : > { %7152 = vmatprep.subr.mxu1 %v5194_v3 }
 0xf32   : > { %7153 = vmatpush3.msra.mxu1 %v5194_v3 }
 0xf33   : > { %7154 = vmatprep.subr.mxu1 %v5193_v16 }
 0xf34   : > { %7155 = vmatpush3.msra.mxu1 %v5193_v16 }
 0xf35   : > { %7156 = vmatprep.subr.mxu1 %v5192_v48 }
 0xf36   : > { %7157 = vmatpush3.msra.mxu1 %v5192_v48 }
 0xf37   : > { %7159 = vmatmul.mubr.msk.f32.vlgmr.msra.gmra.mxu1 %vm1521_vm7, %v5201_v24 }
 0xf38   : > { %7161 = vmatprep.mubr.msk.f32.mxu1 %vm1521_vm7, %v5202_v42 }
 0xf3b   : > { %7162 = vmatmul.mubr.msk.f32.gmra.mxu1 %vm1521_vm7, %v5203_v0 }
 0xf3c   : > { %7164 = vmatprep.mubr.msk.f32.mxu1 %vm1521_vm7, %v5204_v21 }
 0xf3f   : > { %7165 = vmatmul.mubr.msk.f32.gmra.mxu1 %vm1521_vm7, %v5205_v9 }
 0xf40   : > { %7167 = vmatprep.mubr.msk.f32.mxu1 %vm1521_vm7, %v5206_v1 }
 0xf43   : > { %7168 = vmatmul.mubr.msk.f32.gmra.mxu1 %vm1521_vm7, %v5207_v56 }
 0xf44   : > { %7170 = vmatprep.mubr.msk.f32.mxu1 %vm1521_vm7, %v5208_v57 }
 0xf47   : > { %7171 = vmatmul.mubr.msk.f32.gmra.mxu1 %vm1521_vm7, %v5209_v49 }
 0xf48   : > { %7173 = vmatprep.mubr.msk.f32.mxu1 %vm1521_vm7, %v5210_v14 }
 0xf4b   : > { %7174 = vmatmul.mubr.msk.f32.gmra.mxu1 %vm1521_vm7, %v5211_v41 }
 0xf4c   : > { %7176 = vmatprep.mubr.msk.f32.mxu1 %vm1521_vm7, %v5212_v23 }
 0xf4f   : > { %7177 = vmatmul.mubr.msk.f32.gmra.mxu1 %vm1521_vm7, %v5213_v18 }
 0xf50   : > { %7179 = vmatprep.mubr.msk.f32.mxu1 %vm1521_vm7, %v5214_v6 }
 0xf53   : > { %7180 = vmatmul.mubr.msk.f32.gmra.mxu1 %vm1521_vm7, %v5215_v40 }
 0xff7   : > { %v7160_v37 = vpop.f32.mrf.mxu1 }
 0xff9   : > { %v5330_v10 = vpop.f32.mrf.mxu1 }
 0xffa   : > { %7190 = vmatprep.mubr.msk.f32.mxu0 %vm2622_vm11, %v5330_v10 }
 0xffb   : > { %v7163_v55 = vpop.f32.mrf.mxu1  ;;  %7191 = vmatmul.mubr.msk.f32.vlgmr.msra.gmra.mxu0 %vm2622_vm11, %v7160_v37 }
 0xffd   : > { %v5340_v63 = vpop.f32.mrf.mxu1 }
 0xffe   : > { %7193 = vmatprep.mubr.msk.f32.mxu0 %vm2622_vm11, %v5340_v63 }
 0xfff   : > { %v7166_v11 = vpop.f32.mrf.mxu1  ;;  %7194 = vmatmul.mubr.msk.f32.gmra.mxu0 %vm2622_vm11, %v7163_v55 }
0x1001   : > { %v5350_v51 = vpop.f32.mrf.mxu1 }
0x1002   : > { %7196 = vmatprep.mubr.msk.f32.mxu0 %vm2622_vm11, %v5350_v51 }
0x1003   : > { %v7169_v52 = vpop.f32.mrf.mxu1  ;;  %7197 = vmatmul.mubr.msk.f32.gmra.mxu0 %vm2622_vm11, %v7166_v11 }
0x1005   : > { %v5360_v32 = vpop.f32.mrf.mxu1 }
0x1006   : > { %7199 = vmatprep.mubr.msk.f32.mxu0 %vm2622_vm11, %v5360_v32 }
0x1007   : > { %v7172_v47 = vpop.f32.mrf.mxu1  ;;  %7200 = vmatmul.mubr.msk.f32.gmra.mxu0 %vm2622_vm11, %v7169_v52 }
0x1009   : > { %v5370_v45 = vpop.f32.mrf.mxu1 }
0x100a   : > { %7202 = vmatprep.mubr.msk.f32.mxu0 %vm2622_vm11, %v5370_v45 }
0x100b   : > { %v7175_v7 = vpop.f32.mrf.mxu1  ;;  %7203 = vmatmul.mubr.msk.f32.gmra.mxu0 %vm2622_vm11, %v7172_v47 }
0x100d   : > { %v5380_v62 = vpop.f32.mrf.mxu1 }
0x100e   : > { %7205 = vmatprep.mubr.msk.f32.mxu0 %vm2622_vm11, %v5380_v62 }
0x100f   : > { %v7178_v2 = vpop.f32.mrf.mxu1  ;;  %7206 = vmatmul.mubr.msk.f32.gmra.mxu0 %vm2622_vm11, %v7175_v7 }
0x1011   : > { %v5390_v15 = vpop.f32.mrf.mxu1 }
0x1012   : > { %7208 = vmatprep.mubr.msk.f32.mxu0 %vm2622_vm11, %v5390_v15 }
0x1013   : > { %v7181_v38 = vpop.f32.mrf.mxu1  ;;  %7209 = vmatmul.mubr.msk.f32.gmra.mxu0 %vm2622_vm11, %v7178_v2 }
0x1015   : > { %v5400_v5 = vpop.f32.mrf.mxu1 }
0x1016   : > { %7211 = vmatprep.mubr.msk.f32.mxu0 %vm2622_vm11, %v5400_v5 }
0x1017   : > { %7212 = vmatmul.mubr.msk.f32.gmra.mxu0 %vm2622_vm11, %v7181_v38 }
0x1018   : > { %7703 = shalt.err (!%p7700_p5)
}
0x1019   : > { %s7704_s5 = scalar_lea.hbm %s5735_s0, 64  ;;  %s7708_s3 = scalar_lea.hbm %s10399_s7, 128 }
0x101a   : > { %p7705_p8 = scmp.ne.s32.totalorder %s5735_s0, %s7704_s5  ;;  %p7709_p2 = scmp.lt.s32.totalorder %s5735_s0, %s10399_s7 }
0x101b   : > { %p7710_p1 = scmp.lt.s32.totalorder %s7708_s3, %s7704_s5 }
0x101c   : > { %p7706_p11 = pnand %p7705_p8, %p10401_p13 }
0x101d   : > { %p7711_p9 = por %p7710_p1, %p7709_p2 }
0x101e   : > { %p7707_p0 = pneg %p7706_p11 }
0x1020   : > { %p7712_p10 = pnand %p7711_p9, %p7707_p0 }
0x1022   : > { %7715 = shalt.err (!%p7712_p10)
}
0x1023   : > { %7254 = dma.vmem_to_hbm [thread:$0]  (%p10401_p13), %s5738_s4, 64, %s5735_s0, %s5719_s2  }
0x1024   : > { %s6387_s8 = sshll.u32 %s8091_s26, 7  ;;  %s10402_s11 = sld [smem:[#allocation55_spill]] }
0x102a   : > { %s10231_s2 = scalar_lea.vmem %s10402_s11, %s6387_s8 }
0x10bb   : > { %v7192_v34 = vpop.f32.mrf.mxu0 }
0x10bc   : > { %v6368_v13 = vmul.f32 -1.442695, %v7192_v34 }
0x10bd   : > { %v5527_v17 = vpop.f32.mrf.mxu0 }
0x10be   : > { %7366 = vpow2.f32 %v6368_v13  ;;  %v6367_v59 = vmul.f32 -1.442695, %v5527_v17 }
0x10bf   : > { %v7195_v35 = vpop.f32.mrf.mxu0 }
0x10c0   : > { %7368 = vpow2.f32 %v6367_v59  ;;  %v6370_v54 = vmul.f32 -1.442695, %v7195_v35 }
0x10c1   : > { %v5537_v26 = vpop.f32.mrf.mxu0 }
0x10c2   : > { %7370 = vpow2.f32 %v6370_v54  ;;  %v6369_v12 = vmul.f32 -1.442695, %v5537_v26 }
0x10c3   : > { %v7198_v4 = vpop.f32.mrf.mxu0 }
0x10c4   : > { %7372 = vpow2.f32 %v6369_v12  ;;  %v6372_v22 = vmul.f32 -1.442695, %v7198_v4 }
0x10c5   : > { %v5547_v60 = vpop.f32.mrf.mxu0 }
0x10c6   : > { %7374 = vpow2.f32 %v6372_v22  ;;  %v6371_v28 = vmul.f32 -1.442695, %v5547_v60 }
0x10c7   : > { %v7201_v61 = vpop.f32.mrf.mxu0 }
0x10c8   : > { %7376 = vpow2.f32 %v6371_v28  ;;  %v6374_v46 = vmul.f32 -1.442695, %v7201_v61 }
0x10c9   : > { %v5557_v20 = vpop.f32.mrf.mxu0 }
0x10ca   : > { %7378 = vpow2.f32 %v6374_v46  ;;  %v6373_v30 = vmul.f32 -1.442695, %v5557_v20 }
0x10cb   : > { %v7367_v33 = vpop.eup %7366  ;;  %v7204_v50 = vpop.f32.mrf.mxu0 }
0x10cc   : > { %v5655_v25 = vadd.f32 1.0, %v7367_v33  ;;  %7380 = vpow2.f32 %v6373_v30  ;;  %v6376_v27 = vmul.f32 -1.442695, %v7204_v50 }
0x10cd   : > { %v7369_v36 = vpop.eup %7368  ;;  %v5567_v43 = vpop.f32.mrf.mxu0 }
0x10ce   : > { %7382 = vrcp.f32 %v5655_v25  ;;  %v5654_v44 = vadd.f32 1.0, %v7369_v36  ;;  %v6375_v19 = vmul.f32 -1.442695, %v5567_v43 }
0x10cf   : > { %v7371_v29 = vpop.eup %7370  ;;  %7384 = vpow2.f32 %v6376_v27  ;;  %v7207_v39 = vpop.f32.mrf.mxu0 }
0x10d0   : > { %7386 = vrcp.f32 %v5654_v44  ;;  %v5657_v31 = vadd.f32 1.0, %v7371_v29  ;;  %v6378_v53 = vmul.f32 -1.442695, %v7207_v39 }
0x10d1   : > { %v7373_v8 = vpop.eup %7372  ;;  %7388 = vpow2.f32 %v6375_v19  ;;  %v5577_v3 = vpop.f32.mrf.mxu0 }
0x10d2   : > { %7390 = vrcp.f32 %v5657_v31  ;;  %v5656_v16 = vadd.f32 1.0, %v7373_v8  ;;  %v6377_v48 = vmul.f32 -1.442695, %v5577_v3 }
0x10d3   : > { %v7375_v24 = vpop.eup %7374  ;;  %7392 = vpow2.f32 %v6378_v53  ;;  %v7210_v42 = vpop.f32.mrf.mxu0 }
0x10d4   : > { %7394 = vrcp.f32 %v5656_v16  ;;  %v5659_v0 = vadd.f32 1.0, %v7375_v24  ;;  %v6380_v21 = vmul.f32 -1.442695, %v7210_v42 }
0x10d5   : > { %v7377_v9 = vpop.eup %7376  ;;  %7396 = vpow2.f32 %v6377_v48  ;;  %v5587_v1 = vpop.f32.mrf.mxu0 }
0x10d6   : > { %7398 = vrcp.f32 %v5659_v0  ;;  %v5658_v56 = vadd.f32 1.0, %v7377_v9  ;;  %v6379_v57 = vmul.f32 -1.442695, %v5587_v1 }
0x10d7   : > { %v7379_v49 = vpop.eup %7378  ;;  %7400 = vpow2.f32 %v6380_v21  ;;  %v7213_v14 = vpop.f32.mrf.mxu0 }
0x10d8   : > { %7402 = vrcp.f32 %v5658_v56  ;;  %v5661_v41 = vadd.f32 1.0, %v7379_v49  ;;  %v6382_v23 = vmul.f32 -1.442695, %v7213_v14 }
0x10d9   : > { %v7381_v18 = vpop.eup %7380  ;;  %7404 = vpow2.f32 %v6379_v57  ;;  %v5597_v6 = vpop.f32.mrf.mxu0 }
0x10da   : > { %7406 = vrcp.f32 %v5661_v41  ;;  %v5660_v40 = vadd.f32 1.0, %v7381_v18  ;;  %v6381_v58 = vmul.f32 -1.442695, %v5597_v6 }
0x10db   : > { %v7383_v37 = vpop.eup %7382  ;;  %7408 = vpow2.f32 %v6382_v23 }
0x10dc   : > { %v7385_v10 = vpop.eup %7384  ;;  %5703 = vst.msk [vmem:[%s10231_s2 + $0x8] sm:$0xff] %vm1521_vm7, %v7383_v37  ;;  %7410 = vrcp.f32 %v5660_v40 }
0x10dd   : > { %v7387_v55 = vpop.eup %7386  ;;  %v5663_v63 = vadd.f32 1.0, %v7385_v10  ;;  %7412 = vpow2.f32 %v6381_v58 }
0x10de   : > { %v7389_v11 = vpop.eup %7388  ;;  %5702 = vst.msk [vmem:[%s10231_s2] sm:$0xff] %vm1521_vm7, %v7387_v55 }
0x10df   : > { %v7391_v51 = vpop.eup %7390  ;;  %7414 = vrcp.f32 %v5663_v63  ;;  %v5662_v52 = vadd.f32 1.0, %v7389_v11 }
0x10e0   : > { %v7393_v32 = vpop.eup %7392  ;;  %5705 = vst.msk [vmem:[%s10231_s2 + $0x18] sm:$0xff] %vm1521_vm7, %v7391_v51 }
0x10e1   : > { %v7395_v47 = vpop.eup %7394  ;;  %7416 = vrcp.f32 %v5662_v52  ;;  %v5665_v45 = vadd.f32 1.0, %v7393_v32 }
0x10e2   : > { %v7397_v7 = vpop.eup %7396  ;;  %5704 = vst.msk [vmem:[%s10231_s2 + $0x10] sm:$0xff] %vm1521_vm7, %v7395_v47 }
0x10e3   : > { %v7399_v62 = vpop.eup %7398  ;;  %7418 = vrcp.f32 %v5665_v45  ;;  %v5664_v2 = vadd.f32 1.0, %v7397_v7 }
0x10e4   : > { %v7401_v15 = vpop.eup %7400  ;;  %5707 = vst.msk [vmem:[%s10231_s2 + $0x28] sm:$0xff] %vm1521_vm7, %v7399_v62 }
0x10e5   : > { %v7403_v38 = vpop.eup %7402  ;;  %7420 = vrcp.f32 %v5664_v2  ;;  %v5667_v5 = vadd.f32 1.0, %v7401_v15 }
0x10e6   : > { %v7405_v34 = vpop.eup %7404  ;;  %5706 = vst.msk [vmem:[%s10231_s2 + $0x20] sm:$0xff] %vm1521_vm7, %v7403_v38 }
0x10e7   : > { %v7407_v13 = vpop.eup %7406  ;;  %7422 = vrcp.f32 %v5667_v5  ;;  %v5666_v17 = vadd.f32 1.0, %v7405_v34 }
0x10e8   : > { %v7409_v59 = vpop.eup %7408  ;;  %5709 = vst.msk [vmem:[%s10231_s2 + $0x38] sm:$0xff] %vm1521_vm7, %v7407_v13 }
0x10e9   : > { %v7411_v35 = vpop.eup %7410  ;;  %7424 = vrcp.f32 %v5666_v17  ;;  %v5669_v54 = vadd.f32 1.0, %v7409_v59 }
0x10ea   : > { %v7413_v26 = vpop.eup %7412  ;;  %5708 = vst.msk [vmem:[%s10231_s2 + $0x30] sm:$0xff] %vm1521_vm7, %v7411_v35 }
0x10eb   : > { %7426 = vrcp.f32 %v5669_v54  ;;  %v5668_v12 = vadd.f32 1.0, %v7413_v26 }
0x10ec   : > { %v7415_v4 = vpop.eup %7414 }
0x10ed   : > { %5711 = vst.msk [vmem:[%s10231_s2 + $0x48] sm:$0xff] %vm1521_vm7, %v7415_v4  ;;  %7428 = vrcp.f32 %v5668_v12 }
0x10ee   : > { %v7417_v22 = vpop.eup %7416 }
0x10ef   : > { %5710 = vst.msk [vmem:[%s10231_s2 + $0x40] sm:$0xff] %vm1521_vm7, %v7417_v22 }
0x10f0   : > { %v7419_v60 = vpop.eup %7418 }
0x10f1   : > { %5713 = vst.msk [vmem:[%s10231_s2 + $0x58] sm:$0xff] %vm1521_vm7, %v7419_v60 }
0x10f2   : > { %v7421_v28 = vpop.eup %7420 }
0x10f3   : > { %5712 = vst.msk [vmem:[%s10231_s2 + $0x50] sm:$0xff] %vm1521_vm7, %v7421_v28 }
0x10f4   : > { %v7423_v61 = vpop.eup %7422 }
0x10f5   : > { %5715 = vst.msk [vmem:[%s10231_s2 + $0x68] sm:$0xff] %vm1521_vm7, %v7423_v61 }
0x10f6   : > { %v7425_v46 = vpop.eup %7424 }
0x10f7   : > { %5714 = vst.msk [vmem:[%s10231_s2 + $0x60] sm:$0xff] %vm1521_vm7, %v7425_v46 }
0x10f8   : > { %v7427_v20 = vpop.eup %7426 }
0x10f9   : > { %5717 = vst.msk [vmem:[%s10231_s2 + $0x78] sm:$0xff] %vm1521_vm7, %v7427_v20 }
0x10fa   : > { %v7429_v30 = vpop.eup %7428 }
0x10fb   : > { %5716 = vst.msk [vmem:[%s10231_s2 + $0x70] sm:$0xff] %vm1521_vm7, %v7429_v30 }
0x10fc PF: > { %s10403_s26 = sld [smem:[#allocation29_spill]] }
0x10fd   : > { %s10404_s1 = sld [smem:[#allocation27_spill]] }
0x10fe   : > { %s10405_s4 = sld [smem:[#allocation33_spill]] }
0x1102   : > { %p7311_p13 = scmp.ge.s32.totalorder %s10403_s26, 2 }
0x1103   : > { %s5752_s25 = sand.u32 1, %s10404_s1  }
0x1104   : > { %p10406_p3 = scmp.ne.s32.totalorder %s10405_s4, 0  ;;  %s5753_s0 = scalar_lea.sflag [#allocation4], %s5752_s25 }
0x1106   : > { %p7288_p4 = pnand %p7311_p13, %p10406_p3 }
0x1108   : > { %p7289_p7 = pneg %p7288_p4 }
0x110a   : > { %7757 = dma.done.wait (%p7289_p7), %s5753_s0, 64  }
0x110b   : > { %7759 = vsyncadd (%p7289_p7), %s5753_s0, 4294967232  ;;  %s10407_s25 = sld [smem:[#allocation30_spill]]  ;;  %s10410_s4 = smov %s7766_s30 }
0x110c   : > { %s10408_s23 = sld [smem:[#allocation28_spill]] }
0x110d   : > { %s10409_s24 = sld [smem:[#allocation31_spill]] }
0x1111   : > { %p40_p6 = scmp.ge.s32.totalorder %s10407_s25, 4  }
0x1112   : > { %s10411_s30 = smov %s10408_s23 }
0x1113   :  { %42 = sbr.rel (!%p40_p6) target bundleno = 24 (0x18), region = 207 }
0x1118   :  { %5766 = vsyncpa [#allocation3], 1 }
0x1119   :  { %5768 = vsyncpa [#allocation3 + $0x1], 1 }
0x111a   :  { %5769 = vsyncpa [#allocation6], 1 }
0x111b   :  { %5770 = vsyncpa [#allocation9], 1 }
0x111c   :  { %5771 = vsyncpa [#allocation12], 1 }
0x111d   :  { %5772 = vsyncpa [#allocation15], 1 }
0x111e   :  { %5773 = vsyncpa [#allocation18], 1 }
0x111f   :  { %5774 = vsyncpa [#allocation4], 1 }
0x1120   :  { %5776 = vsyncpa [#allocation4 + $0x1], 1 }

</bundles_post_ra>
